<compile_context>
chip_gen: v7x
topology: tpu7x:2x2x1
jax: 0.10.0
libtpu: 0.0.40
codegen_flags: <defaults>
</compile_context>

<pallas_src>
import functools

import jax
import jax.numpy as jnp
from jax.experimental import pallas as pl
from jax.experimental.pallas import tpu as pltpu

_LANE = 128
_ROW_TILE = 512  # pad N to a multiple of this so tiles never degenerate to 128


def _pad_to(v, m):
    return ((v + m - 1) // m) * m


def _pick_tiles(n_pad):
    """n_pad is a multiple of 512; tm = 512, tk = 1024 when it divides n_pad."""
    tm = min(n_pad, _ROW_TILE)
    tk = 1024 if (n_pad >= 1024 and n_pad % 1024 == 0) else min(n_pad, 512)
    return tm, tk


# ---------------------------------------------------------------------------
# Kernel 1: fused per-layer projection  y = x @ [Wl | Wr];  split into
#           xWl (bf16, fed to the aggregation matmul) and self = x@Wr + b (f32).
# ---------------------------------------------------------------------------
def _proj_kernel(x_ref, w_ref, b_ref, xwl_ref, self_ref, *, h_pad):
    y = jnp.dot(x_ref[...], w_ref[...], preferred_element_type=jnp.float32)
    xwl_ref[...] = y[:, :h_pad].astype(xwl_ref.dtype)
    self_ref[...] = (y[:, h_pad:] + b_ref[...]).astype(self_ref.dtype)


def _project(x, w_cat, b):
    n_pad, f_pad = x.shape
    h_pad = b.shape[1]
    tm = min(n_pad, _ROW_TILE)
    grid = (n_pad // tm,)

    kernel = functools.partial(_proj_kernel, h_pad=h_pad)
    return pl.pallas_call(
        kernel,
        out_shape=(jax.ShapeDtypeStruct((n_pad, h_pad), jnp.bfloat16),
                   jax.ShapeDtypeStruct((n_pad, h_pad), jnp.float32)),
        grid=grid,
        in_specs=[
            pl.BlockSpec((tm, f_pad), lambda i: (i, 0)),            # x rows
            pl.BlockSpec((f_pad, 2 * h_pad), lambda i: (0, 0)),     # [Wl | Wr]
            pl.BlockSpec((1, h_pad), lambda i: (0, 0)),             # lin_l bias
        ],
        out_specs=(pl.BlockSpec((tm, h_pad), lambda i: (i, 0)),
                   pl.BlockSpec((tm, h_pad), lambda i: (i, 0))),
        compiler_params=pltpu.CompilerParams(
            dimension_semantics=("parallel",)),
    )(x, w_cat, b)


# ---------------------------------------------------------------------------
# Kernel 2: block-sparse mean aggregation + finalize.
#   acc += A_tile @ xWl_tile          (skipped + DMA-elided for empty A tiles)
#   out  = relu(deg_inv * acc + self)
# ---------------------------------------------------------------------------
def _agg_kernel(mask_ref, effk_ref, a_ref, xwl_ref, dinv_ref, self_ref, o_ref,
                acc_ref, *, nk, apply_relu):
    del effk_ref  # only used by the index_maps
    i = pl.program_id(0)
    k = pl.program_id(1)

    @pl.when(k == 0)
    def _init():
        acc_ref[...] = jnp.zeros_like(acc_ref)

    @pl.when(mask_ref[i * nk + k] != 0)
    def _accumulate():
        acc_ref[...] += jnp.dot(a_ref[...], xwl_ref[...],
                                preferred_element_type=jnp.float32)

    @pl.when(k == nk - 1)
    def _finalize():
        out = acc_ref[...] * dinv_ref[...] + self_ref[...]
        if apply_relu:
            out = jnp.maximum(out, 0.0)
        o_ref[...] = out.astype(o_ref.dtype)


def sage_layer(adj, deg_inv, mask_flat, effk_flat, x, w_cat, b, *, tm, tk,
               apply_relu, out_dtype):
    """One SAGEConv layer on padded, lane-dense operands."""
    n_pad = adj.shape[0]
    h_pad = b.shape[1]
    ni, nk = n_pad // tm, n_pad // tk

    # Projection first (algebraic reorder): everything before ReLU is linear, so
    # deg_inv * (A @ (x@Wl)) + (x@Wr + b)  ==  lin_l(mean agg) + lin_r(x).
    xwl, self_term = _project(x, w_cat, b)

    kernel = functools.partial(_agg_kernel, nk=nk, apply_relu=apply_relu)

    # Data-dependent index maps: for empty tiles return the previous non-empty
    # block index so the A / xWl DMAs are elided (revisit -> no copy).
    def a_map(i, k, mask_ref, effk_ref):
        return (i, effk_ref[i * nk + k])

    def xwl_map(i, k, mask_ref, effk_ref):
        return (effk_ref[i * nk + k], 0)

    def row_map(i, k, mask_ref, effk_ref):
        return (i, 0)

    out_itemsize = jnp.dtype(out_dtype).itemsize
    vmem_needed = (2 * tm * tk * 2            # A double buffer (bf16)
                   + 2 * tk * h_pad * 2       # xWl double buffer (bf16)
                   + 2 * tm * 4               # deg_inv
                   + 2 * tm * h_pad * 4       # self term (f32)
                   + 2 * tm * h_pad * out_itemsize
                   + tm * h_pad * 4)          # acc scratch
    vmem_limit = int(min(max(2 * vmem_needed, 16 << 20), 56 << 20))

    flops = 2 * n_pad * n_pad * h_pad  # dense upper bound (sparse skip is dynamic)
    bytes_accessed = (n_pad * n_pad * 2
                      + n_pad * h_pad * (2 + 4 + out_itemsize)
                      + n_pad * 4)

    return pl.pallas_call(
        kernel,
        out_shape=jax.ShapeDtypeStruct((n_pad, h_pad), out_dtype),
        grid_spec=pltpu.PrefetchScalarGridSpec(
            num_scalar_prefetch=2,
            grid=(ni, nk),
            in_specs=[
                pl.BlockSpec((tm, tk), a_map),        # A tile (edge counts, bf16)
                pl.BlockSpec((tk, h_pad), xwl_map),   # x @ Wl rows (reduction)
                pl.BlockSpec((tm, 1), row_map),       # 1/deg column
                pl.BlockSpec((tm, h_pad), row_map),   # x @ Wr + b rows
            ],
            out_specs=pl.BlockSpec((tm, h_pad), row_map),
            scratch_shapes=[pltpu.VMEM((tm, h_pad), jnp.float32)],
        ),
        compiler_params=pltpu.CompilerParams(
            dimension_semantics=("parallel", "arbitrary"),
            vmem_limit_bytes=vmem_limit),
        cost_estimate=pl.CostEstimate(
            flops=flops, transcendentals=0, bytes_accessed=bytes_accessed),
    )(mask_flat, effk_flat, adj, xwl, deg_inv, self_term)


# ---------------------------------------------------------------------------
# Plain-JAX glue: graph operands (built once per forward, shared by all layers).
# ---------------------------------------------------------------------------
def build_graph_operands(edge_index, n_pad, tm, tk):
    src = edge_index[0].astype(jnp.int32)
    dst = edge_index[1].astype(jnp.int32)

    # Edge-count adjacency (duplicates counted like PyG): one O(E) scatter-add,
    # then a cast.  Counts are small integers, exact in bf16.  Padded rows/cols
    # stay exactly zero, so padding never affects real nodes.
    adj = (jnp.zeros((n_pad, n_pad), jnp.float32)
           .at[dst, src].add(1.0)
           .astype(jnp.bfloat16))

    # In-degree from the edge list (O(E)); 1/deg applied inside the kernel.
    deg = jnp.zeros((n_pad,), jnp.float32).at[dst].add(1.0)
    deg_inv = (1.0 / jnp.maximum(deg, 1.0)).reshape(n_pad, 1)

    # Per-tile occupancy + "effective k" table (last non-empty tile index <= k)
    # for the block-sparse skip / DMA elision in the aggregation kernel.
    ni, nk = n_pad // tm, n_pad // tk
    mask2d = jnp.zeros((ni, nk), jnp.int32).at[dst // tm, src // tk].set(1)
    kk = jax.lax.broadcasted_iota(jnp.int32, (ni, nk), 1)
    effk2d = jnp.maximum(jax.lax.cummax(jnp.where(mask2d > 0, kk, -1), axis=1), 0)

    return adj, deg_inv, mask2d.reshape(-1), effk2d.reshape(-1).astype(jnp.int32)


def _prep_layer(w_l, w_r, b_l):
    """Zero-pad to lane-dense shapes; stack [Wl | Wr] along the output dim."""
    fin, h = w_l.shape
    f_pad = _pad_to(fin, _LANE)
    h_pad = _pad_to(h, _LANE)
    w_cat = (jnp.zeros((f_pad, 2 * h_pad), jnp.float32)
             .at[:fin, :h].set(w_l)
             .at[:fin, h_pad:h_pad + h].set(w_r)
             .astype(jnp.bfloat16))
    b = jnp.zeros((1, h_pad), jnp.float32).at[0, :h].set(b_l.reshape(-1))
    return w_cat, b


def init_sage_params(key, in_ch, out_ch):
    """Deterministic glorot-uniform-style init; weights stored as [in, out]."""
    k1, k2 = jax.random.split(key, 2)
    scale = jnp.sqrt(6.0 / (in_ch + out_ch))
    w_l = jax.random.uniform(k1, (in_ch, out_ch), jnp.float32, -scale, scale)
    w_r = jax.random.uniform(k2, (in_ch, out_ch), jnp.float32, -scale, scale)
    b_l = jnp.zeros((1, out_ch), jnp.float32)
    return (w_l, w_r, b_l)


def init_gnn_params(key, in_channels, hidden_channels):
    k1, k2, k3 = jax.random.split(key, 3)
    return {
        "conv1": init_sage_params(k1, in_channels, hidden_channels),
        "conv2": init_sage_params(k2, hidden_channels, hidden_channels),
        "conv3": init_sage_params(k3, hidden_channels, hidden_channels),
    }


@functools.partial(jax.jit, static_argnames=("num_nodes",))
def gnn_forward(params, x, edge_index, num_nodes):
    in_ch = x.shape[1]
    hidden = params["conv3"][0].shape[1]

    n_pad = _pad_to(max(num_nodes, 1), _ROW_TILE)
    f_pad = _pad_to(in_ch, _LANE)
    tm, tk = _pick_tiles(n_pad)

    adj, deg_inv, mask_flat, effk_flat = build_graph_operands(
        edge_index, n_pad, tm, tk)

    xp = jnp.zeros((n_pad, f_pad), jnp.float32).at[:num_nodes, :in_ch].set(x)
    xp = xp.astype(jnp.bfloat16)

    w1, b1 = _prep_layer(*params["conv1"])
    w2, b2 = _prep_layer(*params["conv2"])
    w3, b3 = _prep_layer(*params["conv3"])

    layer = functools.partial(sage_layer, adj, deg_inv, mask_flat, effk_flat,
                              tm=tm, tk=tk)
    h = layer(xp, w1, b1, apply_relu=True, out_dtype=jnp.bfloat16)
    h = layer(h, w2, b2, apply_relu=True, out_dtype=jnp.bfloat16)
    h = layer(h, w3, b3, apply_relu=False, out_dtype=jnp.float32)
    return h[:num_nodes, :hidden]


if __name__ == "__main__":
    key = jax.random.PRNGKey(0)
    k_x, k_src, k_dst, k_params = jax.random.split(key, 4)

    num_nodes = 16
    in_channels = 32
    hidden_channels = 32
    num_edges = 48

    x = jax.random.normal(k_x, (num_nodes, in_channels), jnp.float32)
    src = jax.random.randint(k_src, (num_edges,), 0, num_nodes, jnp.int32)
    dst = jax.random.randint(k_dst, (num_edges,), 0, num_nodes, jnp.int32)
    edge_index = jnp.stack([src, dst], axis=0)  # [2, E], PyG convention

    params = init_gnn_params(k_params, in_channels, hidden_channels)

    out = gnn_forward(params, x, edge_index, num_nodes)
    out = jax.block_until_ready(out)

    assert out.shape == (num_nodes, hidden_channels)
    assert bool(jnp.all(jnp.isfinite(out)))

    # Pure-JAX f32 reference; tolerance-based (kernels use bf16 MXU inputs).
    def ref_forward(params, x, edge_index):
        adj = (jnp.zeros((num_nodes, num_nodes), jnp.float32)
               .at[edge_index[1], edge_index[0]].add(1.0))
        deg = jnp.maximum(adj.sum(axis=1, keepdims=True), 1.0)
        h = x
        for name, relu in (("conv1", True), ("conv2", True), ("conv3", False)):
            w_l, w_r, b_l = params[name]
            h = (adj @ h) / deg @ w_l + h @ w_r + b_l
            if relu:
                h = jnp.maximum(h, 0.0)
        return h

    ref = ref_forward(params, x, edge_index)
    rel_err = float(jnp.max(jnp.abs(out - ref)) / (jnp.max(jnp.abs(ref)) + 1e-6))
    assert rel_err < 0.05, f"relative error too large: {rel_err}"

    print("KERNEL_OK")
</pallas_src>

<mosaic_0001>
module attributes {stable_mosaic.version = 11 : i64} {
  func.func private @main(%arg0: i32) attributes {dimension_semantics = [#tpu.dimension_semantics<core_parallel>], iteration_bounds = array<i64: 2>, tpu.core_type = #tpu.core_type<sc_scalar_subcore>, window_params = []} {
    return
  }
}

module attributes {stable_mosaic.version = 11 : i64} {
  func.func private @main(%arg0: i32) attributes {dimension_semantics = [#tpu.dimension_semantics<core_parallel>], iteration_bounds = array<i64: 2>, tpu.core_type = #tpu.core_type<sc_scalar_subcore>, window_params = []} {
    return
  }
}

module attributes {stable_mosaic.version = 11 : i64} {
  func.func @_proj_kernel(%arg0: i32, %arg1: memref<512x128xbf16, #tpu.memory_space<vmem>>, %arg2: memref<128x256xbf16, #tpu.memory_space<vmem>>, %arg3: memref<1x128xf32, #tpu.memory_space<vmem>>, %arg4: memref<512x128xbf16, #tpu.memory_space<vmem>>, %arg5: memref<512x128xf32, #tpu.memory_space<vmem>>) attributes {dimension_semantics = [#tpu.dimension_semantics<parallel>], iteration_bounds = array<i64: 1>, scalar_prefetch = 0 : i64, scratch_operands = 0 : i64, tpu.core_type = #tpu.core_type<tc>, window_params = [{transform_indices = @transform_0, window_bounds = array<i64: 512, 128>}, {pipeline_mode = #tpu.pipeline_mode<synchronous>, transform_indices = @transform_1, window_bounds = array<i64: 128, 256>}, {pipeline_mode = #tpu.pipeline_mode<synchronous>, transform_indices = @transform_2, window_bounds = array<i64: 1, 128>}, {transform_indices = @transform_3, window_bounds = array<i64: 512, 128>}, {transform_indices = @transform_4, window_bounds = array<i64: 512, 128>}]} {
    %c0 = arith.constant 0 : index
    %c0_0 = arith.constant 0 : index
    %0 = vector.load %arg1[%c0, %c0_0] : memref<512x128xbf16, #tpu.memory_space<vmem>>, vector<512x128xbf16>
    %c0_1 = arith.constant 0 : index
    %c0_2 = arith.constant 0 : index
    %1 = vector.load %arg2[%c0_1, %c0_2] : memref<128x256xbf16, #tpu.memory_space<vmem>>, vector<128x256xbf16>
    %cst = arith.constant dense<0.000000e+00> : vector<512x256xf32>
    %2 = tpu.matmul %0, %1, %cst {dimension_numbers = #tpu.dot_dimension_numbers<[1], [0], [0], [1], [0, 0, 1, 1], [], []>} : vector<512x128xbf16>, vector<128x256xbf16>, vector<512x256xf32> -> vector<512x256xf32>
    %3 = vector.extract_strided_slice %2 {offsets = [0, 0], sizes = [512, 128], strides = [1, 1]} : vector<512x256xf32> to vector<512x128xf32>
    %4 = arith.truncf %3 : vector<512x128xf32> to vector<512x128xbf16>
    %c0_3 = arith.constant 0 : index
    %c0_4 = arith.constant 0 : index
    %5 = vector.load %arg4[%c0_3, %c0_4] : memref<512x128xbf16, #tpu.memory_space<vmem>>, vector<512x128xbf16>
    tpu.vector_store %arg4[%c0_3, %c0_4], %4 {strides = array<i32>} : memref<512x128xbf16, #tpu.memory_space<vmem>>, vector<512x128xbf16>,
    %6 = vector.extract_strided_slice %2 {offsets = [0, 128], sizes = [512, 128], strides = [1, 1]} : vector<512x256xf32> to vector<512x128xf32>
    %c0_5 = arith.constant 0 : index
    %c0_6 = arith.constant 0 : index
    %7 = vector.load %arg3[%c0_5, %c0_6] : memref<1x128xf32, #tpu.memory_space<vmem>>, vector<1x128xf32>
    %8 = vector.broadcast %7 : vector<1x128xf32> to vector<512x128xf32>
    %9 = arith.addf %6, %8 : vector<512x128xf32>
    %c0_7 = arith.constant 0 : index
    %c0_8 = arith.constant 0 : index
    %10 = vector.load %arg5[%c0_7, %c0_8] : memref<512x128xf32, #tpu.memory_space<vmem>>, vector<512x128xf32>
    tpu.vector_store %arg5[%c0_7, %c0_8], %9 {strides = array<i32>} : memref<512x128xf32, #tpu.memory_space<vmem>>, vector<512x128xf32>,
    return
  }
  func.func @transform_0(%arg0: i32) -> (i32, i32) {
    %c0_i32 = arith.constant 0 : i32
    %c0_i32_0 = arith.constant 0 : i32
    return %arg0, %c0_i32 : i32, i32
  }
  func.func @transform_1(%arg0: i32) -> (i32, i32) {
    %c0_i32 = arith.constant 0 : i32
    %c0_i32_0 = arith.constant 0 : i32
    %c0_i32_1 = arith.constant 0 : i32
    return %c0_i32, %c0_i32_0 : i32, i32
  }
  func.func @transform_2(%arg0: i32) -> (i32, i32) {
    %c0_i32 = arith.constant 0 : i32
    %c0_i32_0 = arith.constant 0 : i32
    %c0_i32_1 = arith.constant 0 : i32
    return %c0_i32, %c0_i32_0 : i32, i32
  }
  func.func @transform_3(%arg0: i32) -> (i32, i32) {
    %c0_i32 = arith.constant 0 : i32
    %c0_i32_0 = arith.constant 0 : i32
    return %arg0, %c0_i32 : i32, i32
  }
  func.func @transform_4(%arg0: i32) -> (i32, i32) {
    %c0_i32 = arith.constant 0 : i32
    %c0_i32_0 = arith.constant 0 : i32
    return %arg0, %c0_i32 : i32, i32
  }
}

module attributes {stable_mosaic.version = 11 : i64} {
  func.func @_agg_kernel(%arg0: i32, %arg1: i32, %arg2: memref<1xi32, #tpu.memory_space<smem>>, %arg3: memref<1xi32, #tpu.memory_space<smem>>, %arg4: memref<512x512xbf16, #tpu.memory_space<vmem>>, %arg5: memref<512x128xbf16, #tpu.memory_space<vmem>>, %arg6: memref<512x1xf32, #tpu.memory_space<vmem>>, %arg7: memref<512x128xf32, #tpu.memory_space<vmem>>, %arg8: memref<512x128xbf16, #tpu.memory_space<vmem>>, %arg9: memref<512x128xf32, #tpu.memory_space<vmem>>) attributes {dimension_semantics = [#tpu.dimension_semantics<parallel>, #tpu.dimension_semantics<arbitrary>], iteration_bounds = array<i64: 1, 1>, scalar_prefetch = 2 : i64, scratch_operands = 1 : i64, tpu.core_type = #tpu.core_type<tc>, window_params = [{transform_indices = @transform_0, window_bounds = array<i64: 512, 512>}, {transform_indices = @transform_1, window_bounds = array<i64: 512, 128>}, {transform_indices = @transform_2, window_bounds = array<i64: 512, 1>}, {transform_indices = @transform_3, window_bounds = array<i64: 512, 128>}, {transform_indices = @transform_4, window_bounds = array<i64: 512, 128>}]} {
    %c0_i32 = arith.constant 0 : i32
    %0 = arith.cmpi eq, %arg1, %c0_i32 : i32
    %1 = arith.extui %0 : i1 to i32
    %c0_i32_0 = arith.constant 0 : i32
    %2 = arith.cmpi ne, %1, %c0_i32_0 : i32
    scf.if %2 {
      %cst = arith.constant 0.000000e+00 : f32
      %13 = vector.broadcast %cst : f32 to vector<512x128xf32>
      %c0 = arith.constant 0 : index
      %c0_5 = arith.constant 0 : index
      %14 = vector.load %arg9[%c0, %c0_5] : memref<512x128xf32, #tpu.memory_space<vmem>>, vector<512x128xf32>
      tpu.vector_store %arg9[%c0, %c0_5], %13 {strides = array<i32>} : memref<512x128xf32, #tpu.memory_space<vmem>>, vector<512x128xf32>,
    } else {
    }
    %c1_i32 = arith.constant 1 : i32
    %3 = arith.muli %arg0, %c1_i32 : i32
    %4 = arith.addi %3, %arg1 : i32
    %5 = arith.index_cast %4 : i32 to index
    %6 = memref.load %arg2[%5] : memref<1xi32, #tpu.memory_space<smem>>
    %c0_i32_1 = arith.constant 0 : i32
    %7 = arith.cmpi ne, %6, %c0_i32_1 : i32
    %8 = arith.extui %7 : i1 to i32
    %c0_i32_2 = arith.constant 0 : i32
    %9 = arith.cmpi ne, %8, %c0_i32_2 : i32
    scf.if %9 {
      %c0 = arith.constant 0 : index
      %c0_5 = arith.constant 0 : index
      %13 = vector.load %arg9[%c0, %c0_5] : memref<512x128xf32, #tpu.memory_space<vmem>>, vector<512x128xf32>
      %c0_6 = arith.constant 0 : index
      %c0_7 = arith.constant 0 : index
      %14 = vector.load %arg4[%c0_6, %c0_7] : memref<512x512xbf16, #tpu.memory_space<vmem>>, vector<512x512xbf16>
      %c0_8 = arith.constant 0 : index
      %c0_9 = arith.constant 0 : index
      %15 = vector.load %arg5[%c0_8, %c0_9] : memref<512x128xbf16, #tpu.memory_space<vmem>>, vector<512x128xbf16>
      %cst = arith.constant dense<0.000000e+00> : vector<512x128xf32>
      %16 = tpu.matmul %14, %15, %cst {dimension_numbers = #tpu.dot_dimension_numbers<[1], [0], [0], [1], [0, 0, 1, 1], [], []>} : vector<512x512xbf16>, vector<512x128xbf16>, vector<512x128xf32> -> vector<512x128xf32>
      %17 = arith.addf %13, %16 : vector<512x128xf32>
      %c0_10 = arith.constant 0 : index
      %c0_11 = arith.constant 0 : index
      %18 = vector.load %arg9[%c0_10, %c0_11] : memref<512x128xf32, #tpu.memory_space<vmem>>, vector<512x128xf32>
      tpu.vector_store %arg9[%c0_10, %c0_11], %17 {strides = array<i32>} : memref<512x128xf32, #tpu.memory_space<vmem>>, vector<512x128xf32>,
    } else {
    }
    %c0_i32_3 = arith.constant 0 : i32
    %10 = arith.cmpi eq, %arg1, %c0_i32_3 : i32
    %11 = arith.extui %10 : i1 to i32
    %c0_i32_4 = arith.constant 0 : i32
    %12 = arith.cmpi ne, %11, %c0_i32_4 : i32
    scf.if %12 {
      %c0 = arith.constant 0 : index
      %c0_5 = arith.constant 0 : index
      %13 = vector.load %arg9[%c0, %c0_5] : memref<512x128xf32, #tpu.memory_space<vmem>>, vector<512x128xf32>
      %c0_6 = arith.constant 0 : index
      %c0_7 = arith.constant 0 : index
      %14 = vector.load %arg6[%c0_6, %c0_7] : memref<512x1xf32, #tpu.memory_space<vmem>>, vector<512x1xf32>
      %15 = vector.broadcast %14 : vector<512x1xf32> to vector<512x128xf32>
      %16 = arith.mulf %13, %15 : vector<512x128xf32>
      %c0_8 = arith.constant 0 : index
      %c0_9 = arith.constant 0 : index
      %17 = vector.load %arg7[%c0_8, %c0_9] : memref<512x128xf32, #tpu.memory_space<vmem>>, vector<512x128xf32>
      %18 = arith.addf %16, %17 : vector<512x128xf32>
      %cst = arith.constant 0.000000e+00 : f32
      %19 = vector.broadcast %cst : f32 to vector<512x128xf32>
      %20 = arith.maximumf %18, %19 : vector<512x128xf32>
      %21 = arith.truncf %20 : vector<512x128xf32> to vector<512x128xbf16>
      %c0_10 = arith.constant 0 : index
      %c0_11 = arith.constant 0 : index
      %22 = vector.load %arg8[%c0_10, %c0_11] : memref<512x128xbf16, #tpu.memory_space<vmem>>, vector<512x128xbf16>
      tpu.vector_store %arg8[%c0_10, %c0_11], %21 {strides = array<i32>} : memref<512x128xbf16, #tpu.memory_space<vmem>>, vector<512x128xbf16>,
    } else {
    }
    return
  }
  func.func @transform_0(%arg0: i32, %arg1: i32, %arg2: memref<1xi32, #tpu.memory_space<smem>>, %arg3: memref<1xi32, #tpu.memory_space<smem>>) -> (i32, i32) {
    %c1_i32 = arith.constant 1 : i32
    %0 = arith.muli %arg0, %c1_i32 : i32
    %1 = arith.addi %0, %arg1 : i32
    %2 = arith.index_cast %1 : i32 to index
    %3 = memref.load %arg3[%2] : memref<1xi32, #tpu.memory_space<smem>>
    %c0_i32 = arith.constant 0 : i32
    return %arg0, %3 : i32, i32
  }
  func.func @transform_1(%arg0: i32, %arg1: i32, %arg2: memref<1xi32, #tpu.memory_space<smem>>, %arg3: memref<1xi32, #tpu.memory_space<smem>>) -> (i32, i32) {
    %c1_i32 = arith.constant 1 : i32
    %0 = arith.muli %arg0, %c1_i32 : i32
    %1 = arith.addi %0, %arg1 : i32
    %2 = arith.index_cast %1 : i32 to index
    %3 = memref.load %arg3[%2] : memref<1xi32, #tpu.memory_space<smem>>
    %c0_i32 = arith.constant 0 : i32
    %c0_i32_0 = arith.constant 0 : i32
    return %3, %c0_i32 : i32, i32
  }
  func.func @transform_2(%arg0: i32, %arg1: i32, %arg2: memref<1xi32, #tpu.memory_space<smem>>, %arg3: memref<1xi32, #tpu.memory_space<smem>>) -> (i32, i32) {
    %c0_i32 = arith.constant 0 : i32
    %c0_i32_0 = arith.constant 0 : i32
    return %arg0, %c0_i32 : i32, i32
  }
  func.func @transform_3(%arg0: i32, %arg1: i32, %arg2: memref<1xi32, #tpu.memory_space<smem>>, %arg3: memref<1xi32, #tpu.memory_space<smem>>) -> (i32, i32) {
    %c0_i32 = arith.constant 0 : i32
    %c0_i32_0 = arith.constant 0 : i32
    return %arg0, %c0_i32 : i32, i32
  }
  func.func @transform_4(%arg0: i32, %arg1: i32, %arg2: memref<1xi32, #tpu.memory_space<smem>>, %arg3: memref<1xi32, #tpu.memory_space<smem>>) -> (i32, i32) {
    %c0_i32 = arith.constant 0 : i32
    %c0_i32_0 = arith.constant 0 : i32
    return %arg0, %c0_i32 : i32, i32
  }
}

module attributes {stable_mosaic.version = 11 : i64} {
  func.func @_agg_kernel(%arg0: i32, %arg1: i32, %arg2: memref<1xi32, #tpu.memory_space<smem>>, %arg3: memref<1xi32, #tpu.memory_space<smem>>, %arg4: memref<512x512xbf16, #tpu.memory_space<vmem>>, %arg5: memref<512x128xbf16, #tpu.memory_space<vmem>>, %arg6: memref<512x1xf32, #tpu.memory_space<vmem>>, %arg7: memref<512x128xf32, #tpu.memory_space<vmem>>, %arg8: memref<512x128xf32, #tpu.memory_space<vmem>>, %arg9: memref<512x128xf32, #tpu.memory_space<vmem>>) attributes {dimension_semantics = [#tpu.dimension_semantics<parallel>, #tpu.dimension_semantics<arbitrary>], iteration_bounds = array<i64: 1, 1>, scalar_prefetch = 2 : i64, scratch_operands = 1 : i64, tpu.core_type = #tpu.core_type<tc>, window_params = [{transform_indices = @transform_0, window_bounds = array<i64: 512, 512>}, {transform_indices = @transform_1, window_bounds = array<i64: 512, 128>}, {transform_indices = @transform_2, window_bounds = array<i64: 512, 1>}, {transform_indices = @transform_3, window_bounds = array<i64: 512, 128>}, {transform_indices = @transform_4, window_bounds = array<i64: 512, 128>}]} {
    %c0_i32 = arith.constant 0 : i32
    %0 = arith.cmpi eq, %arg1, %c0_i32 : i32
    %1 = arith.extui %0 : i1 to i32
    %c0_i32_0 = arith.constant 0 : i32
    %2 = arith.cmpi ne, %1, %c0_i32_0 : i32
    scf.if %2 {
      %cst = arith.constant 0.000000e+00 : f32
      %13 = vector.broadcast %cst : f32 to vector<512x128xf32>
      %c0 = arith.constant 0 : index
      %c0_5 = arith.constant 0 : index
      %14 = vector.load %arg9[%c0, %c0_5] : memref<512x128xf32, #tpu.memory_space<vmem>>, vector<512x128xf32>
      tpu.vector_store %arg9[%c0, %c0_5], %13 {strides = array<i32>} : memref<512x128xf32, #tpu.memory_space<vmem>>, vector<512x128xf32>,
    } else {
    }
    %c1_i32 = arith.constant 1 : i32
    %3 = arith.muli %arg0, %c1_i32 : i32
    %4 = arith.addi %3, %arg1 : i32
    %5 = arith.index_cast %4 : i32 to index
    %6 = memref.load %arg2[%5] : memref<1xi32, #tpu.memory_space<smem>>
    %c0_i32_1 = arith.constant 0 : i32
    %7 = arith.cmpi ne, %6, %c0_i32_1 : i32
    %8 = arith.extui %7 : i1 to i32
    %c0_i32_2 = arith.constant 0 : i32
    %9 = arith.cmpi ne, %8, %c0_i32_2 : i32
    scf.if %9 {
      %c0 = arith.constant 0 : index
      %c0_5 = arith.constant 0 : index
      %13 = vector.load %arg9[%c0, %c0_5] : memref<512x128xf32, #tpu.memory_space<vmem>>, vector<512x128xf32>
      %c0_6 = arith.constant 0 : index
      %c0_7 = arith.constant 0 : index
      %14 = vector.load %arg4[%c0_6, %c0_7] : memref<512x512xbf16, #tpu.memory_space<vmem>>, vector<512x512xbf16>
      %c0_8 = arith.constant 0 : index
      %c0_9 = arith.constant 0 : index
      %15 = vector.load %arg5[%c0_8, %c0_9] : memref<512x128xbf16, #tpu.memory_space<vmem>>, vector<512x128xbf16>
      %cst = arith.constant dense<0.000000e+00> : vector<512x128xf32>
      %16 = tpu.matmul %14, %15, %cst {dimension_numbers = #tpu.dot_dimension_numbers<[1], [0], [0], [1], [0, 0, 1, 1], [], []>} : vector<512x512xbf16>, vector<512x128xbf16>, vector<512x128xf32> -> vector<512x128xf32>
      %17 = arith.addf %13, %16 : vector<512x128xf32>
      %c0_10 = arith.constant 0 : index
      %c0_11 = arith.constant 0 : index
      %18 = vector.load %arg9[%c0_10, %c0_11] : memref<512x128xf32, #tpu.memory_space<vmem>>, vector<512x128xf32>
      tpu.vector_store %arg9[%c0_10, %c0_11], %17 {strides = array<i32>} : memref<512x128xf32, #tpu.memory_space<vmem>>, vector<512x128xf32>,
    } else {
    }
    %c0_i32_3 = arith.constant 0 : i32
    %10 = arith.cmpi eq, %arg1, %c0_i32_3 : i32
    %11 = arith.extui %10 : i1 to i32
    %c0_i32_4 = arith.constant 0 : i32
    %12 = arith.cmpi ne, %11, %c0_i32_4 : i32
    scf.if %12 {
      %c0 = arith.constant 0 : index
      %c0_5 = arith.constant 0 : index
      %13 = vector.load %arg9[%c0, %c0_5] : memref<512x128xf32, #tpu.memory_space<vmem>>, vector<512x128xf32>
      %c0_6 = arith.constant 0 : index
      %c0_7 = arith.constant 0 : index
      %14 = vector.load %arg6[%c0_6, %c0_7] : memref<512x1xf32, #tpu.memory_space<vmem>>, vector<512x1xf32>
      %15 = vector.broadcast %14 : vector<512x1xf32> to vector<512x128xf32>
      %16 = arith.mulf %13, %15 : vector<512x128xf32>
      %c0_8 = arith.constant 0 : index
      %c0_9 = arith.constant 0 : index
      %17 = vector.load %arg7[%c0_8, %c0_9] : memref<512x128xf32, #tpu.memory_space<vmem>>, vector<512x128xf32>
      %18 = arith.addf %16, %17 : vector<512x128xf32>
      %c0_10 = arith.constant 0 : index
      %c0_11 = arith.constant 0 : index
      %19 = vector.load %arg8[%c0_10, %c0_11] : memref<512x128xf32, #tpu.memory_space<vmem>>, vector<512x128xf32>
      tpu.vector_store %arg8[%c0_10, %c0_11], %18 {strides = array<i32>} : memref<512x128xf32, #tpu.memory_space<vmem>>, vector<512x128xf32>,
    } else {
    }
    return
  }
  func.func @transform_0(%arg0: i32, %arg1: i32, %arg2: memref<1xi32, #tpu.memory_space<smem>>, %arg3: memref<1xi32, #tpu.memory_space<smem>>) -> (i32, i32) {
    %c1_i32 = arith.constant 1 : i32
    %0 = arith.muli %arg0, %c1_i32 : i32
    %1 = arith.addi %0, %arg1 : i32
    %2 = arith.index_cast %1 : i32 to index
    %3 = memref.load %arg3[%2] : memref<1xi32, #tpu.memory_space<smem>>
    %c0_i32 = arith.constant 0 : i32
    return %arg0, %3 : i32, i32
  }
  func.func @transform_1(%arg0: i32, %arg1: i32, %arg2: memref<1xi32, #tpu.memory_space<smem>>, %arg3: memref<1xi32, #tpu.memory_space<smem>>) -> (i32, i32) {
    %c1_i32 = arith.constant 1 : i32
    %0 = arith.muli %arg0, %c1_i32 : i32
    %1 = arith.addi %0, %arg1 : i32
    %2 = arith.index_cast %1 : i32 to index
    %3 = memref.load %arg3[%2] : memref<1xi32, #tpu.memory_space<smem>>
    %c0_i32 = arith.constant 0 : i32
    %c0_i32_0 = arith.constant 0 : i32
    return %3, %c0_i32 : i32, i32
  }
  func.func @transform_2(%arg0: i32, %arg1: i32, %arg2: memref<1xi32, #tpu.memory_space<smem>>, %arg3: memref<1xi32, #tpu.memory_space<smem>>) -> (i32, i32) {
    %c0_i32 = arith.constant 0 : i32
    %c0_i32_0 = arith.constant 0 : i32
    return %arg0, %c0_i32 : i32, i32
  }
  func.func @transform_3(%arg0: i32, %arg1: i32, %arg2: memref<1xi32, #tpu.memory_space<smem>>, %arg3: memref<1xi32, #tpu.memory_space<smem>>) -> (i32, i32) {
    %c0_i32 = arith.constant 0 : i32
    %c0_i32_0 = arith.constant 0 : i32
    return %arg0, %c0_i32 : i32, i32
  }
  func.func @transform_4(%arg0: i32, %arg1: i32, %arg2: memref<1xi32, #tpu.memory_space<smem>>, %arg3: memref<1xi32, #tpu.memory_space<smem>>) -> (i32, i32) {
    %c0_i32 = arith.constant 0 : i32
    %c0_i32_0 = arith.constant 0 : i32
    return %arg0, %c0_i32 : i32, i32
  }
}

</mosaic_0001>

<bundles_post_ra>
// kernel: gnn_forward.6
= control target key start
LH: loop header
LB: loop body
LE: loop exit
PB: predicated region body
PF: predicated region fallthrough
CT: control target
= control target key end

     0   :  { %v1626_v1 = vmov 0   ;;  %s2185_s1 = inlined_call_operand.vmem [shape: bf16[128,256], index: 1, kind: input, shape index: {}]   ;;  %s2186_s0 = inlined_call_operand.vmem [shape: bf16[512,128], index: 0, kind: input, shape index: {}]   ;;  %s2187_s2 = inlined_call_operand.vmem [shape: f32[1,128], index: 2, kind: input, shape index: {}]   ;;  %s2188_s4 = inlined_call_operand.vmem [shape: f32[512,128], index: 4, kind: output, shape index: {1}]   ;;  %s2189_s3 = inlined_call_operand.vmem [shape: bf16[512,128], index: 3, kind: output, shape index: {0}]  }
   0x1   :  { %v1570_v0 = vld [vmem:[%s2185_s1 + $0x4] ss:$8 sps:$4 sm:$0xff]   ;;  %401 = vmatprep.mubr.bf16.mxu0 %v1626_v1  ;;  %561 = vmatprep.mubr.bf16.mxu1 %v1626_v1  ;;  %v1572_v2 = vld [vmem:[%s2185_s1] ss:$8 sps:$4 sm:$0xff]   ;;  %v1573_v3 = vld [vmem:[%s2185_s1 + $0x14] ss:$8 sps:$4 sm:$0xff]  }
   0x2   :  { %369 = vmatprep.subr.bf16.mxu0 %v1570_v0  ;;  %1553 = vmatprep.subr.bf16.mxu1 %v1570_v0  ;;  %v1575_v4 = vld [vmem:[%s2185_s1 + $0x10] ss:$8 sps:$4 sm:$0xff]   ;;  %v1576_v5 = vld [vmem:[%s2185_s1 + $0x24] ss:$8 sps:$4 sm:$0xff]   ;;  %v1578_v6 = vld [vmem:[%s2185_s1 + $0x20] ss:$8 sps:$4 sm:$0xff]  }
   0x3   :  { %370 = vmatpush1.bf16.msra.mxu0 %v1572_v2  ;;  %1561 = vmatpush1.bf16.msra.mxu1 %v1572_v2  ;;  %v1579_v7 = vld [vmem:[%s2185_s1 + $0x34] ss:$8 sps:$4 sm:$0xff]   ;;  %v1581_v8 = vld [vmem:[%s2185_s1 + $0x30] ss:$8 sps:$4 sm:$0xff]   ;;  %v1582_v9 = vld [vmem:[%s2185_s1 + $0x44] ss:$8 sps:$4 sm:$0xff]  }
   0x4   :  { %371 = vmatprep.subr.bf16.mxu0 %v1573_v3  ;;  %1554 = vmatprep.subr.bf16.mxu1 %v1573_v3  ;;  %v1584_v10 = vld [vmem:[%s2185_s1 + $0x40] ss:$8 sps:$4 sm:$0xff]   ;;  %v1585_v11 = vld [vmem:[%s2185_s1 + $0x54] ss:$8 sps:$4 sm:$0xff]   ;;  %v1587_v12 = vld [vmem:[%s2185_s1 + $0x50] ss:$8 sps:$4 sm:$0xff]  }
   0x5   :  { %v1588_v13 = vld [vmem:[%s2185_s1 + $0x64] ss:$8 sps:$4 sm:$0xff]   ;;  %v1590_v14 = vld [vmem:[%s2185_s1 + $0x60] ss:$8 sps:$4 sm:$0xff]   ;;  %v1591_v15 = vld [vmem:[%s2185_s1 + $0x74] ss:$8 sps:$4 sm:$0xff]  }
   0x6   :  { %v1593_v16 = vld [vmem:[%s2185_s1 + $0x70] ss:$8 sps:$4 sm:$0xff]   ;;  %v1594_v17 = vld [vmem:[%s2186_s0] sm:$0xff]   ;;  %v1596_v19 = vld [vmem:[%s2186_s0 + $0x8] sm:$0xff]  }
   0x7   :  { %372 = vmatpush1.bf16.msra.mxu0 %v1575_v4  ;;  %1562 = vmatpush1.bf16.msra.mxu1 %v1575_v4  ;;  %v1595_v18 = vld [vmem:[%s2186_s0 + $0x80] sm:$0xff]   ;;  %v1597_v20 = vld [vmem:[%s2186_s0 + $0x88] sm:$0xff]   ;;  %v1598_v21 = vld [vmem:[%s2186_s0 + $0x10] sm:$0xff]  }
   0x8   :  { %373 = vmatprep.subr.bf16.mxu0 %v1576_v5  ;;  %1555 = vmatprep.subr.bf16.mxu1 %v1576_v5  ;;  %v1599_v22 = vld [vmem:[%s2186_s0 + $0x90] sm:$0xff]   ;;  %v1600_v23 = vld [vmem:[%s2186_s0 + $0x18] sm:$0xff]   ;;  %v1602_v25 = vld [vmem:[%s2186_s0 + $0x20] sm:$0xff]  }
   0x9   :  { %v1601_v24 = vld [vmem:[%s2186_s0 + $0x98] sm:$0xff]   ;;  %v1603_v26 = vld [vmem:[%s2186_s0 + $0xa0] sm:$0xff]   ;;  %v1604_v27 = vld [vmem:[%s2186_s0 + $0x28] sm:$0xff]  }
   0xa   :  { %v1605_v28 = vld [vmem:[%s2186_s0 + $0xa8] sm:$0xff]   ;;  %v1606_v29 = vld [vmem:[%s2186_s0 + $0x30] sm:$0xff]   ;;  %v1608_v31 = vld [vmem:[%s2186_s0 + $0x38] sm:$0xff]  }
   0xb   :  { %374 = vmatpush1.bf16.msra.mxu0 %v1578_v6  ;;  %1563 = vmatpush1.bf16.msra.mxu1 %v1578_v6  ;;  %v1607_v30 = vld [vmem:[%s2186_s0 + $0xb0] sm:$0xff]   ;;  %v1609_v32 = vld [vmem:[%s2186_s0 + $0xb8] sm:$0xff]   ;;  %v1610_v33 = vld [vmem:[%s2186_s0 + $0x40] sm:$0xff]  }
   0xc   :  { %375 = vmatprep.subr.bf16.mxu0 %v1579_v7  ;;  %1556 = vmatprep.subr.bf16.mxu1 %v1579_v7  ;;  %v1611_v34 = vld [vmem:[%s2186_s0 + $0xc0] sm:$0xff]   ;;  %v1612_v35 = vld [vmem:[%s2186_s0 + $0x48] sm:$0xff]   ;;  %v1614_v37 = vld [vmem:[%s2186_s0 + $0x50] sm:$0xff]  }
   0xd   :  { %v1613_v36 = vld [vmem:[%s2186_s0 + $0xc8] sm:$0xff]   ;;  %v1615_v38 = vld [vmem:[%s2186_s0 + $0xd0] sm:$0xff]   ;;  %v1616_v39 = vld [vmem:[%s2186_s0 + $0x58] sm:$0xff]  }
   0xe   :  { %v1617_v40 = vld [vmem:[%s2186_s0 + $0xd8] sm:$0xff]   ;;  %v1618_v41 = vld [vmem:[%s2186_s0 + $0x60] sm:$0xff]   ;;  %v1620_v43 = vld [vmem:[%s2186_s0 + $0x68] sm:$0xff]  }
   0xf   :  { %376 = vmatpush1.bf16.msra.mxu0 %v1581_v8  ;;  %1564 = vmatpush1.bf16.msra.mxu1 %v1581_v8  ;;  %v1619_v42 = vld [vmem:[%s2186_s0 + $0xe0] sm:$0xff]   ;;  %v1621_v44 = vld [vmem:[%s2186_s0 + $0xe8] sm:$0xff]   ;;  %v1622_v45 = vld [vmem:[%s2186_s0 + $0x70] sm:$0xff]  }
  0x10   :  { %377 = vmatprep.subr.bf16.mxu0 %v1582_v9  ;;  %1557 = vmatprep.subr.bf16.mxu1 %v1582_v9  ;;  %v1623_v46 = vld [vmem:[%s2186_s0 + $0xf0] sm:$0xff]   ;;  %v1624_v47 = vld [vmem:[%s2186_s0 + $0x78] sm:$0xff]   ;;  %v1831_v49 = vld [vmem:[%s2187_s2] ss:$0 sm:$0xff] }
  0x11   :  { %v1625_v48 = vld [vmem:[%s2186_s0 + $0xf8] sm:$0xff]  }
  0x13   :  { %378 = vmatpush1.bf16.msra.mxu0 %v1584_v10  ;;  %1565 = vmatpush1.bf16.msra.mxu1 %v1584_v10 }
  0x14   :  { %379 = vmatprep.subr.bf16.mxu0 %v1585_v11  ;;  %1558 = vmatprep.subr.bf16.mxu1 %v1585_v11 }
  0x17   :  { %380 = vmatpush1.bf16.msra.mxu0 %v1587_v12  ;;  %1566 = vmatpush1.bf16.msra.mxu1 %v1587_v12 }
  0x18   :  { %381 = vmatprep.subr.bf16.mxu0 %v1588_v13  ;;  %1559 = vmatprep.subr.bf16.mxu1 %v1588_v13 }
  0x1b   :  { %382 = vmatpush1.bf16.msra.mxu0 %v1590_v14  ;;  %1567 = vmatpush1.bf16.msra.mxu1 %v1590_v14 }
  0x1c   :  { %383 = vmatprep.subr.bf16.mxu0 %v1591_v15  ;;  %1560 = vmatprep.subr.bf16.mxu1 %v1591_v15 }
  0x1f   :  { %384 = vmatpush1.bf16.msra.mxu0 %v1593_v16  ;;  %1568 = vmatpush1.bf16.msra.mxu1 %v1593_v16 }
  0x22   :  { %402 = vmatmul.mubr.bf16.vlgmr.msra.gmra.mrb[0].mxu0 %v1594_v17  ;;  %562 = vmatmul.mubr.bf16.vlgmr.msra.gmra.mrb[0].mxu1 %v1595_v18 }
  0x23   :  { %411 = vmatprep.mubr.bf16.mxu0 %v1626_v1  ;;  %571 = vmatprep.mubr.bf16.mxu1 %v1626_v1 }
  0x2a   :  { %412 = vmatmul.mubr.bf16.gmra.mrb[4].mxu0 %v1596_v19  ;;  %572 = vmatmul.mubr.bf16.gmra.mrb[4].mxu1 %v1597_v20 }
  0x2b   :  { %421 = vmatprep.mubr.bf16.mxu0 %v1626_v1  ;;  %581 = vmatprep.mubr.bf16.mxu1 %v1626_v1 }
  0x32   :  { %422 = vmatmul.mubr.bf16.gmra.mrb[8].mxu0 %v1598_v21  ;;  %582 = vmatmul.mubr.bf16.gmra.mrb[8].mxu1 %v1599_v22 }
  0x33   :  { %431 = vmatprep.mubr.bf16.mxu0 %v1626_v1  ;;  %591 = vmatprep.mubr.bf16.mxu1 %v1626_v1 }
  0x3a   :  { %432 = vmatmul.mubr.bf16.gmra.mrb[12].mxu0 %v1600_v23  ;;  %592 = vmatmul.mubr.bf16.gmra.mrb[12].mxu1 %v1601_v24 }
  0x3b   :  { %441 = vmatprep.mubr.bf16.mxu0 %v1626_v1  ;;  %601 = vmatprep.mubr.bf16.mxu1 %v1626_v1 }
  0x42   :  { %442 = vmatmul.mubr.bf16.gmra.mrb[16].mxu0 %v1602_v25  ;;  %602 = vmatmul.mubr.bf16.gmra.mrb[16].mxu1 %v1603_v26 }
  0x43   :  { %451 = vmatprep.mubr.bf16.mxu0 %v1626_v1  ;;  %611 = vmatprep.mubr.bf16.mxu1 %v1626_v1 }
  0x4a   :  { %452 = vmatmul.mubr.bf16.gmra.mrb[20].mxu0 %v1604_v27  ;;  %612 = vmatmul.mubr.bf16.gmra.mrb[20].mxu1 %v1605_v28 }
  0x4b   :  { %461 = vmatprep.mubr.bf16.mxu0 %v1626_v1  ;;  %621 = vmatprep.mubr.bf16.mxu1 %v1626_v1 }
  0x52   :  { %462 = vmatmul.mubr.bf16.gmra.mrb[24].mxu0 %v1606_v29  ;;  %622 = vmatmul.mubr.bf16.gmra.mrb[24].mxu1 %v1607_v30 }
  0x53   :  { %471 = vmatprep.mubr.bf16.mxu0 %v1626_v1  ;;  %631 = vmatprep.mubr.bf16.mxu1 %v1626_v1 }
  0x5a   :  { %472 = vmatmul.mubr.bf16.gmra.mrb[28].mxu0 %v1608_v31  ;;  %632 = vmatmul.mubr.bf16.gmra.mrb[28].mxu1 %v1609_v32 }
  0x5b   :  { %481 = vmatprep.mubr.bf16.mxu0 %v1626_v1  ;;  %641 = vmatprep.mubr.bf16.mxu1 %v1626_v1 }
  0x62   :  { %482 = vmatmul.mubr.bf16.gmra.mrb[32].mxu0 %v1610_v33  ;;  %642 = vmatmul.mubr.bf16.gmra.mrb[32].mxu1 %v1611_v34 }
  0x63   :  { %491 = vmatprep.mubr.bf16.mxu0 %v1626_v1  ;;  %651 = vmatprep.mubr.bf16.mxu1 %v1626_v1 }
  0x6a   :  { %492 = vmatmul.mubr.bf16.gmra.mrb[36].mxu0 %v1612_v35  ;;  %652 = vmatmul.mubr.bf16.gmra.mrb[36].mxu1 %v1613_v36 }
  0x6b   :  { %501 = vmatprep.mubr.bf16.mxu0 %v1626_v1  ;;  %661 = vmatprep.mubr.bf16.mxu1 %v1626_v1 }
  0x72   :  { %502 = vmatmul.mubr.bf16.gmra.mrb[40].mxu0 %v1614_v37  ;;  %662 = vmatmul.mubr.bf16.gmra.mrb[40].mxu1 %v1615_v38 }
  0x73   :  { %511 = vmatprep.mubr.bf16.mxu0 %v1626_v1  ;;  %671 = vmatprep.mubr.bf16.mxu1 %v1626_v1 }
  0x7a   :  { %512 = vmatmul.mubr.bf16.gmra.mrb[44].mxu0 %v1616_v39  ;;  %672 = vmatmul.mubr.bf16.gmra.mrb[44].mxu1 %v1617_v40 }
  0x7b   :  { %521 = vmatprep.mubr.bf16.mxu0 %v1626_v1  ;;  %681 = vmatprep.mubr.bf16.mxu1 %v1626_v1 }
  0x82   :  { %522 = vmatmul.mubr.bf16.gmra.mrb[48].mxu0 %v1618_v41  ;;  %682 = vmatmul.mubr.bf16.gmra.mrb[48].mxu1 %v1619_v42 }
  0x83   :  { %531 = vmatprep.mubr.bf16.mxu0 %v1626_v1  ;;  %691 = vmatprep.mubr.bf16.mxu1 %v1626_v1 }
  0x8a   :  { %532 = vmatmul.mubr.bf16.gmra.mrb[52].mxu0 %v1620_v43  ;;  %692 = vmatmul.mubr.bf16.gmra.mrb[52].mxu1 %v1621_v44 }
  0x8b   :  { %541 = vmatprep.mubr.bf16.mxu0 %v1626_v1  ;;  %701 = vmatprep.mubr.bf16.mxu1 %v1626_v1 }
  0x92   :  { %542 = vmatmul.mubr.bf16.gmra.mrb[56].mxu0 %v1622_v45  ;;  %702 = vmatmul.mubr.bf16.gmra.mrb[56].mxu1 %v1623_v46 }
  0x93   :  { %551 = vmatprep.mubr.bf16.mxu0 %v1626_v1  ;;  %711 = vmatprep.mubr.bf16.mxu1 %v1626_v1 }
  0x9a   :  { %552 = vmatmul.mubr.bf16.gmra.mrb[60].mxu0 %v1624_v47  ;;  %712 = vmatmul.mubr.bf16.gmra.mrb[60].mxu1 %v1625_v48 }
  0xf5   :  { %v403_v50 = vpop.f32.mrb[0].mxu0  ;;  %v563_v51 = vpop.f32.mrb[0].mxu1 }
  0xf6   :  { %v405_v52 = vpop.f32.mrb[1].mxu0  ;;  %v565_v53 = vpop.f32.mrb[1].mxu1 }
  0xf7   :  { %v1049_v54 = vadd.f32 %v1831_v49, %v405_v52  ;;  %v1081_v55 = vadd.f32 %v1831_v49, %v565_v53  ;;  %v407_v56 = vpop.f32.mrb[2].mxu0  ;;  %v567_v57 = vpop.f32.mrb[2].mxu1 }
  0xf8   :  { %v1365_v58 = vpack.c.bf16 %v407_v56, %v403_v50  ;;  %v1445_v59 = vpack.c.bf16 %v567_v57, %v563_v51  ;;  %v409_v60 = vpop.f32.mrb[3].mxu0  ;;  %v569_v61 = vpop.f32.mrb[3].mxu1 }
  0xf9   :  { %1113 = vst [vmem:[%s2188_s4] sm:$0xff] %v1049_v54  ;;  %1145 = vst [vmem:[%s2188_s4 + $0x100] sm:$0xff] %v1081_v55  ;;  %v1050_v62 = vadd.f32 %v1831_v49, %v409_v60  ;;  %v1082_v63 = vadd.f32 %v1831_v49, %v569_v61 }
  0xfa   :  { %1366 = vst [vmem:[%s2189_s3] sm:$0xff] %v1365_v58   ;;  %1537 = vst [vmem:[%s2189_s3 + $0x80] sm:$0xff] %v1445_v59  }
  0xfb   :  { %1114 = vst [vmem:[%s2188_s4 + $0x8] sm:$0xff] %v1050_v62  ;;  %1146 = vst [vmem:[%s2188_s4 + $0x108] sm:$0xff] %v1082_v63 }
  0xfd   :  { %v413_v0 = vpop.f32.mrb[4].mxu0  ;;  %v573_v1 = vpop.f32.mrb[4].mxu1 }
  0xfe   :  { %v415_v2 = vpop.f32.mrb[5].mxu0  ;;  %v575_v3 = vpop.f32.mrb[5].mxu1 }
  0xff   :  { %v1051_v4 = vadd.f32 %v1831_v49, %v415_v2  ;;  %v1083_v5 = vadd.f32 %v1831_v49, %v575_v3  ;;  %v417_v6 = vpop.f32.mrb[6].mxu0  ;;  %v577_v7 = vpop.f32.mrb[6].mxu1 }
 0x100   :  { %v1370_v8 = vpack.c.bf16 %v417_v6, %v413_v0  ;;  %v1450_v9 = vpack.c.bf16 %v577_v7, %v573_v1  ;;  %v419_v10 = vpop.f32.mrb[7].mxu0  ;;  %v579_v11 = vpop.f32.mrb[7].mxu1 }
 0x101   :  { %1115 = vst [vmem:[%s2188_s4 + $0x10] sm:$0xff] %v1051_v4  ;;  %1147 = vst [vmem:[%s2188_s4 + $0x110] sm:$0xff] %v1083_v5  ;;  %v1052_v12 = vadd.f32 %v1831_v49, %v419_v10  ;;  %v1084_v13 = vadd.f32 %v1831_v49, %v579_v11 }
 0x102   :  { %1522 = vst [vmem:[%s2189_s3 + $0x8] sm:$0xff] %v1370_v8   ;;  %1538 = vst [vmem:[%s2189_s3 + $0x88] sm:$0xff] %v1450_v9  }
 0x103   :  { %1116 = vst [vmem:[%s2188_s4 + $0x18] sm:$0xff] %v1052_v12  ;;  %1148 = vst [vmem:[%s2188_s4 + $0x118] sm:$0xff] %v1084_v13 }
 0x105   :  { %v423_v14 = vpop.f32.mrb[8].mxu0  ;;  %v583_v15 = vpop.f32.mrb[8].mxu1 }
 0x106   :  { %v425_v16 = vpop.f32.mrb[9].mxu0  ;;  %v585_v17 = vpop.f32.mrb[9].mxu1 }
 0x107   :  { %v1053_v18 = vadd.f32 %v1831_v49, %v425_v16  ;;  %v1085_v19 = vadd.f32 %v1831_v49, %v585_v17  ;;  %v427_v20 = vpop.f32.mrb[10].mxu0  ;;  %v587_v21 = vpop.f32.mrb[10].mxu1 }
 0x108   :  { %v1375_v22 = vpack.c.bf16 %v427_v20, %v423_v14  ;;  %v1455_v23 = vpack.c.bf16 %v587_v21, %v583_v15  ;;  %v429_v24 = vpop.f32.mrb[11].mxu0  ;;  %v589_v25 = vpop.f32.mrb[11].mxu1 }
 0x109   :  { %1117 = vst [vmem:[%s2188_s4 + $0x20] sm:$0xff] %v1053_v18  ;;  %1149 = vst [vmem:[%s2188_s4 + $0x120] sm:$0xff] %v1085_v19  ;;  %v1054_v26 = vadd.f32 %v1831_v49, %v429_v24  ;;  %v1086_v27 = vadd.f32 %v1831_v49, %v589_v25 }
 0x10a   :  { %1523 = vst [vmem:[%s2189_s3 + $0x10] sm:$0xff] %v1375_v22   ;;  %1539 = vst [vmem:[%s2189_s3 + $0x90] sm:$0xff] %v1455_v23  }
 0x10b   :  { %1118 = vst [vmem:[%s2188_s4 + $0x28] sm:$0xff] %v1054_v26  ;;  %1150 = vst [vmem:[%s2188_s4 + $0x128] sm:$0xff] %v1086_v27 }
 0x10d   :  { %v433_v28 = vpop.f32.mrb[12].mxu0  ;;  %v593_v29 = vpop.f32.mrb[12].mxu1 }
 0x10e   :  { %v435_v30 = vpop.f32.mrb[13].mxu0  ;;  %v595_v31 = vpop.f32.mrb[13].mxu1 }
 0x10f   :  { %v1055_v32 = vadd.f32 %v1831_v49, %v435_v30  ;;  %v1087_v33 = vadd.f32 %v1831_v49, %v595_v31  ;;  %v437_v34 = vpop.f32.mrb[14].mxu0  ;;  %v597_v35 = vpop.f32.mrb[14].mxu1 }
 0x110   :  { %v1380_v36 = vpack.c.bf16 %v437_v34, %v433_v28  ;;  %v1460_v37 = vpack.c.bf16 %v597_v35, %v593_v29  ;;  %v439_v38 = vpop.f32.mrb[15].mxu0  ;;  %v599_v39 = vpop.f32.mrb[15].mxu1 }
 0x111   :  { %1119 = vst [vmem:[%s2188_s4 + $0x30] sm:$0xff] %v1055_v32  ;;  %1151 = vst [vmem:[%s2188_s4 + $0x130] sm:$0xff] %v1087_v33  ;;  %v1056_v40 = vadd.f32 %v1831_v49, %v439_v38  ;;  %v1088_v41 = vadd.f32 %v1831_v49, %v599_v39 }
 0x112   :  { %1524 = vst [vmem:[%s2189_s3 + $0x18] sm:$0xff] %v1380_v36   ;;  %1540 = vst [vmem:[%s2189_s3 + $0x98] sm:$0xff] %v1460_v37  }
 0x113   :  { %1120 = vst [vmem:[%s2188_s4 + $0x38] sm:$0xff] %v1056_v40  ;;  %1152 = vst [vmem:[%s2188_s4 + $0x138] sm:$0xff] %v1088_v41 }
 0x115   :  { %v443_v42 = vpop.f32.mrb[16].mxu0  ;;  %v603_v43 = vpop.f32.mrb[16].mxu1 }
 0x116   :  { %v445_v44 = vpop.f32.mrb[17].mxu0  ;;  %v605_v45 = vpop.f32.mrb[17].mxu1 }
 0x117   :  { %v1057_v46 = vadd.f32 %v1831_v49, %v445_v44  ;;  %v1089_v47 = vadd.f32 %v1831_v49, %v605_v45  ;;  %v447_v48 = vpop.f32.mrb[18].mxu0  ;;  %v607_v50 = vpop.f32.mrb[18].mxu1 }
 0x118   :  { %v1385_v51 = vpack.c.bf16 %v447_v48, %v443_v42  ;;  %v1465_v52 = vpack.c.bf16 %v607_v50, %v603_v43  ;;  %v449_v53 = vpop.f32.mrb[19].mxu0  ;;  %v609_v54 = vpop.f32.mrb[19].mxu1 }
 0x119   :  { %1121 = vst [vmem:[%s2188_s4 + $0x40] sm:$0xff] %v1057_v46  ;;  %1153 = vst [vmem:[%s2188_s4 + $0x140] sm:$0xff] %v1089_v47  ;;  %v1058_v55 = vadd.f32 %v1831_v49, %v449_v53  ;;  %v1090_v56 = vadd.f32 %v1831_v49, %v609_v54 }
 0x11a   :  { %1525 = vst [vmem:[%s2189_s3 + $0x20] sm:$0xff] %v1385_v51   ;;  %1541 = vst [vmem:[%s2189_s3 + $0xa0] sm:$0xff] %v1465_v52  }
 0x11b   :  { %1122 = vst [vmem:[%s2188_s4 + $0x48] sm:$0xff] %v1058_v55  ;;  %1154 = vst [vmem:[%s2188_s4 + $0x148] sm:$0xff] %v1090_v56 }
 0x11d   :  { %v453_v57 = vpop.f32.mrb[20].mxu0  ;;  %v613_v58 = vpop.f32.mrb[20].mxu1 }
 0x11e   :  { %v455_v59 = vpop.f32.mrb[21].mxu0  ;;  %v615_v60 = vpop.f32.mrb[21].mxu1 }
 0x11f   :  { %v1059_v61 = vadd.f32 %v1831_v49, %v455_v59  ;;  %v1091_v62 = vadd.f32 %v1831_v49, %v615_v60  ;;  %v457_v63 = vpop.f32.mrb[22].mxu0  ;;  %v617_v0 = vpop.f32.mrb[22].mxu1 }
 0x120   :  { %v1390_v1 = vpack.c.bf16 %v457_v63, %v453_v57  ;;  %v1470_v2 = vpack.c.bf16 %v617_v0, %v613_v58  ;;  %v459_v3 = vpop.f32.mrb[23].mxu0  ;;  %v619_v4 = vpop.f32.mrb[23].mxu1 }
 0x121   :  { %1123 = vst [vmem:[%s2188_s4 + $0x50] sm:$0xff] %v1059_v61  ;;  %1155 = vst [vmem:[%s2188_s4 + $0x150] sm:$0xff] %v1091_v62  ;;  %v1060_v5 = vadd.f32 %v1831_v49, %v459_v3  ;;  %v1092_v6 = vadd.f32 %v1831_v49, %v619_v4 }
 0x122   :  { %1526 = vst [vmem:[%s2189_s3 + $0x28] sm:$0xff] %v1390_v1   ;;  %1542 = vst [vmem:[%s2189_s3 + $0xa8] sm:$0xff] %v1470_v2  }
 0x123   :  { %1124 = vst [vmem:[%s2188_s4 + $0x58] sm:$0xff] %v1060_v5  ;;  %1156 = vst [vmem:[%s2188_s4 + $0x158] sm:$0xff] %v1092_v6 }
 0x125   :  { %v463_v7 = vpop.f32.mrb[24].mxu0  ;;  %v623_v8 = vpop.f32.mrb[24].mxu1 }
 0x126   :  { %v465_v9 = vpop.f32.mrb[25].mxu0  ;;  %v625_v10 = vpop.f32.mrb[25].mxu1 }
 0x127   :  { %v1061_v11 = vadd.f32 %v1831_v49, %v465_v9  ;;  %v1093_v12 = vadd.f32 %v1831_v49, %v625_v10  ;;  %v467_v13 = vpop.f32.mrb[26].mxu0  ;;  %v627_v14 = vpop.f32.mrb[26].mxu1 }
 0x128   :  { %v1395_v15 = vpack.c.bf16 %v467_v13, %v463_v7  ;;  %v1475_v16 = vpack.c.bf16 %v627_v14, %v623_v8  ;;  %v469_v17 = vpop.f32.mrb[27].mxu0  ;;  %v629_v18 = vpop.f32.mrb[27].mxu1 }
 0x129   :  { %1125 = vst [vmem:[%s2188_s4 + $0x60] sm:$0xff] %v1061_v11  ;;  %1157 = vst [vmem:[%s2188_s4 + $0x160] sm:$0xff] %v1093_v12  ;;  %v1062_v19 = vadd.f32 %v1831_v49, %v469_v17  ;;  %v1094_v20 = vadd.f32 %v1831_v49, %v629_v18 }
 0x12a   :  { %1527 = vst [vmem:[%s2189_s3 + $0x30] sm:$0xff] %v1395_v15   ;;  %1543 = vst [vmem:[%s2189_s3 + $0xb0] sm:$0xff] %v1475_v16  }
 0x12b   :  { %1126 = vst [vmem:[%s2188_s4 + $0x68] sm:$0xff] %v1062_v19  ;;  %1158 = vst [vmem:[%s2188_s4 + $0x168] sm:$0xff] %v1094_v20 }
 0x12d   :  { %v473_v21 = vpop.f32.mrb[28].mxu0  ;;  %v633_v22 = vpop.f32.mrb[28].mxu1 }
 0x12e   :  { %v475_v23 = vpop.f32.mrb[29].mxu0  ;;  %v635_v24 = vpop.f32.mrb[29].mxu1 }
 0x12f   :  { %v1063_v25 = vadd.f32 %v1831_v49, %v475_v23  ;;  %v1095_v26 = vadd.f32 %v1831_v49, %v635_v24  ;;  %v477_v27 = vpop.f32.mrb[30].mxu0  ;;  %v637_v28 = vpop.f32.mrb[30].mxu1 }
 0x130   :  { %v1400_v29 = vpack.c.bf16 %v477_v27, %v473_v21  ;;  %v1480_v30 = vpack.c.bf16 %v637_v28, %v633_v22  ;;  %v479_v31 = vpop.f32.mrb[31].mxu0  ;;  %v639_v32 = vpop.f32.mrb[31].mxu1 }
 0x131   :  { %1127 = vst [vmem:[%s2188_s4 + $0x70] sm:$0xff] %v1063_v25  ;;  %1159 = vst [vmem:[%s2188_s4 + $0x170] sm:$0xff] %v1095_v26  ;;  %v1064_v33 = vadd.f32 %v1831_v49, %v479_v31  ;;  %v1096_v34 = vadd.f32 %v1831_v49, %v639_v32 }
 0x132   :  { %1528 = vst [vmem:[%s2189_s3 + $0x38] sm:$0xff] %v1400_v29   ;;  %1544 = vst [vmem:[%s2189_s3 + $0xb8] sm:$0xff] %v1480_v30  }
 0x133   :  { %1128 = vst [vmem:[%s2188_s4 + $0x78] sm:$0xff] %v1064_v33  ;;  %1160 = vst [vmem:[%s2188_s4 + $0x178] sm:$0xff] %v1096_v34 }
 0x135   :  { %v483_v35 = vpop.f32.mrb[32].mxu0  ;;  %v643_v36 = vpop.f32.mrb[32].mxu1 }
 0x136   :  { %v485_v37 = vpop.f32.mrb[33].mxu0  ;;  %v645_v38 = vpop.f32.mrb[33].mxu1 }
 0x137   :  { %v1065_v39 = vadd.f32 %v1831_v49, %v485_v37  ;;  %v1097_v40 = vadd.f32 %v1831_v49, %v645_v38  ;;  %v487_v41 = vpop.f32.mrb[34].mxu0  ;;  %v647_v42 = vpop.f32.mrb[34].mxu1 }
 0x138   :  { %v1405_v43 = vpack.c.bf16 %v487_v41, %v483_v35  ;;  %v1485_v44 = vpack.c.bf16 %v647_v42, %v643_v36  ;;  %v489_v45 = vpop.f32.mrb[35].mxu0  ;;  %v649_v46 = vpop.f32.mrb[35].mxu1 }
 0x139   :  { %1129 = vst [vmem:[%s2188_s4 + $0x80] sm:$0xff] %v1065_v39  ;;  %1161 = vst [vmem:[%s2188_s4 + $0x180] sm:$0xff] %v1097_v40  ;;  %v1066_v47 = vadd.f32 %v1831_v49, %v489_v45  ;;  %v1098_v48 = vadd.f32 %v1831_v49, %v649_v46 }
 0x13a   :  { %1529 = vst [vmem:[%s2189_s3 + $0x40] sm:$0xff] %v1405_v43   ;;  %1545 = vst [vmem:[%s2189_s3 + $0xc0] sm:$0xff] %v1485_v44  }
 0x13b   :  { %1130 = vst [vmem:[%s2188_s4 + $0x88] sm:$0xff] %v1066_v47  ;;  %1162 = vst [vmem:[%s2188_s4 + $0x188] sm:$0xff] %v1098_v48 }
 0x13d   :  { %v493_v50 = vpop.f32.mrb[36].mxu0  ;;  %v653_v51 = vpop.f32.mrb[36].mxu1 }
 0x13e   :  { %v495_v52 = vpop.f32.mrb[37].mxu0  ;;  %v655_v53 = vpop.f32.mrb[37].mxu1 }
 0x13f   :  { %v1067_v54 = vadd.f32 %v1831_v49, %v495_v52  ;;  %v1099_v55 = vadd.f32 %v1831_v49, %v655_v53  ;;  %v497_v56 = vpop.f32.mrb[38].mxu0  ;;  %v657_v57 = vpop.f32.mrb[38].mxu1 }
 0x140   :  { %v1410_v58 = vpack.c.bf16 %v497_v56, %v493_v50  ;;  %v1490_v59 = vpack.c.bf16 %v657_v57, %v653_v51  ;;  %v499_v60 = vpop.f32.mrb[39].mxu0  ;;  %v659_v61 = vpop.f32.mrb[39].mxu1 }
 0x141   :  { %1131 = vst [vmem:[%s2188_s4 + $0x90] sm:$0xff] %v1067_v54  ;;  %1163 = vst [vmem:[%s2188_s4 + $0x190] sm:$0xff] %v1099_v55  ;;  %v1068_v62 = vadd.f32 %v1831_v49, %v499_v60  ;;  %v1100_v63 = vadd.f32 %v1831_v49, %v659_v61 }
 0x142   :  { %1530 = vst [vmem:[%s2189_s3 + $0x48] sm:$0xff] %v1410_v58   ;;  %1546 = vst [vmem:[%s2189_s3 + $0xc8] sm:$0xff] %v1490_v59  }
 0x143   :  { %1132 = vst [vmem:[%s2188_s4 + $0x98] sm:$0xff] %v1068_v62  ;;  %1164 = vst [vmem:[%s2188_s4 + $0x198] sm:$0xff] %v1100_v63 }
 0x145   :  { %v503_v0 = vpop.f32.mrb[40].mxu0  ;;  %v663_v1 = vpop.f32.mrb[40].mxu1 }
 0x146   :  { %v505_v2 = vpop.f32.mrb[41].mxu0  ;;  %v665_v3 = vpop.f32.mrb[41].mxu1 }
 0x147   :  { %v1069_v4 = vadd.f32 %v1831_v49, %v505_v2  ;;  %v1101_v5 = vadd.f32 %v1831_v49, %v665_v3  ;;  %v507_v6 = vpop.f32.mrb[42].mxu0  ;;  %v667_v7 = vpop.f32.mrb[42].mxu1 }
 0x148   :  { %v1415_v8 = vpack.c.bf16 %v507_v6, %v503_v0  ;;  %v1495_v9 = vpack.c.bf16 %v667_v7, %v663_v1  ;;  %v509_v10 = vpop.f32.mrb[43].mxu0  ;;  %v669_v11 = vpop.f32.mrb[43].mxu1 }
 0x149   :  { %1133 = vst [vmem:[%s2188_s4 + $0xa0] sm:$0xff] %v1069_v4  ;;  %1165 = vst [vmem:[%s2188_s4 + $0x1a0] sm:$0xff] %v1101_v5  ;;  %v1070_v12 = vadd.f32 %v1831_v49, %v509_v10  ;;  %v1102_v13 = vadd.f32 %v1831_v49, %v669_v11 }
 0x14a   :  { %1531 = vst [vmem:[%s2189_s3 + $0x50] sm:$0xff] %v1415_v8   ;;  %1547 = vst [vmem:[%s2189_s3 + $0xd0] sm:$0xff] %v1495_v9  }
 0x14b   :  { %1134 = vst [vmem:[%s2188_s4 + $0xa8] sm:$0xff] %v1070_v12  ;;  %1166 = vst [vmem:[%s2188_s4 + $0x1a8] sm:$0xff] %v1102_v13 }
 0x14d   :  { %v513_v14 = vpop.f32.mrb[44].mxu0  ;;  %v673_v15 = vpop.f32.mrb[44].mxu1 }
 0x14e   :  { %v515_v16 = vpop.f32.mrb[45].mxu0  ;;  %v675_v17 = vpop.f32.mrb[45].mxu1 }
 0x14f   :  { %v1071_v18 = vadd.f32 %v1831_v49, %v515_v16  ;;  %v1103_v19 = vadd.f32 %v1831_v49, %v675_v17  ;;  %v517_v20 = vpop.f32.mrb[46].mxu0  ;;  %v677_v21 = vpop.f32.mrb[46].mxu1 }
 0x150   :  { %v1420_v22 = vpack.c.bf16 %v517_v20, %v513_v14  ;;  %v1500_v23 = vpack.c.bf16 %v677_v21, %v673_v15  ;;  %v519_v24 = vpop.f32.mrb[47].mxu0  ;;  %v679_v25 = vpop.f32.mrb[47].mxu1 }
 0x151   :  { %1135 = vst [vmem:[%s2188_s4 + $0xb0] sm:$0xff] %v1071_v18  ;;  %1167 = vst [vmem:[%s2188_s4 + $0x1b0] sm:$0xff] %v1103_v19  ;;  %v1072_v26 = vadd.f32 %v1831_v49, %v519_v24  ;;  %v1104_v27 = vadd.f32 %v1831_v49, %v679_v25 }
 0x152   :  { %1532 = vst [vmem:[%s2189_s3 + $0x58] sm:$0xff] %v1420_v22   ;;  %1548 = vst [vmem:[%s2189_s3 + $0xd8] sm:$0xff] %v1500_v23  }
 0x153   :  { %1136 = vst [vmem:[%s2188_s4 + $0xb8] sm:$0xff] %v1072_v26  ;;  %1168 = vst [vmem:[%s2188_s4 + $0x1b8] sm:$0xff] %v1104_v27 }
 0x155   :  { %v523_v28 = vpop.f32.mrb[48].mxu0  ;;  %v683_v29 = vpop.f32.mrb[48].mxu1 }
 0x156   :  { %v525_v30 = vpop.f32.mrb[49].mxu0  ;;  %v685_v31 = vpop.f32.mrb[49].mxu1 }
 0x157   :  { %v1073_v32 = vadd.f32 %v1831_v49, %v525_v30  ;;  %v1105_v33 = vadd.f32 %v1831_v49, %v685_v31  ;;  %v527_v34 = vpop.f32.mrb[50].mxu0  ;;  %v687_v35 = vpop.f32.mrb[50].mxu1 }
 0x158   :  { %v1425_v36 = vpack.c.bf16 %v527_v34, %v523_v28  ;;  %v1505_v37 = vpack.c.bf16 %v687_v35, %v683_v29  ;;  %v529_v38 = vpop.f32.mrb[51].mxu0  ;;  %v689_v39 = vpop.f32.mrb[51].mxu1 }
 0x159   :  { %1137 = vst [vmem:[%s2188_s4 + $0xc0] sm:$0xff] %v1073_v32  ;;  %1169 = vst [vmem:[%s2188_s4 + $0x1c0] sm:$0xff] %v1105_v33  ;;  %v1074_v40 = vadd.f32 %v1831_v49, %v529_v38  ;;  %v1106_v41 = vadd.f32 %v1831_v49, %v689_v39 }
 0x15a   :  { %1533 = vst [vmem:[%s2189_s3 + $0x60] sm:$0xff] %v1425_v36   ;;  %1549 = vst [vmem:[%s2189_s3 + $0xe0] sm:$0xff] %v1505_v37  }
 0x15b   :  { %1138 = vst [vmem:[%s2188_s4 + $0xc8] sm:$0xff] %v1074_v40  ;;  %1170 = vst [vmem:[%s2188_s4 + $0x1c8] sm:$0xff] %v1106_v41 }
 0x15d   :  { %v533_v42 = vpop.f32.mrb[52].mxu0  ;;  %v693_v43 = vpop.f32.mrb[52].mxu1 }
 0x15e   :  { %v535_v44 = vpop.f32.mrb[53].mxu0  ;;  %v695_v45 = vpop.f32.mrb[53].mxu1 }
 0x15f   :  { %v1075_v46 = vadd.f32 %v1831_v49, %v535_v44  ;;  %v1107_v47 = vadd.f32 %v1831_v49, %v695_v45  ;;  %v537_v48 = vpop.f32.mrb[54].mxu0  ;;  %v697_v50 = vpop.f32.mrb[54].mxu1 }
 0x160   :  { %v1430_v51 = vpack.c.bf16 %v537_v48, %v533_v42  ;;  %v1510_v52 = vpack.c.bf16 %v697_v50, %v693_v43  ;;  %v539_v53 = vpop.f32.mrb[55].mxu0  ;;  %v699_v54 = vpop.f32.mrb[55].mxu1 }
 0x161   :  { %1139 = vst [vmem:[%s2188_s4 + $0xd0] sm:$0xff] %v1075_v46  ;;  %1171 = vst [vmem:[%s2188_s4 + $0x1d0] sm:$0xff] %v1107_v47  ;;  %v1076_v55 = vadd.f32 %v1831_v49, %v539_v53  ;;  %v1108_v56 = vadd.f32 %v1831_v49, %v699_v54 }
 0x162   :  { %1534 = vst [vmem:[%s2189_s3 + $0x68] sm:$0xff] %v1430_v51   ;;  %1550 = vst [vmem:[%s2189_s3 + $0xe8] sm:$0xff] %v1510_v52  }
 0x163   :  { %1140 = vst [vmem:[%s2188_s4 + $0xd8] sm:$0xff] %v1076_v55  ;;  %1172 = vst [vmem:[%s2188_s4 + $0x1d8] sm:$0xff] %v1108_v56 }
 0x165   :  { %v543_v57 = vpop.f32.mrb[56].mxu0  ;;  %v703_v58 = vpop.f32.mrb[56].mxu1 }
 0x166   :  { %v545_v59 = vpop.f32.mrb[57].mxu0  ;;  %v705_v60 = vpop.f32.mrb[57].mxu1 }
 0x167   :  { %v1077_v61 = vadd.f32 %v1831_v49, %v545_v59  ;;  %v1109_v62 = vadd.f32 %v1831_v49, %v705_v60  ;;  %v547_v63 = vpop.f32.mrb[58].mxu0  ;;  %v707_v0 = vpop.f32.mrb[58].mxu1 }
 0x168   :  { %v1435_v1 = vpack.c.bf16 %v547_v63, %v543_v57  ;;  %v1515_v2 = vpack.c.bf16 %v707_v0, %v703_v58  ;;  %v549_v3 = vpop.f32.mrb[59].mxu0  ;;  %v709_v4 = vpop.f32.mrb[59].mxu1 }
 0x169   :  { %1141 = vst [vmem:[%s2188_s4 + $0xe0] sm:$0xff] %v1077_v61  ;;  %1173 = vst [vmem:[%s2188_s4 + $0x1e0] sm:$0xff] %v1109_v62  ;;  %v1078_v5 = vadd.f32 %v1831_v49, %v549_v3  ;;  %v1110_v6 = vadd.f32 %v1831_v49, %v709_v4 }
 0x16a   :  { %1535 = vst [vmem:[%s2189_s3 + $0x70] sm:$0xff] %v1435_v1   ;;  %1551 = vst [vmem:[%s2189_s3 + $0xf0] sm:$0xff] %v1515_v2  }
 0x16b   :  { %1142 = vst [vmem:[%s2188_s4 + $0xe8] sm:$0xff] %v1078_v5  ;;  %1174 = vst [vmem:[%s2188_s4 + $0x1e8] sm:$0xff] %v1110_v6 }
 0x16d   :  { %v553_v7 = vpop.f32.mrb[60].mxu0  ;;  %v713_v8 = vpop.f32.mrb[60].mxu1 }
 0x16e   :  { %v555_v9 = vpop.f32.mrb[61].mxu0  ;;  %v715_v10 = vpop.f32.mrb[61].mxu1 }
 0x16f   :  { %v1079_v11 = vadd.f32 %v1831_v49, %v555_v9  ;;  %v1111_v12 = vadd.f32 %v1831_v49, %v715_v10  ;;  %v557_v13 = vpop.f32.mrb[62].mxu0  ;;  %v717_v14 = vpop.f32.mrb[62].mxu1 }
 0x170   :  { %v1440_v15 = vpack.c.bf16 %v557_v13, %v553_v7  ;;  %v1520_v16 = vpack.c.bf16 %v717_v14, %v713_v8  ;;  %v559_v17 = vpop.f32.mrb[63].mxu0  ;;  %v719_v18 = vpop.f32.mrb[63].mxu1 }
 0x171   :  { %1143 = vst [vmem:[%s2188_s4 + $0xf0] sm:$0xff] %v1079_v11  ;;  %1175 = vst [vmem:[%s2188_s4 + $0x1f0] sm:$0xff] %v1111_v12  ;;  %v1080_v19 = vadd.f32 %v1831_v49, %v559_v17  ;;  %v1112_v20 = vadd.f32 %v1831_v49, %v719_v18 }
 0x172   :  { %1536 = vst [vmem:[%s2189_s3 + $0x78] sm:$0xff] %v1440_v15   ;;  %1552 = vst [vmem:[%s2189_s3 + $0xf8] sm:$0xff] %v1520_v16  }
 0x173   :  { %1144 = vst [vmem:[%s2188_s4 + $0xf8] sm:$0xff] %v1080_v19  ;;  %1176 = vst [vmem:[%s2188_s4 + $0x1f8] sm:$0xff] %v1112_v20 }

// kernel: gnn_forward.11
= control target key start
LH: loop header
LB: loop body
LE: loop exit
PB: predicated region body
PF: predicated region fallthrough
CT: control target
= control target key end

     0   :  { %v3061_v0 = vmov 0.0   ;;  %s3966_s0 = inlined_call_operand.<no memory space> [shape: s32[1], index: 0, kind: input, shape index: {}]   ;;  %s3967_s1 = inlined_call_operand.<no memory space> [shape: s32[1], index: 1, kind: input, shape index: {}]   ;;  %s3968_s4 = inlined_call_operand.vmem [shape: f32[512,1], index: 4, kind: input, shape index: {}]   ;;  %s3969_s5 = inlined_call_operand.vmem [shape: f32[512,128], index: 5, kind: input, shape index: {}]   ;;  %s3970_s6 = inlined_call_operand.vmem [shape: f32[512,128], index: 6, kind: output, shape index: {}]   ;;  %s3971_s2 = inlined_call_operand.vmem [shape: bf16[512,512], index: 2, kind: input, shape index: {}]   ;;  %s3972_s3 = inlined_call_operand.vmem [shape: bf16[512,128], index: 3, kind: input, shape index: {}]  }
   0x1   :  { %s2667_s23 = sshll.u32 %s3967_s1, 2  ;;  %s2669_s26 = sshll.u32 %s3967_s1, 6  ;;  %80 = vst [vmem:[#allocation2] sm:$0xff] %v3061_v0  ;;  %81 = vst [vmem:[#allocation2 + $0x8] sm:$0xff] %v3061_v0 }
   0x2   :  { %82 = vst [vmem:[#allocation2 + $0x10] sm:$0xff] %v3061_v0  ;;  %83 = vst [vmem:[#allocation2 + $0x18] sm:$0xff] %v3061_v0  ;;  %p58_p0 = scmp.lt.s32.totalorder %s2667_s23, 3  ;;  %p68_p1 = scmp.lt.s32.totalorder %s2669_s26, 63 }
   0x3   :  { %84 = vst [vmem:[#allocation2 + $0x20] sm:$0xff] %v3061_v0  ;;  %85 = vst [vmem:[#allocation2 + $0x28] sm:$0xff] %v3061_v0  ;;  %p2671_p2 = scmp.eq.s32.totalorder %s3966_s0, 0 }
   0x4   :  { %86 = vst [vmem:[#allocation2 + $0x30] sm:$0xff] %v3061_v0  ;;  %87 = vst [vmem:[#allocation2 + $0x38] sm:$0xff] %v3061_v0  ;;  %s3974_s23 = smov (!%p58_p0, %s2667_s23), 3  ;;  %s3976_s26 = smov (!%p68_p1, %s2669_s26), 63 }
   0x5   :  { %88 = vst [vmem:[#allocation2 + $0x40] sm:$0xff] %v3061_v0  ;;  %89 = vst [vmem:[#allocation2 + $0x48] sm:$0xff] %v3061_v0  ;;  %s2668_s11 = sshll.u32 %s3974_s23, 2  ;;  %s2670_s15 = sshll.u32 %s3976_s26, 2  ;;  %v3062_v2 = vmov (!%p2671_p2), 0  }
   0x6   :  { %90 = vst [vmem:[#allocation2 + $0x50] sm:$0xff] %v3061_v0  ;;  %91 = vst [vmem:[#allocation2 + $0x58] sm:$0xff] %v3061_v0  ;;  %s3188_s14 = scalar_lea.vmem %s3971_s2, %s2668_s11  ;;  %s3193_s18 = scalar_lea.vmem %s3972_s3, %s2670_s15  ;;  %1238 = vmatprep.subr.bf16.mxu0 (!%p2671_p2), %v3062_v2  ;;  %1527 = vmatprep.subr.bf16.mxu1 (!%p2671_p2), %v3062_v2 }
   0x7   :  { %92 = vst [vmem:[#allocation2 + $0x60] sm:$0xff] %v3061_v0  ;;  %93 = vst [vmem:[#allocation2 + $0x68] sm:$0xff] %v3061_v0  ;;  %v2835_v1 = vld [vmem:[%s3193_s18] sm:$0xff] (!%p2671_p2)   ;;  %v2837_v4 = vld [vmem:[%s3193_s18 + $0x8] sm:$0xff] (!%p2671_p2)  }
   0x8   :  { %94 = vst [vmem:[#allocation2 + $0x70] sm:$0xff] %v3061_v0  ;;  %95 = vst [vmem:[#allocation2 + $0x78] sm:$0xff] %v3061_v0  ;;  %v2836_v3 = vld [vmem:[%s3193_s18 + $0x80] sm:$0xff] (!%p2671_p2)   ;;  %1239 = vmatpush1.bf16.msra.mxu0 (!%p2671_p2), %v2835_v1  ;;  %v2838_v5 = vld [vmem:[%s3193_s18 + $0x88] sm:$0xff] (!%p2671_p2)  }
   0x9   :  { %96 = vst [vmem:[#allocation2 + $0x80] sm:$0xff] %v3061_v0  ;;  %97 = vst [vmem:[#allocation2 + $0x88] sm:$0xff] %v3061_v0  ;;  %1528 = vmatpush1.bf16.msra.mxu1 (!%p2671_p2), %v2836_v3  ;;  %1240 = vmatprep.subr.bf16.mxu0 (!%p2671_p2), %v3062_v2  ;;  %v2839_v6 = vld [vmem:[%s3193_s18 + $0x10] sm:$0xff] (!%p2671_p2)   ;;  %v2841_v8 = vld [vmem:[%s3193_s18 + $0x18] sm:$0xff] (!%p2671_p2)  }
   0xa   :  { %98 = vst [vmem:[#allocation2 + $0x90] sm:$0xff] %v3061_v0  ;;  %99 = vst [vmem:[#allocation2 + $0x98] sm:$0xff] %v3061_v0  ;;  %1529 = vmatprep.subr.bf16.mxu1 (!%p2671_p2), %v3062_v2  ;;  %v2840_v7 = vld [vmem:[%s3193_s18 + $0x90] sm:$0xff] (!%p2671_p2)   ;;  %v2842_v9 = vld [vmem:[%s3193_s18 + $0x98] sm:$0xff] (!%p2671_p2)  }
   0xb   :  { %100 = vst [vmem:[#allocation2 + $0xa0] sm:$0xff] %v3061_v0  ;;  %101 = vst [vmem:[#allocation2 + $0xa8] sm:$0xff] %v3061_v0  ;;  %v2843_v10 = vld [vmem:[%s3193_s18 + $0x20] sm:$0xff] (!%p2671_p2)   ;;  %v2845_v12 = vld [vmem:[%s3193_s18 + $0x28] sm:$0xff] (!%p2671_p2)  }
   0xc   :  { %102 = vst [vmem:[#allocation2 + $0xb0] sm:$0xff] %v3061_v0  ;;  %103 = vst [vmem:[#allocation2 + $0xb8] sm:$0xff] %v3061_v0  ;;  %1241 = vmatpush1.bf16.msra.mxu0 (!%p2671_p2), %v2837_v4  ;;  %v2844_v11 = vld [vmem:[%s3193_s18 + $0xa0] sm:$0xff] (!%p2671_p2)   ;;  %v2846_v13 = vld [vmem:[%s3193_s18 + $0xa8] sm:$0xff] (!%p2671_p2)  }
   0xd   :  { %104 = vst [vmem:[#allocation2 + $0xc0] sm:$0xff] %v3061_v0  ;;  %105 = vst [vmem:[#allocation2 + $0xc8] sm:$0xff] %v3061_v0  ;;  %1530 = vmatpush1.bf16.msra.mxu1 (!%p2671_p2), %v2838_v5  ;;  %1242 = vmatprep.subr.bf16.mxu0 (!%p2671_p2), %v3062_v2  ;;  %v2847_v14 = vld [vmem:[%s3193_s18 + $0x30] sm:$0xff] (!%p2671_p2)   ;;  %v2849_v16 = vld [vmem:[%s3193_s18 + $0x38] sm:$0xff] (!%p2671_p2)  }
   0xe   :  { %106 = vst [vmem:[#allocation2 + $0xd0] sm:$0xff] %v3061_v0  ;;  %107 = vst [vmem:[#allocation2 + $0xd8] sm:$0xff] %v3061_v0  ;;  %1531 = vmatprep.subr.bf16.mxu1 (!%p2671_p2), %v3062_v2  ;;  %v2848_v15 = vld [vmem:[%s3193_s18 + $0xb0] sm:$0xff] (!%p2671_p2)   ;;  %v2850_v17 = vld [vmem:[%s3193_s18 + $0xb8] sm:$0xff] (!%p2671_p2)  }
   0xf   :  { %108 = vst [vmem:[#allocation2 + $0xe0] sm:$0xff] %v3061_v0  ;;  %109 = vst [vmem:[#allocation2 + $0xe8] sm:$0xff] %v3061_v0  ;;  %v2851_v18 = vld [vmem:[%s3193_s18 + $0x40] sm:$0xff] (!%p2671_p2)   ;;  %v2853_v21 = vld [vmem:[%s3193_s18 + $0x48] sm:$0xff] (!%p2671_p2)  }
  0x10   :  { %110 = vst [vmem:[#allocation2 + $0xf0] sm:$0xff] %v3061_v0  ;;  %111 = vst [vmem:[#allocation2 + $0xf8] sm:$0xff] %v3061_v0  ;;  %1243 = vmatpush1.bf16.msra.mxu0 (!%p2671_p2), %v2839_v6  ;;  %v2852_v19 = vld [vmem:[%s3193_s18 + $0xc0] sm:$0xff] (!%p2671_p2)   ;;  %v2872_v22 = vld [vmem:[%s3188_s14 + $0xc] ss:$16 sps:$4 sm:$0xff] (!%p2671_p2)  }
  0x11   :  { %112 = vst [vmem:[#allocation2 + $0x100] sm:$0xff] %v3061_v0  ;;  %113 = vst [vmem:[#allocation2 + $0x108] sm:$0xff] %v3061_v0  ;;  %1532 = vmatpush1.bf16.msra.mxu1 (!%p2671_p2), %v2840_v7  ;;  %1244 = vmatprep.subr.bf16.mxu0 (!%p2671_p2), %v3062_v2  ;;  %v2869_v20 = vld [vmem:[%s3188_s14 + $0x4] ss:$16 sps:$4 sm:$0xff] (!%p2671_p2)   ;;  %v2854_v23 = vld [vmem:[%s3193_s18 + $0xc8] sm:$0xff] (!%p2671_p2)  }
  0x12   :  { %114 = vst [vmem:[#allocation2 + $0x110] sm:$0xff] %v3061_v0  ;;  %115 = vst [vmem:[#allocation2 + $0x118] sm:$0xff] %v3061_v0  ;;  %1533 = vmatprep.subr.bf16.mxu1 (!%p2671_p2), %v3062_v2  ;;  %1270 = vmatprep.mubr.bf16.mxu0 (!%p2671_p2), %v2869_v20  ;;  %v2855_v24 = vld [vmem:[%s3193_s18 + $0x50] sm:$0xff] (!%p2671_p2)   ;;  %v2857_v26 = vld [vmem:[%s3193_s18 + $0x58] sm:$0xff] (!%p2671_p2)  }
  0x13   :  { %116 = vst [vmem:[#allocation2 + $0x120] sm:$0xff] %v3061_v0  ;;  %117 = vst [vmem:[#allocation2 + $0x128] sm:$0xff] %v3061_v0  ;;  %1559 = vmatprep.mubr.bf16.mxu1 (!%p2671_p2), %v2872_v22  ;;  %v2856_v25 = vld [vmem:[%s3193_s18 + $0xd0] sm:$0xff] (!%p2671_p2)   ;;  %v2858_v27 = vld [vmem:[%s3193_s18 + $0xd8] sm:$0xff] (!%p2671_p2)  }
  0x14   :  { %118 = vst [vmem:[#allocation2 + $0x130] sm:$0xff] %v3061_v0  ;;  %119 = vst [vmem:[#allocation2 + $0x138] sm:$0xff] %v3061_v0  ;;  %1245 = vmatpush1.bf16.msra.mxu0 (!%p2671_p2), %v2841_v8  ;;  %v2859_v28 = vld [vmem:[%s3193_s18 + $0x60] sm:$0xff] (!%p2671_p2)   ;;  %v2861_v30 = vld [vmem:[%s3193_s18 + $0x68] sm:$0xff] (!%p2671_p2)  }
  0x15   :  { %120 = vst [vmem:[#allocation2 + $0x140] sm:$0xff] %v3061_v0  ;;  %121 = vst [vmem:[#allocation2 + $0x148] sm:$0xff] %v3061_v0  ;;  %1534 = vmatpush1.bf16.msra.mxu1 (!%p2671_p2), %v2842_v9  ;;  %1246 = vmatprep.subr.bf16.mxu0 (!%p2671_p2), %v3062_v2  ;;  %v2860_v29 = vld [vmem:[%s3193_s18 + $0xe0] sm:$0xff] (!%p2671_p2)   ;;  %v2862_v31 = vld [vmem:[%s3193_s18 + $0xe8] sm:$0xff] (!%p2671_p2)  }
  0x16   :  { %122 = vst [vmem:[#allocation2 + $0x150] sm:$0xff] %v3061_v0  ;;  %123 = vst [vmem:[#allocation2 + $0x158] sm:$0xff] %v3061_v0  ;;  %1535 = vmatprep.subr.bf16.mxu1 (!%p2671_p2), %v3062_v2  ;;  %v2863_v32 = vld [vmem:[%s3193_s18 + $0x70] sm:$0xff] (!%p2671_p2)   ;;  %v2865_v34 = vld [vmem:[%s3193_s18 + $0x78] sm:$0xff] (!%p2671_p2)  }
  0x17   :  { %124 = vst [vmem:[#allocation2 + $0x160] sm:$0xff] %v3061_v0  ;;  %125 = vst [vmem:[#allocation2 + $0x168] sm:$0xff] %v3061_v0  ;;  %v2864_v33 = vld [vmem:[%s3193_s18 + $0xf0] sm:$0xff] (!%p2671_p2)   ;;  %v2866_v35 = vld [vmem:[%s3193_s18 + $0xf8] sm:$0xff] (!%p2671_p2)  }
  0x18   :  { %126 = vst [vmem:[#allocation2 + $0x170] sm:$0xff] %v3061_v0  ;;  %127 = vst [vmem:[#allocation2 + $0x178] sm:$0xff] %v3061_v0  ;;  %1247 = vmatpush1.bf16.msra.mxu0 (!%p2671_p2), %v2843_v10  ;;  %v2867_v36 = vld [vmem:[%s3188_s14] ss:$16 sps:$4 sm:$0xff] (!%p2671_p2)   ;;  %v2870_v37 = vld [vmem:[%s3188_s14 + $0x8] ss:$16 sps:$4 sm:$0xff] (!%p2671_p2)  }
  0x19   :  { %128 = vst [vmem:[#allocation2 + $0x180] sm:$0xff] %v3061_v0  ;;  %129 = vst [vmem:[#allocation2 + $0x188] sm:$0xff] %v3061_v0  ;;  %1536 = vmatpush1.bf16.msra.mxu1 (!%p2671_p2), %v2844_v11  ;;  %1248 = vmatprep.subr.bf16.mxu0 (!%p2671_p2), %v3062_v2  ;;  %v2873_v38 = vld [vmem:[%s3188_s14 + $0x24] ss:$16 sps:$4 sm:$0xff] (!%p2671_p2)   ;;  %v2875_v39 = vld [vmem:[%s3188_s14 + $0x2c] ss:$16 sps:$4 sm:$0xff] (!%p2671_p2)  }
  0x1a   :  { %130 = vst [vmem:[#allocation2 + $0x190] sm:$0xff] %v3061_v0  ;;  %131 = vst [vmem:[#allocation2 + $0x198] sm:$0xff] %v3061_v0  ;;  %149 = sbr.rel (%p2671_p2) target bundleno = 539 (0x21b), region = 25  ;;  %1537 = vmatprep.subr.bf16.mxu1 (!%p2671_p2), %v3062_v2  ;;  %v2877_v40 = vld [vmem:[%s3188_s14 + $0x20] ss:$16 sps:$4 sm:$0xff] (!%p2671_p2)  }
  0x1b   :  { %132 = vst [vmem:[#allocation2 + $0x1a0] sm:$0xff] %v3061_v0  ;;  %133 = vst [vmem:[#allocation2 + $0x1a8] sm:$0xff] %v3061_v0  ;;  %v2878_v41 = vld [vmem:[%s3188_s14 + $0x28] ss:$16 sps:$4 sm:$0xff] (!%p2671_p2)   ;;  %v2879_v42 = vld [vmem:[%s3188_s14 + $0x44] ss:$16 sps:$4 sm:$0xff] (!%p2671_p2)  }
  0x1c   :  { %134 = vst [vmem:[#allocation2 + $0x1b0] sm:$0xff] %v3061_v0  ;;  %135 = vst [vmem:[#allocation2 + $0x1b8] sm:$0xff] %v3061_v0  ;;  %1249 = vmatpush1.bf16.msra.mxu0 (!%p2671_p2), %v2845_v12  ;;  %v2881_v43 = vld [vmem:[%s3188_s14 + $0x4c] ss:$16 sps:$4 sm:$0xff] (!%p2671_p2)   ;;  %v2883_v44 = vld [vmem:[%s3188_s14 + $0x40] ss:$16 sps:$4 sm:$0xff] (!%p2671_p2)  }
  0x1d   :  { %136 = vst [vmem:[#allocation2 + $0x1c0] sm:$0xff] %v3061_v0  ;;  %137 = vst [vmem:[#allocation2 + $0x1c8] sm:$0xff] %v3061_v0  ;;  %1538 = vmatpush1.bf16.msra.mxu1 (!%p2671_p2), %v2846_v13  ;;  %1250 = vmatprep.subr.bf16.mxu0 (!%p2671_p2), %v3062_v2  ;;  %v2884_v45 = vld [vmem:[%s3188_s14 + $0x48] ss:$16 sps:$4 sm:$0xff] (!%p2671_p2)   ;;  %v2885_v46 = vld [vmem:[%s3188_s14 + $0x64] ss:$16 sps:$4 sm:$0xff] (!%p2671_p2)  }
  0x1e   :  { %138 = vst [vmem:[#allocation2 + $0x1d0] sm:$0xff] %v3061_v0  ;;  %139 = vst [vmem:[#allocation2 + $0x1d8] sm:$0xff] %v3061_v0  ;;  %1539 = vmatprep.subr.bf16.mxu1 (!%p2671_p2), %v3062_v2  ;;  %v2887_v47 = vld [vmem:[%s3188_s14 + $0x6c] ss:$16 sps:$4 sm:$0xff] (!%p2671_p2)   ;;  %v2889_v48 = vld [vmem:[%s3188_s14 + $0x60] ss:$16 sps:$4 sm:$0xff] (!%p2671_p2)  }
  0x1f   :  { %140 = vst [vmem:[#allocation2 + $0x1e0] sm:$0xff] %v3061_v0  ;;  %141 = vst [vmem:[#allocation2 + $0x1e8] sm:$0xff] %v3061_v0  ;;  %v2890_v49 = vld [vmem:[%s3188_s14 + $0x68] ss:$16 sps:$4 sm:$0xff] (!%p2671_p2)   ;;  %v2891_v50 = vld [vmem:[%s3188_s14 + $0x84] ss:$16 sps:$4 sm:$0xff] (!%p2671_p2)  }
  0x20   :  { %142 = vst [vmem:[#allocation2 + $0x1f0] sm:$0xff] %v3061_v0  ;;  %143 = vst [vmem:[#allocation2 + $0x1f8] sm:$0xff] %v3061_v0  ;;  %1251 = vmatpush1.bf16.msra.mxu0 (!%p2671_p2), %v2847_v14  ;;  %v2893_v51 = vld [vmem:[%s3188_s14 + $0x8c] ss:$16 sps:$4 sm:$0xff] (!%p2671_p2)   ;;  %v2895_v52 = vld [vmem:[%s3188_s14 + $0x80] ss:$16 sps:$4 sm:$0xff] (!%p2671_p2)  }
  0x21   :  { %1540 = vmatpush1.bf16.msra.mxu1 %v2848_v15  ;;  %1252 = vmatprep.subr.bf16.mxu0 %v3062_v2  ;;  %v2896_v53 = vld [vmem:[%s3188_s14 + $0x88] ss:$16 sps:$4 sm:$0xff]   ;;  %v2897_v54 = vld [vmem:[%s3188_s14 + $0xa4] ss:$16 sps:$4 sm:$0xff]   ;;  %v2899_v55 = vld [vmem:[%s3188_s14 + $0xac] ss:$16 sps:$4 sm:$0xff]  }
  0x22   :  { %1541 = vmatprep.subr.bf16.mxu1 %v3062_v2  ;;  %v2901_v56 = vld [vmem:[%s3188_s14 + $0xa0] ss:$16 sps:$4 sm:$0xff]   ;;  %v2902_v57 = vld [vmem:[%s3188_s14 + $0xa8] ss:$16 sps:$4 sm:$0xff]   ;;  %v2903_v58 = vld [vmem:[%s3188_s14 + $0xc4] ss:$16 sps:$4 sm:$0xff]  }
  0x23   :  { %v2905_v59 = vld [vmem:[%s3188_s14 + $0xcc] ss:$16 sps:$4 sm:$0xff]   ;;  %v2907_v60 = vld [vmem:[%s3188_s14 + $0xc0] ss:$16 sps:$4 sm:$0xff]   ;;  %v2908_v61 = vld [vmem:[%s3188_s14 + $0xc8] ss:$16 sps:$4 sm:$0xff]  }
  0x24   :  { %1253 = vmatpush1.bf16.msra.mxu0 %v2849_v16  ;;  %v2909_v62 = vld [vmem:[%s3188_s14 + $0xe4] ss:$16 sps:$4 sm:$0xff]   ;;  %v2911_v63 = vld [vmem:[%s3188_s14 + $0xec] ss:$16 sps:$4 sm:$0xff]   ;;  %v2913_v0 = vld [vmem:[%s3188_s14 + $0xe0] ss:$16 sps:$4 sm:$0xff]  }
  0x25   :  { %1542 = vmatpush1.bf16.msra.mxu1 %v2850_v17  ;;  %1254 = vmatprep.subr.bf16.mxu0 %v3062_v2  ;;  %v2914_v1 = vld [vmem:[%s3188_s14 + $0xe8] ss:$16 sps:$4 sm:$0xff]   ;;  %v2917_v3 = vld [vmem:[%s3188_s14 + $0x10c] ss:$16 sps:$4 sm:$0xff]   ;;  %v2919_v4 = vld [vmem:[%s3188_s14 + $0x100] ss:$16 sps:$4 sm:$0xff]  }
  0x26   :  { %1543 = vmatprep.subr.bf16.mxu1 %v3062_v2  ;;  %v2920_v5 = vld [vmem:[%s3188_s14 + $0x108] ss:$16 sps:$4 sm:$0xff]   ;;  %v2921_v6 = vld [vmem:[%s3188_s14 + $0x124] ss:$16 sps:$4 sm:$0xff]   ;;  %v2923_v7 = vld [vmem:[%s3188_s14 + $0x12c] ss:$16 sps:$4 sm:$0xff]  }
  0x27   :  { %v2925_v8 = vld [vmem:[%s3188_s14 + $0x120] ss:$16 sps:$4 sm:$0xff]   ;;  %v2926_v9 = vld [vmem:[%s3188_s14 + $0x128] ss:$16 sps:$4 sm:$0xff]   ;;  %v2927_v10 = vld [vmem:[%s3188_s14 + $0x144] ss:$16 sps:$4 sm:$0xff]  }
  0x28   :  { %1255 = vmatpush1.bf16.msra.mxu0 %v2851_v18  ;;  %v2929_v11 = vld [vmem:[%s3188_s14 + $0x14c] ss:$16 sps:$4 sm:$0xff]   ;;  %v2931_v12 = vld [vmem:[%s3188_s14 + $0x140] ss:$16 sps:$4 sm:$0xff]   ;;  %v2932_v13 = vld [vmem:[%s3188_s14 + $0x148] ss:$16 sps:$4 sm:$0xff]  }
  0x29   :  { %1544 = vmatpush1.bf16.msra.mxu1 %v2852_v19  ;;  %1256 = vmatprep.subr.bf16.mxu0 %v3062_v2  ;;  %v2933_v14 = vld [vmem:[%s3188_s14 + $0x164] ss:$16 sps:$4 sm:$0xff]   ;;  %v2935_v15 = vld [vmem:[%s3188_s14 + $0x16c] ss:$16 sps:$4 sm:$0xff]   ;;  %v2937_v16 = vld [vmem:[%s3188_s14 + $0x160] ss:$16 sps:$4 sm:$0xff]  }
  0x2a   :  { %1545 = vmatprep.subr.bf16.mxu1 %v3062_v2  ;;  %v2938_v17 = vld [vmem:[%s3188_s14 + $0x168] ss:$16 sps:$4 sm:$0xff]   ;;  %v2939_v18 = vld [vmem:[%s3188_s14 + $0x184] ss:$16 sps:$4 sm:$0xff]   ;;  %v2941_v19 = vld [vmem:[%s3188_s14 + $0x18c] ss:$16 sps:$4 sm:$0xff]  }
  0x2b   :  { %v2943_v20 = vld [vmem:[%s3188_s14 + $0x180] ss:$16 sps:$4 sm:$0xff]   ;;  %v2945_v22 = vld [vmem:[%s3188_s14 + $0x1a4] ss:$16 sps:$4 sm:$0xff]  }
  0x2c   :  { %1257 = vmatpush1.bf16.msra.mxu0 %v2853_v21  ;;  %v2944_v21 = vld [vmem:[%s3188_s14 + $0x188] ss:$16 sps:$4 sm:$0xff]  }
  0x2d   :  { %1546 = vmatpush1.bf16.msra.mxu1 %v2854_v23  ;;  %1258 = vmatprep.subr.bf16.mxu0 %v3062_v2  ;;  %v2947_v23 = vld [vmem:[%s3188_s14 + $0x1ac] ss:$16 sps:$4 sm:$0xff]  }
  0x2e   :  { %1547 = vmatprep.subr.bf16.mxu1 %v3062_v2 }
  0x30   :  { %1259 = vmatpush1.bf16.msra.mxu0 %v2855_v24  ;;  %v2949_v24 = vld [vmem:[%s3188_s14 + $0x1a0] ss:$16 sps:$4 sm:$0xff]  }
  0x31   :  { %1548 = vmatpush1.bf16.msra.mxu1 %v2856_v25  ;;  %1260 = vmatprep.subr.bf16.mxu0 %v3062_v2  ;;  %v2950_v25 = vld [vmem:[%s3188_s14 + $0x1a8] ss:$16 sps:$4 sm:$0xff]  }
  0x32   :  { %1549 = vmatprep.subr.bf16.mxu1 %v3062_v2 }
  0x34   :  { %1261 = vmatpush1.bf16.msra.mxu0 %v2857_v26  ;;  %v2951_v26 = vld [vmem:[%s3188_s14 + $0x1c4] ss:$16 sps:$4 sm:$0xff]  }
  0x35   :  { %1550 = vmatpush1.bf16.msra.mxu1 %v2858_v27  ;;  %1262 = vmatprep.subr.bf16.mxu0 %v3062_v2  ;;  %v2953_v27 = vld [vmem:[%s3188_s14 + $0x1cc] ss:$16 sps:$4 sm:$0xff]  }
  0x36   :  { %1551 = vmatprep.subr.bf16.mxu1 %v3062_v2 }
  0x38   :  { %1263 = vmatpush1.bf16.msra.mxu0 %v2859_v28  ;;  %v2955_v28 = vld [vmem:[%s3188_s14 + $0x1c0] ss:$16 sps:$4 sm:$0xff]  }
  0x39   :  { %1552 = vmatpush1.bf16.msra.mxu1 %v2860_v29  ;;  %1264 = vmatprep.subr.bf16.mxu0 %v3062_v2  ;;  %v2956_v29 = vld [vmem:[%s3188_s14 + $0x1c8] ss:$16 sps:$4 sm:$0xff]  }
  0x3a   :  { %1553 = vmatprep.subr.bf16.mxu1 %v3062_v2 }
  0x3c   :  { %1265 = vmatpush1.bf16.msra.mxu0 %v2861_v30  ;;  %v2957_v30 = vld [vmem:[%s3188_s14 + $0x1e4] ss:$16 sps:$4 sm:$0xff]  }
  0x3d   :  { %1554 = vmatpush1.bf16.msra.mxu1 %v2862_v31  ;;  %1266 = vmatprep.subr.bf16.mxu0 %v3062_v2  ;;  %v2959_v31 = vld [vmem:[%s3188_s14 + $0x1ec] ss:$16 sps:$4 sm:$0xff]  }
  0x3e   :  { %1555 = vmatprep.subr.bf16.mxu1 %v3062_v2 }
  0x40   :  { %1267 = vmatpush1.bf16.msra.mxu0 %v2863_v32  ;;  %v2961_v32 = vld [vmem:[%s3188_s14 + $0x1e0] ss:$16 sps:$4 sm:$0xff]  }
  0x41   :  { %1556 = vmatpush1.bf16.msra.mxu1 %v2864_v33  ;;  %1268 = vmatprep.subr.bf16.mxu0 %v3062_v2  ;;  %v2962_v33 = vld [vmem:[%s3188_s14 + $0x1e8] ss:$16 sps:$4 sm:$0xff]  }
  0x42   :  { %1557 = vmatprep.subr.bf16.mxu1 %v3062_v2  ;;  %v2915_v2 = vld [vmem:[%s3188_s14 + $0x104] ss:$16 sps:$4 sm:$0xff]  }
  0x44   :  { %1269 = vmatpush1.bf16.msra.mxu0 %v2865_v34  ;;  %v2963_v34 = vld [vmem:[%s3188_s14 + $0x204] ss:$16 sps:$4 sm:$0xff]  }
  0x45   :  { %1558 = vmatpush1.bf16.msra.mxu1 %v2866_v35  ;;  %v2965_v35 = vld [vmem:[%s3188_s14 + $0x20c] ss:$16 sps:$4 sm:$0xff]  }
  0x47   :  { %1271 = vmatmul.mubr.bf16.vlgmr.msra.gmra.mrb[0].mxu0 %v2867_v36  ;;  %v2967_v36 = vld [vmem:[%s3188_s14 + $0x200] ss:$16 sps:$4 sm:$0xff]  }
  0x48   :  { %1560 = vmatmul.mubr.bf16.vlgmr.msra.gmra.mrb[0].mxu1 %v2870_v37  ;;  %1278 = vmatprep.mubr.bf16.mxu0 %v2873_v38  ;;  %v2968_v37 = vld [vmem:[%s3188_s14 + $0x208] ss:$16 sps:$4 sm:$0xff]   ;;  %v2969_v38 = vld [vmem:[%s3188_s14 + $0x224] ss:$16 sps:$4 sm:$0xff]  }
  0x49   :  { %1567 = vmatprep.mubr.bf16.mxu1 %v2875_v39  ;;  %v2971_v39 = vld [vmem:[%s3188_s14 + $0x22c] ss:$16 sps:$4 sm:$0xff]  }
  0x4f   :  { %1279 = vmatmul.mubr.bf16.gmra.mrb[4].mxu0 %v2877_v40  ;;  %v2973_v40 = vld [vmem:[%s3188_s14 + $0x220] ss:$16 sps:$4 sm:$0xff]  }
  0x50   :  { %1568 = vmatmul.mubr.bf16.gmra.mrb[4].mxu1 %v2878_v41  ;;  %1286 = vmatprep.mubr.bf16.mxu0 %v2879_v42  ;;  %v2974_v41 = vld [vmem:[%s3188_s14 + $0x228] ss:$16 sps:$4 sm:$0xff]   ;;  %v2975_v42 = vld [vmem:[%s3188_s14 + $0x244] ss:$16 sps:$4 sm:$0xff]  }
  0x51   :  { %1575 = vmatprep.mubr.bf16.mxu1 %v2881_v43  ;;  %v2977_v43 = vld [vmem:[%s3188_s14 + $0x24c] ss:$16 sps:$4 sm:$0xff]  }
  0x57   :  { %1287 = vmatmul.mubr.bf16.gmra.mrb[8].mxu0 %v2883_v44  ;;  %v2979_v44 = vld [vmem:[%s3188_s14 + $0x240] ss:$16 sps:$4 sm:$0xff]  }
  0x58   :  { %1576 = vmatmul.mubr.bf16.gmra.mrb[8].mxu1 %v2884_v45  ;;  %1294 = vmatprep.mubr.bf16.mxu0 %v2885_v46  ;;  %v2980_v45 = vld [vmem:[%s3188_s14 + $0x248] ss:$16 sps:$4 sm:$0xff]   ;;  %v2981_v46 = vld [vmem:[%s3188_s14 + $0x264] ss:$16 sps:$4 sm:$0xff]  }
  0x59   :  { %1583 = vmatprep.mubr.bf16.mxu1 %v2887_v47  ;;  %v2983_v47 = vld [vmem:[%s3188_s14 + $0x26c] ss:$16 sps:$4 sm:$0xff]  }
  0x5f   :  { %1295 = vmatmul.mubr.bf16.gmra.mrb[12].mxu0 %v2889_v48  ;;  %v2985_v48 = vld [vmem:[%s3188_s14 + $0x260] ss:$16 sps:$4 sm:$0xff]  }
  0x60   :  { %1584 = vmatmul.mubr.bf16.gmra.mrb[12].mxu1 %v2890_v49  ;;  %1302 = vmatprep.mubr.bf16.mxu0 %v2891_v50  ;;  %v2986_v49 = vld [vmem:[%s3188_s14 + $0x268] ss:$16 sps:$4 sm:$0xff]   ;;  %v2987_v50 = vld [vmem:[%s3188_s14 + $0x284] ss:$16 sps:$4 sm:$0xff]  }
  0x61   :  { %1591 = vmatprep.mubr.bf16.mxu1 %v2893_v51  ;;  %v2989_v51 = vld [vmem:[%s3188_s14 + $0x28c] ss:$16 sps:$4 sm:$0xff]  }
  0x67   :  { %1303 = vmatmul.mubr.bf16.gmra.mrb[16].mxu0 %v2895_v52  ;;  %v2991_v52 = vld [vmem:[%s3188_s14 + $0x280] ss:$16 sps:$4 sm:$0xff]  }
  0x68   :  { %1592 = vmatmul.mubr.bf16.gmra.mrb[16].mxu1 %v2896_v53  ;;  %1310 = vmatprep.mubr.bf16.mxu0 %v2897_v54  ;;  %v2992_v53 = vld [vmem:[%s3188_s14 + $0x288] ss:$16 sps:$4 sm:$0xff]   ;;  %v2993_v54 = vld [vmem:[%s3188_s14 + $0x2a4] ss:$16 sps:$4 sm:$0xff]  }
  0x69   :  { %1599 = vmatprep.mubr.bf16.mxu1 %v2899_v55  ;;  %v2995_v55 = vld [vmem:[%s3188_s14 + $0x2ac] ss:$16 sps:$4 sm:$0xff]  }
  0x6f   :  { %1311 = vmatmul.mubr.bf16.gmra.mrb[20].mxu0 %v2901_v56  ;;  %v2997_v56 = vld [vmem:[%s3188_s14 + $0x2a0] ss:$16 sps:$4 sm:$0xff]  }
  0x70   :  { %1600 = vmatmul.mubr.bf16.gmra.mrb[20].mxu1 %v2902_v57  ;;  %1318 = vmatprep.mubr.bf16.mxu0 %v2903_v58  ;;  %v2998_v57 = vld [vmem:[%s3188_s14 + $0x2a8] ss:$16 sps:$4 sm:$0xff]   ;;  %v2999_v58 = vld [vmem:[%s3188_s14 + $0x2c4] ss:$16 sps:$4 sm:$0xff]  }
  0x71   :  { %1607 = vmatprep.mubr.bf16.mxu1 %v2905_v59  ;;  %v3001_v59 = vld [vmem:[%s3188_s14 + $0x2cc] ss:$16 sps:$4 sm:$0xff]  }
  0x77   :  { %1319 = vmatmul.mubr.bf16.gmra.mrb[24].mxu0 %v2907_v60  ;;  %v3003_v60 = vld [vmem:[%s3188_s14 + $0x2c0] ss:$16 sps:$4 sm:$0xff]  }
  0x78   :  { %1608 = vmatmul.mubr.bf16.gmra.mrb[24].mxu1 %v2908_v61  ;;  %1326 = vmatprep.mubr.bf16.mxu0 %v2909_v62  ;;  %v3004_v61 = vld [vmem:[%s3188_s14 + $0x2c8] ss:$16 sps:$4 sm:$0xff]   ;;  %v3005_v62 = vld [vmem:[%s3188_s14 + $0x2e4] ss:$16 sps:$4 sm:$0xff]  }
  0x79   :  { %1615 = vmatprep.mubr.bf16.mxu1 %v2911_v63  ;;  %v3007_v63 = vld [vmem:[%s3188_s14 + $0x2ec] ss:$16 sps:$4 sm:$0xff]  }
  0x7f   :  { %1327 = vmatmul.mubr.bf16.gmra.mrb[28].mxu0 %v2913_v0  ;;  %v3009_v0 = vld [vmem:[%s3188_s14 + $0x2e0] ss:$16 sps:$4 sm:$0xff]  }
  0x80   :  { %1616 = vmatmul.mubr.bf16.gmra.mrb[28].mxu1 %v2914_v1  ;;  %1334 = vmatprep.mubr.bf16.mxu0 %v2915_v2  ;;  %v3010_v1 = vld [vmem:[%s3188_s14 + $0x2e8] ss:$16 sps:$4 sm:$0xff]   ;;  %v3011_v2 = vld [vmem:[%s3188_s14 + $0x304] ss:$16 sps:$4 sm:$0xff]  }
  0x81   :  { %1623 = vmatprep.mubr.bf16.mxu1 %v2917_v3  ;;  %v3013_v3 = vld [vmem:[%s3188_s14 + $0x30c] ss:$16 sps:$4 sm:$0xff]  }
  0x87   :  { %1335 = vmatmul.mubr.bf16.gmra.mrb[32].mxu0 %v2919_v4  ;;  %v3015_v4 = vld [vmem:[%s3188_s14 + $0x300] ss:$16 sps:$4 sm:$0xff]  }
  0x88   :  { %1624 = vmatmul.mubr.bf16.gmra.mrb[32].mxu1 %v2920_v5  ;;  %1342 = vmatprep.mubr.bf16.mxu0 %v2921_v6  ;;  %v3016_v5 = vld [vmem:[%s3188_s14 + $0x308] ss:$16 sps:$4 sm:$0xff]   ;;  %v3017_v6 = vld [vmem:[%s3188_s14 + $0x324] ss:$16 sps:$4 sm:$0xff]  }
  0x89   :  { %1631 = vmatprep.mubr.bf16.mxu1 %v2923_v7  ;;  %v3019_v7 = vld [vmem:[%s3188_s14 + $0x32c] ss:$16 sps:$4 sm:$0xff]  }
  0x8f   :  { %1343 = vmatmul.mubr.bf16.gmra.mrb[36].mxu0 %v2925_v8  ;;  %v3021_v8 = vld [vmem:[%s3188_s14 + $0x320] ss:$16 sps:$4 sm:$0xff]  }
  0x90   :  { %1632 = vmatmul.mubr.bf16.gmra.mrb[36].mxu1 %v2926_v9  ;;  %1350 = vmatprep.mubr.bf16.mxu0 %v2927_v10  ;;  %v3022_v9 = vld [vmem:[%s3188_s14 + $0x328] ss:$16 sps:$4 sm:$0xff]   ;;  %v3023_v10 = vld [vmem:[%s3188_s14 + $0x344] ss:$16 sps:$4 sm:$0xff]  }
  0x91   :  { %1639 = vmatprep.mubr.bf16.mxu1 %v2929_v11  ;;  %v3025_v11 = vld [vmem:[%s3188_s14 + $0x34c] ss:$16 sps:$4 sm:$0xff]  }
  0x97   :  { %1351 = vmatmul.mubr.bf16.gmra.mrb[40].mxu0 %v2931_v12  ;;  %v3027_v12 = vld [vmem:[%s3188_s14 + $0x340] ss:$16 sps:$4 sm:$0xff]  }
  0x98   :  { %1640 = vmatmul.mubr.bf16.gmra.mrb[40].mxu1 %v2932_v13  ;;  %1358 = vmatprep.mubr.bf16.mxu0 %v2933_v14  ;;  %v3028_v13 = vld [vmem:[%s3188_s14 + $0x348] ss:$16 sps:$4 sm:$0xff]   ;;  %v3029_v14 = vld [vmem:[%s3188_s14 + $0x364] ss:$16 sps:$4 sm:$0xff]  }
  0x99   :  { %1647 = vmatprep.mubr.bf16.mxu1 %v2935_v15  ;;  %v3031_v15 = vld [vmem:[%s3188_s14 + $0x36c] ss:$16 sps:$4 sm:$0xff]  }
  0x9f   :  { %1359 = vmatmul.mubr.bf16.gmra.mrb[44].mxu0 %v2937_v16 }
  0xa0   :  { %1648 = vmatmul.mubr.bf16.gmra.mrb[44].mxu1 %v2938_v17  ;;  %1366 = vmatprep.mubr.bf16.mxu0 %v2939_v18  ;;  %v150_v17 = vld [vmem:[#allocation2] sm:$0xff] }
  0xa1   :  { %1655 = vmatprep.mubr.bf16.mxu1 %v2941_v19 }
  0xa7   :  { %1367 = vmatmul.mubr.bf16.gmra.mrb[48].mxu0 %v2943_v20  ;;  %v3033_v20 = vld [vmem:[%s3188_s14 + $0x360] ss:$16 sps:$4 sm:$0xff]  }
  0xa8   :  { %1656 = vmatmul.mubr.bf16.gmra.mrb[48].mxu1 %v2944_v21  ;;  %1374 = vmatprep.mubr.bf16.mxu0 %v2945_v22 }
  0xa9   :  { %1663 = vmatprep.mubr.bf16.mxu1 %v2947_v23 }
  0xaf   :  { %1375 = vmatmul.mubr.bf16.gmra.mrb[52].mxu0 %v2949_v24  ;;  %v3034_v24 = vld [vmem:[%s3188_s14 + $0x368] ss:$16 sps:$4 sm:$0xff]  }
  0xb0   :  { %1664 = vmatmul.mubr.bf16.gmra.mrb[52].mxu1 %v2950_v25  ;;  %1382 = vmatprep.mubr.bf16.mxu0 %v2951_v26  ;;  %v3035_v25 = vld [vmem:[%s3188_s14 + $0x384] ss:$16 sps:$4 sm:$0xff]   ;;  %v151_v26 = vld [vmem:[#allocation2 + $0x8] sm:$0xff] }
  0xb1   :  { %1671 = vmatprep.mubr.bf16.mxu1 %v2953_v27 }
  0xb7   :  { %1383 = vmatmul.mubr.bf16.gmra.mrb[56].mxu0 %v2955_v28 }
  0xb8   :  { %1672 = vmatmul.mubr.bf16.gmra.mrb[56].mxu1 %v2956_v29  ;;  %1390 = vmatprep.mubr.bf16.mxu0 %v2957_v30  ;;  %v3037_v29 = vld [vmem:[%s3188_s14 + $0x38c] ss:$16 sps:$4 sm:$0xff]  }
  0xb9   :  { %1679 = vmatprep.mubr.bf16.mxu1 %v2959_v31 }
  0xbf   :  { %1391 = vmatmul.mubr.bf16.gmra.mrb[60].mxu0 %v2961_v32 }
  0xc0   :  { %1680 = vmatmul.mubr.bf16.gmra.mrb[60].mxu1 %v2962_v33  ;;  %1398 = vmatprep.mubr.bf16.mxu0 %v2963_v34 }
  0xc1   :  { %1687 = vmatprep.mubr.bf16.mxu1 %v2965_v35  ;;  %v152_v35 = vld [vmem:[#allocation2 + $0x10] sm:$0xff] }
  0xc7   :  { %1399 = vmatmul.mubr.bf16.gmra.mrb[64].mxu0 %v2967_v36 }
  0xc8   :  { %1688 = vmatmul.mubr.bf16.gmra.mrb[64].mxu1 %v2968_v37  ;;  %1406 = vmatprep.mubr.bf16.mxu0 %v2969_v38  ;;  %v3039_v38 = vld [vmem:[%s3188_s14 + $0x380] ss:$16 sps:$4 sm:$0xff]  }
  0xc9   :  { %1695 = vmatprep.mubr.bf16.mxu1 %v2971_v39 }
  0xcf   :  { %1407 = vmatmul.mubr.bf16.gmra.mrb[68].mxu0 %v2973_v40 }
  0xd0   :  { %1696 = vmatmul.mubr.bf16.gmra.mrb[68].mxu1 %v2974_v41  ;;  %1414 = vmatprep.mubr.bf16.mxu0 %v2975_v42  ;;  %v3040_v42 = vld [vmem:[%s3188_s14 + $0x388] ss:$16 sps:$4 sm:$0xff]  }
  0xd1   :  { %1703 = vmatprep.mubr.bf16.mxu1 %v2977_v43  ;;  %v3041_v43 = vld [vmem:[%s3188_s14 + $0x3a4] ss:$16 sps:$4 sm:$0xff]  }
  0xd7   :  { %1415 = vmatmul.mubr.bf16.gmra.mrb[72].mxu0 %v2979_v44  ;;  %v153_v44 = vld [vmem:[#allocation2 + $0x18] sm:$0xff] }
  0xd8   :  { %1704 = vmatmul.mubr.bf16.gmra.mrb[72].mxu1 %v2980_v45  ;;  %1422 = vmatprep.mubr.bf16.mxu0 %v2981_v46 }
  0xd9   :  { %1711 = vmatprep.mubr.bf16.mxu1 %v2983_v47  ;;  %v3043_v47 = vld [vmem:[%s3188_s14 + $0x3ac] ss:$16 sps:$4 sm:$0xff]  }
  0xdf   :  { %1423 = vmatmul.mubr.bf16.gmra.mrb[76].mxu0 %v2985_v48 }
  0xe0   :  { %1712 = vmatmul.mubr.bf16.gmra.mrb[76].mxu1 %v2986_v49  ;;  %1430 = vmatprep.mubr.bf16.mxu0 %v2987_v50 }
  0xe1   :  { %1719 = vmatprep.mubr.bf16.mxu1 %v2989_v51 }
  0xe7   :  { %1431 = vmatmul.mubr.bf16.gmra.mrb[80].mxu0 %v2991_v52 }
  0xe8   :  { %1720 = vmatmul.mubr.bf16.gmra.mrb[80].mxu1 %v2992_v53  ;;  %1438 = vmatprep.mubr.bf16.mxu0 %v2993_v54  ;;  %v154_v53 = vld [vmem:[#allocation2 + $0x20] sm:$0xff] }
  0xe9   :  { %1727 = vmatprep.mubr.bf16.mxu1 %v2995_v55 }
  0xef   :  { %1439 = vmatmul.mubr.bf16.gmra.mrb[84].mxu0 %v2997_v56  ;;  %v3045_v56 = vld [vmem:[%s3188_s14 + $0x3a0] ss:$16 sps:$4 sm:$0xff]  }
  0xf0   :  { %1728 = vmatmul.mubr.bf16.gmra.mrb[84].mxu1 %v2998_v57  ;;  %1446 = vmatprep.mubr.bf16.mxu0 %v2999_v58 }
  0xf1   :  { %1735 = vmatprep.mubr.bf16.mxu1 %v3001_v59 }
  0xf7   :  { %1447 = vmatmul.mubr.bf16.gmra.mrb[88].mxu0 %v3003_v60  ;;  %v3046_v60 = vld [vmem:[%s3188_s14 + $0x3a8] ss:$16 sps:$4 sm:$0xff]  }
  0xf8   :  { %1736 = vmatmul.mubr.bf16.gmra.mrb[88].mxu1 %v3004_v61  ;;  %1454 = vmatprep.mubr.bf16.mxu0 %v3005_v62  ;;  %v3047_v61 = vld [vmem:[%s3188_s14 + $0x3c4] ss:$16 sps:$4 sm:$0xff]   ;;  %v155_v62 = vld [vmem:[#allocation2 + $0x28] sm:$0xff] }
  0xf9   :  { %1743 = vmatprep.mubr.bf16.mxu1 %v3007_v63 }
  0xff   :  { %1455 = vmatmul.mubr.bf16.gmra.mrb[92].mxu0 %v3009_v0 }
 0x100   :  { %1744 = vmatmul.mubr.bf16.gmra.mrb[92].mxu1 %v3010_v1  ;;  %1462 = vmatprep.mubr.bf16.mxu0 %v3011_v2  ;;  %v3049_v1 = vld [vmem:[%s3188_s14 + $0x3cc] ss:$16 sps:$4 sm:$0xff]  }
 0x101   :  { %1751 = vmatprep.mubr.bf16.mxu1 %v3013_v3 }
 0x107   :  { %1463 = vmatmul.mubr.bf16.gmra.mrb[96].mxu0 %v3015_v4 }
 0x108   :  { %1752 = vmatmul.mubr.bf16.gmra.mrb[96].mxu1 %v3016_v5  ;;  %1470 = vmatprep.mubr.bf16.mxu0 %v3017_v6 }
 0x109   :  { %1759 = vmatprep.mubr.bf16.mxu1 %v3019_v7  ;;  %v156_v7 = vld [vmem:[#allocation2 + $0x30] sm:$0xff] }
 0x10f   :  { %1471 = vmatmul.mubr.bf16.gmra.mrb[100].mxu0 %v3021_v8 }
 0x110   :  { %1760 = vmatmul.mubr.bf16.gmra.mrb[100].mxu1 %v3022_v9  ;;  %1478 = vmatprep.mubr.bf16.mxu0 %v3023_v10  ;;  %v3051_v10 = vld [vmem:[%s3188_s14 + $0x3c0] ss:$16 sps:$4 sm:$0xff]  }
 0x111   :  { %1767 = vmatprep.mubr.bf16.mxu1 %v3025_v11 }
 0x117   :  { %1479 = vmatmul.mubr.bf16.gmra.mrb[104].mxu0 %v3027_v12 }
 0x118   :  { %1768 = vmatmul.mubr.bf16.gmra.mrb[104].mxu1 %v3028_v13  ;;  %1486 = vmatprep.mubr.bf16.mxu0 %v3029_v14  ;;  %v3052_v14 = vld [vmem:[%s3188_s14 + $0x3c8] ss:$16 sps:$4 sm:$0xff]  }
 0x119   :  { %1775 = vmatprep.mubr.bf16.mxu1 %v3031_v15  ;;  %v3053_v15 = vld [vmem:[%s3188_s14 + $0x3e4] ss:$16 sps:$4 sm:$0xff]  }
 0x11a   :  { %v1272_v16 = vpop.f32.mrb[0].mxu0 }
 0x11b   :  { %v1561_v18 = vpop.f32.mrb[0].mxu1  ;;  %v1274_v19 = vpop.f32.mrb[1].mxu0 }
 0x11c   :  { %v1562_v21 = vadd.f32 %v1561_v18, %v1272_v16  ;;  %v1563_v22 = vpop.f32.mrb[1].mxu1  ;;  %v1275_v23 = vpop.f32.mrb[2].mxu0  ;;  %v157_v16 = vld [vmem:[#allocation2 + $0x38] sm:$0xff] }
 0x11d   :  { %v1564_v27 = vpop.f32.mrb[2].mxu1  ;;  %v1277_v28 = vpop.f32.mrb[3].mxu0  ;;  %v3055_v19 = vld [vmem:[%s3188_s14 + $0x3ec] ss:$16 sps:$4 sm:$0xff]  }
 0x11e   :  { %v1816_v30 = vadd.f32 %v1562_v21, %v150_v17  ;;  %v1565_v31 = vadd.f32 %v1564_v27, %v1275_v23  ;;  %v1566_v32 = vpop.f32.mrb[3].mxu1  ;;  %v3057_v28 = vld [vmem:[%s3188_s14 + $0x3e0] ss:$16 sps:$4 sm:$0xff]  }
 0x11f   :  { %1487 = vmatmul.mubr.bf16.gmra.mrb[108].mxu0 %v3033_v20  ;;  %v3058_v32 = vld [vmem:[%s3188_s14 + $0x3e8] ss:$16 sps:$4 sm:$0xff]  }
 0x120   :  { %1880 = vst [vmem:[#allocation2] sm:$0xff] %v1816_v30  ;;  %v1817_v33 = vadd.f32 %v1565_v31, %v151_v26  ;;  %1776 = vmatmul.mubr.bf16.gmra.mrb[108].mxu1 %v3034_v24  ;;  %1494 = vmatprep.mubr.bf16.mxu0 %v3035_v25  ;;  %v158_v25 = vld [vmem:[#allocation2 + $0x40] sm:$0xff] }
 0x121   :  { %1783 = vmatprep.mubr.bf16.mxu1 %v3037_v29 }
 0x122   :  { %1881 = vst [vmem:[#allocation2 + $0x8] sm:$0xff] %v1817_v33  ;;  %v1280_v34 = vpop.f32.mrb[4].mxu0  ;;  %v159_v33 = vld [vmem:[#allocation2 + $0x48] sm:$0xff] }
 0x123   :  { %v1569_v36 = vpop.f32.mrb[4].mxu1  ;;  %v1282_v37 = vpop.f32.mrb[5].mxu0 }
 0x124   :  { %v1570_v39 = vadd.f32 %v1569_v36, %v1280_v34  ;;  %v1571_v40 = vpop.f32.mrb[5].mxu1  ;;  %v1283_v41 = vpop.f32.mrb[6].mxu0 }
 0x125   :  { %v1572_v45 = vpop.f32.mrb[6].mxu1  ;;  %v1285_v46 = vpop.f32.mrb[7].mxu0 }
 0x126   :  { %v1818_v48 = vadd.f32 %v1570_v39, %v152_v35  ;;  %v1573_v49 = vadd.f32 %v1572_v45, %v1283_v41  ;;  %v1574_v50 = vpop.f32.mrb[7].mxu1  ;;  %v160_v41 = vld [vmem:[#allocation2 + $0x50] sm:$0xff] }
 0x127   :  { %1495 = vmatmul.mubr.bf16.gmra.mrb[112].mxu0 %v3039_v38 }
 0x128   :  { %1882 = vst [vmem:[#allocation2 + $0x10] sm:$0xff] %v1818_v48  ;;  %v1819_v51 = vadd.f32 %v1573_v49, %v153_v44  ;;  %1784 = vmatmul.mubr.bf16.gmra.mrb[112].mxu1 %v3040_v42  ;;  %1502 = vmatprep.mubr.bf16.mxu0 %v3041_v43 }
 0x129   :  { %1791 = vmatprep.mubr.bf16.mxu1 %v3043_v47  ;;  %v161_v47 = vld [vmem:[#allocation2 + $0x58] sm:$0xff] }
 0x12a   :  { %1883 = vst [vmem:[#allocation2 + $0x18] sm:$0xff] %v1819_v51  ;;  %v1288_v52 = vpop.f32.mrb[8].mxu0 }
 0x12b   :  { %v1577_v54 = vpop.f32.mrb[8].mxu1  ;;  %v1290_v55 = vpop.f32.mrb[9].mxu0 }
 0x12c   :  { %v1578_v57 = vadd.f32 %v1577_v54, %v1288_v52  ;;  %v1579_v58 = vpop.f32.mrb[9].mxu1  ;;  %v1291_v59 = vpop.f32.mrb[10].mxu0  ;;  %v162_v55 = vld [vmem:[#allocation2 + $0x60] sm:$0xff] }
 0x12d   :  { %v1580_v63 = vpop.f32.mrb[10].mxu1  ;;  %v1293_v0 = vpop.f32.mrb[11].mxu0 }
 0x12e   :  { %v1820_v2 = vadd.f32 %v1578_v57, %v154_v53  ;;  %v1581_v3 = vadd.f32 %v1580_v63, %v1291_v59  ;;  %v1582_v4 = vpop.f32.mrb[11].mxu1 }
 0x12f   :  { %1503 = vmatmul.mubr.bf16.gmra.mrb[116].mxu0 %v3045_v56 }
 0x130   :  { %1884 = vst [vmem:[#allocation2 + $0x20] sm:$0xff] %v1820_v2  ;;  %v1821_v5 = vadd.f32 %v1581_v3, %v155_v62  ;;  %1792 = vmatmul.mubr.bf16.gmra.mrb[116].mxu1 %v3046_v60  ;;  %1510 = vmatprep.mubr.bf16.mxu0 %v3047_v61  ;;  %v163_v61 = vld [vmem:[#allocation2 + $0x68] sm:$0xff] }
 0x131   :  { %1799 = vmatprep.mubr.bf16.mxu1 %v3049_v1 }
 0x132   :  { %1885 = vst [vmem:[#allocation2 + $0x28] sm:$0xff] %v1821_v5  ;;  %v1296_v6 = vpop.f32.mrb[12].mxu0  ;;  %v164_v5 = vld [vmem:[#allocation2 + $0x70] sm:$0xff] }
 0x133   :  { %v1585_v8 = vpop.f32.mrb[12].mxu1  ;;  %v1298_v9 = vpop.f32.mrb[13].mxu0 }
 0x134   :  { %v1586_v11 = vadd.f32 %v1585_v8, %v1296_v6  ;;  %v1587_v12 = vpop.f32.mrb[13].mxu1  ;;  %v1299_v13 = vpop.f32.mrb[14].mxu0 }
 0x135   :  { %v1588_v17 = vpop.f32.mrb[14].mxu1  ;;  %v1301_v18 = vpop.f32.mrb[15].mxu0 }
 0x136   :  { %v1822_v20 = vadd.f32 %v1586_v11, %v156_v7  ;;  %v1589_v21 = vadd.f32 %v1588_v17, %v1299_v13  ;;  %v1590_v22 = vpop.f32.mrb[15].mxu1  ;;  %v165_v11 = vld [vmem:[#allocation2 + $0x78] sm:$0xff] }
 0x137   :  { %1511 = vmatmul.mubr.bf16.gmra.mrb[120].mxu0 %v3051_v10 }
 0x138   :  { %1886 = vst [vmem:[#allocation2 + $0x30] sm:$0xff] %v1822_v20  ;;  %v1823_v23 = vadd.f32 %v1589_v21, %v157_v16  ;;  %1800 = vmatmul.mubr.bf16.gmra.mrb[120].mxu1 %v3052_v14  ;;  %1518 = vmatprep.mubr.bf16.mxu0 %v3053_v15 }
 0x139   :  { %1807 = vmatprep.mubr.bf16.mxu1 %v3055_v19  ;;  %v166_v19 = vld [vmem:[#allocation2 + $0x80] sm:$0xff] }
 0x13a   :  { %1887 = vst [vmem:[#allocation2 + $0x38] sm:$0xff] %v1823_v23  ;;  %v1304_v24 = vpop.f32.mrb[16].mxu0 }
 0x13b   :  { %v1593_v26 = vpop.f32.mrb[16].mxu1  ;;  %v1306_v27 = vpop.f32.mrb[17].mxu0 }
 0x13c   :  { %v1594_v29 = vadd.f32 %v1593_v26, %v1304_v24  ;;  %v1595_v30 = vpop.f32.mrb[17].mxu1  ;;  %v1307_v31 = vpop.f32.mrb[18].mxu0 }
 0x13d   :  { %v1596_v34 = vpop.f32.mrb[18].mxu1  ;;  %v1309_v35 = vpop.f32.mrb[19].mxu0 }
 0x13e   :  { %v1824_v36 = vadd.f32 %v1594_v29, %v158_v25  ;;  %v1597_v37 = vadd.f32 %v1596_v34, %v1307_v31  ;;  %v1598_v38 = vpop.f32.mrb[19].mxu1  ;;  %v167_v25 = vld [vmem:[#allocation2 + $0x88] sm:$0xff] }
 0x13f   :  { %1519 = vmatmul.mubr.bf16.gmra.mrb[124].mxu0 %v3057_v28 }
 0x140   :  { %1888 = vst [vmem:[#allocation2 + $0x40] sm:$0xff] %v1824_v36  ;;  %v1825_v39 = vadd.f32 %v1597_v37, %v159_v33  ;;  %1808 = vmatmul.mubr.bf16.gmra.mrb[124].mxu1 %v3058_v32  ;;  %v168_v33 = vld [vmem:[#allocation2 + $0x90] sm:$0xff] }
 0x142   :  { %1889 = vst [vmem:[#allocation2 + $0x48] sm:$0xff] %v1825_v39  ;;  %v1312_v40 = vpop.f32.mrb[20].mxu0  ;;  %v169_v39 = vld [vmem:[#allocation2 + $0x98] sm:$0xff] }
 0x143   :  { %v1601_v42 = vpop.f32.mrb[20].mxu1  ;;  %v1314_v43 = vpop.f32.mrb[21].mxu0 }
 0x144   :  { %v1602_v44 = vadd.f32 %v1601_v42, %v1312_v40  ;;  %v1603_v45 = vpop.f32.mrb[21].mxu1  ;;  %v1315_v46 = vpop.f32.mrb[22].mxu0 }
 0x145   :  { %v1604_v48 = vpop.f32.mrb[22].mxu1  ;;  %v1317_v49 = vpop.f32.mrb[23].mxu0 }
 0x146   :  { %v1826_v50 = vadd.f32 %v1602_v44, %v160_v41  ;;  %v1605_v51 = vadd.f32 %v1604_v48, %v1315_v46  ;;  %v1606_v52 = vpop.f32.mrb[23].mxu1 }
 0x148   :  { %1890 = vst [vmem:[#allocation2 + $0x50] sm:$0xff] %v1826_v50  ;;  %v1827_v53 = vadd.f32 %v1605_v51, %v161_v47  ;;  %v170_v47 = vld [vmem:[#allocation2 + $0xa0] sm:$0xff] }
 0x14a   :  { %1891 = vst [vmem:[#allocation2 + $0x58] sm:$0xff] %v1827_v53  ;;  %v1320_v54 = vpop.f32.mrb[24].mxu0  ;;  %v171_v53 = vld [vmem:[#allocation2 + $0xa8] sm:$0xff] }
 0x14b   :  { %v1609_v56 = vpop.f32.mrb[24].mxu1  ;;  %v1322_v57 = vpop.f32.mrb[25].mxu0 }
 0x14c   :  { %v1610_v58 = vadd.f32 %v1609_v56, %v1320_v54  ;;  %v1611_v59 = vpop.f32.mrb[25].mxu1  ;;  %v1323_v60 = vpop.f32.mrb[26].mxu0 }
 0x14d   :  { %v1612_v62 = vpop.f32.mrb[26].mxu1  ;;  %v1325_v63 = vpop.f32.mrb[27].mxu0 }
 0x14e   :  { %v1828_v0 = vadd.f32 %v1610_v58, %v162_v55  ;;  %v1613_v1 = vadd.f32 %v1612_v62, %v1323_v60  ;;  %v1614_v2 = vpop.f32.mrb[27].mxu1 }
 0x150   :  { %1892 = vst [vmem:[#allocation2 + $0x60] sm:$0xff] %v1828_v0  ;;  %v1829_v3 = vadd.f32 %v1613_v1, %v163_v61  ;;  %v172_v61 = vld [vmem:[#allocation2 + $0xb0] sm:$0xff] }
 0x152   :  { %1893 = vst [vmem:[#allocation2 + $0x68] sm:$0xff] %v1829_v3  ;;  %v1328_v4 = vpop.f32.mrb[28].mxu0  ;;  %v173_v3 = vld [vmem:[#allocation2 + $0xb8] sm:$0xff] }
 0x153   :  { %v1617_v6 = vpop.f32.mrb[28].mxu1  ;;  %v1330_v7 = vpop.f32.mrb[29].mxu0 }
 0x154   :  { %v1618_v8 = vadd.f32 %v1617_v6, %v1328_v4  ;;  %v1619_v9 = vpop.f32.mrb[29].mxu1  ;;  %v1331_v10 = vpop.f32.mrb[30].mxu0 }
 0x155   :  { %v1620_v12 = vpop.f32.mrb[30].mxu1  ;;  %v1333_v13 = vpop.f32.mrb[31].mxu0 }
 0x156   :  { %v1830_v14 = vadd.f32 %v1618_v8, %v164_v5  ;;  %v1621_v15 = vadd.f32 %v1620_v12, %v1331_v10  ;;  %v1622_v16 = vpop.f32.mrb[31].mxu1 }
 0x158   :  { %1894 = vst [vmem:[#allocation2 + $0x70] sm:$0xff] %v1830_v14  ;;  %v1831_v17 = vadd.f32 %v1621_v15, %v165_v11  ;;  %v174_v11 = vld [vmem:[#allocation2 + $0xc0] sm:$0xff] }
 0x15a   :  { %1895 = vst [vmem:[#allocation2 + $0x78] sm:$0xff] %v1831_v17  ;;  %v1336_v18 = vpop.f32.mrb[32].mxu0  ;;  %v175_v17 = vld [vmem:[#allocation2 + $0xc8] sm:$0xff] }
 0x15b   :  { %v1625_v20 = vpop.f32.mrb[32].mxu1  ;;  %v1338_v21 = vpop.f32.mrb[33].mxu0 }
 0x15c   :  { %v1626_v22 = vadd.f32 %v1625_v20, %v1336_v18  ;;  %v1627_v23 = vpop.f32.mrb[33].mxu1  ;;  %v1339_v24 = vpop.f32.mrb[34].mxu0 }
 0x15d   :  { %v1628_v26 = vpop.f32.mrb[34].mxu1  ;;  %v1341_v27 = vpop.f32.mrb[35].mxu0 }
 0x15e   :  { %v1832_v28 = vadd.f32 %v1626_v22, %v166_v19  ;;  %v1629_v29 = vadd.f32 %v1628_v26, %v1339_v24  ;;  %v1630_v30 = vpop.f32.mrb[35].mxu1 }
 0x160   :  { %1896 = vst [vmem:[#allocation2 + $0x80] sm:$0xff] %v1832_v28  ;;  %v1833_v31 = vadd.f32 %v1629_v29, %v167_v25  ;;  %v176_v25 = vld [vmem:[#allocation2 + $0xd0] sm:$0xff] }
 0x162   :  { %1897 = vst [vmem:[#allocation2 + $0x88] sm:$0xff] %v1833_v31  ;;  %v1344_v32 = vpop.f32.mrb[36].mxu0  ;;  %v177_v31 = vld [vmem:[#allocation2 + $0xd8] sm:$0xff] }
 0x163   :  { %v1633_v34 = vpop.f32.mrb[36].mxu1  ;;  %v1346_v35 = vpop.f32.mrb[37].mxu0 }
 0x164   :  { %v1634_v36 = vadd.f32 %v1633_v34, %v1344_v32  ;;  %v1635_v37 = vpop.f32.mrb[37].mxu1  ;;  %v1347_v38 = vpop.f32.mrb[38].mxu0 }
 0x165   :  { %v1636_v40 = vpop.f32.mrb[38].mxu1  ;;  %v1349_v41 = vpop.f32.mrb[39].mxu0 }
 0x166   :  { %v1834_v42 = vadd.f32 %v1634_v36, %v168_v33  ;;  %v1637_v43 = vadd.f32 %v1636_v40, %v1347_v38  ;;  %v1638_v44 = vpop.f32.mrb[39].mxu1 }
 0x168   :  { %1898 = vst [vmem:[#allocation2 + $0x90] sm:$0xff] %v1834_v42  ;;  %v1835_v45 = vadd.f32 %v1637_v43, %v169_v39  ;;  %v178_v39 = vld [vmem:[#allocation2 + $0xe0] sm:$0xff] }
 0x16a   :  { %1899 = vst [vmem:[#allocation2 + $0x98] sm:$0xff] %v1835_v45  ;;  %v1352_v46 = vpop.f32.mrb[40].mxu0  ;;  %v179_v45 = vld [vmem:[#allocation2 + $0xe8] sm:$0xff] }
 0x16b   :  { %v1641_v48 = vpop.f32.mrb[40].mxu1  ;;  %v1354_v49 = vpop.f32.mrb[41].mxu0 }
 0x16c   :  { %v1642_v50 = vadd.f32 %v1641_v48, %v1352_v46  ;;  %v1643_v51 = vpop.f32.mrb[41].mxu1  ;;  %v1355_v52 = vpop.f32.mrb[42].mxu0 }
 0x16d   :  { %v1644_v54 = vpop.f32.mrb[42].mxu1  ;;  %v1357_v55 = vpop.f32.mrb[43].mxu0 }
 0x16e   :  { %v1836_v56 = vadd.f32 %v1642_v50, %v170_v47  ;;  %v1645_v57 = vadd.f32 %v1644_v54, %v1355_v52  ;;  %v1646_v58 = vpop.f32.mrb[43].mxu1 }
 0x170   :  { %1900 = vst [vmem:[#allocation2 + $0xa0] sm:$0xff] %v1836_v56  ;;  %v1837_v59 = vadd.f32 %v1645_v57, %v171_v53  ;;  %v180_v53 = vld [vmem:[#allocation2 + $0xf0] sm:$0xff] }
 0x172   :  { %1901 = vst [vmem:[#allocation2 + $0xa8] sm:$0xff] %v1837_v59  ;;  %v1360_v60 = vpop.f32.mrb[44].mxu0  ;;  %v181_v59 = vld [vmem:[#allocation2 + $0xf8] sm:$0xff] }
 0x173   :  { %v1649_v62 = vpop.f32.mrb[44].mxu1  ;;  %v1362_v63 = vpop.f32.mrb[45].mxu0 }
 0x174   :  { %v1650_v0 = vadd.f32 %v1649_v62, %v1360_v60  ;;  %v1651_v1 = vpop.f32.mrb[45].mxu1  ;;  %v1363_v2 = vpop.f32.mrb[46].mxu0 }
 0x175   :  { %v1652_v4 = vpop.f32.mrb[46].mxu1  ;;  %v1365_v5 = vpop.f32.mrb[47].mxu0 }
 0x176   :  { %v1838_v6 = vadd.f32 %v1650_v0, %v172_v61  ;;  %v1653_v7 = vadd.f32 %v1652_v4, %v1363_v2  ;;  %v1654_v8 = vpop.f32.mrb[47].mxu1 }
 0x178   :  { %1902 = vst [vmem:[#allocation2 + $0xb0] sm:$0xff] %v1838_v6  ;;  %v1839_v9 = vadd.f32 %v1653_v7, %v173_v3  ;;  %v182_v3 = vld [vmem:[#allocation2 + $0x100] sm:$0xff] }
 0x17a   :  { %1903 = vst [vmem:[#allocation2 + $0xb8] sm:$0xff] %v1839_v9  ;;  %v1368_v10 = vpop.f32.mrb[48].mxu0  ;;  %v183_v9 = vld [vmem:[#allocation2 + $0x108] sm:$0xff] }
 0x17b   :  { %v1657_v12 = vpop.f32.mrb[48].mxu1  ;;  %v1370_v13 = vpop.f32.mrb[49].mxu0 }
 0x17c   :  { %v1658_v14 = vadd.f32 %v1657_v12, %v1368_v10  ;;  %v1659_v15 = vpop.f32.mrb[49].mxu1  ;;  %v1371_v16 = vpop.f32.mrb[50].mxu0 }
 0x17d   :  { %v1660_v18 = vpop.f32.mrb[50].mxu1  ;;  %v1373_v19 = vpop.f32.mrb[51].mxu0 }
 0x17e   :  { %v1840_v20 = vadd.f32 %v1658_v14, %v174_v11  ;;  %v1661_v21 = vadd.f32 %v1660_v18, %v1371_v16  ;;  %v1662_v22 = vpop.f32.mrb[51].mxu1 }
 0x180   :  { %1904 = vst [vmem:[#allocation2 + $0xc0] sm:$0xff] %v1840_v20  ;;  %v1841_v23 = vadd.f32 %v1661_v21, %v175_v17  ;;  %v184_v17 = vld [vmem:[#allocation2 + $0x110] sm:$0xff] }
 0x182   :  { %1905 = vst [vmem:[#allocation2 + $0xc8] sm:$0xff] %v1841_v23  ;;  %v1376_v24 = vpop.f32.mrb[52].mxu0  ;;  %v185_v23 = vld [vmem:[#allocation2 + $0x118] sm:$0xff] }
 0x183   :  { %v1665_v26 = vpop.f32.mrb[52].mxu1  ;;  %v1378_v27 = vpop.f32.mrb[53].mxu0 }
 0x184   :  { %v1666_v28 = vadd.f32 %v1665_v26, %v1376_v24  ;;  %v1667_v29 = vpop.f32.mrb[53].mxu1  ;;  %v1379_v30 = vpop.f32.mrb[54].mxu0 }
 0x185   :  { %v1668_v32 = vpop.f32.mrb[54].mxu1  ;;  %v1381_v33 = vpop.f32.mrb[55].mxu0 }
 0x186   :  { %v1842_v34 = vadd.f32 %v1666_v28, %v176_v25  ;;  %v1669_v35 = vadd.f32 %v1668_v32, %v1379_v30  ;;  %v1670_v36 = vpop.f32.mrb[55].mxu1 }
 0x188   :  { %1906 = vst [vmem:[#allocation2 + $0xd0] sm:$0xff] %v1842_v34  ;;  %v1843_v37 = vadd.f32 %v1669_v35, %v177_v31  ;;  %v186_v31 = vld [vmem:[#allocation2 + $0x120] sm:$0xff] }
 0x18a   :  { %1907 = vst [vmem:[#allocation2 + $0xd8] sm:$0xff] %v1843_v37  ;;  %v1384_v38 = vpop.f32.mrb[56].mxu0  ;;  %v187_v37 = vld [vmem:[#allocation2 + $0x128] sm:$0xff] }
 0x18b   :  { %v1673_v40 = vpop.f32.mrb[56].mxu1  ;;  %v1386_v41 = vpop.f32.mrb[57].mxu0 }
 0x18c   :  { %v1674_v42 = vadd.f32 %v1673_v40, %v1384_v38  ;;  %v1675_v43 = vpop.f32.mrb[57].mxu1  ;;  %v1387_v44 = vpop.f32.mrb[58].mxu0 }
 0x18d   :  { %v1676_v46 = vpop.f32.mrb[58].mxu1  ;;  %v1389_v47 = vpop.f32.mrb[59].mxu0 }
 0x18e   :  { %v1844_v48 = vadd.f32 %v1674_v42, %v178_v39  ;;  %v1677_v49 = vadd.f32 %v1676_v46, %v1387_v44  ;;  %v1678_v50 = vpop.f32.mrb[59].mxu1 }
 0x190   :  { %1908 = vst [vmem:[#allocation2 + $0xe0] sm:$0xff] %v1844_v48  ;;  %v1845_v51 = vadd.f32 %v1677_v49, %v179_v45  ;;  %v188_v45 = vld [vmem:[#allocation2 + $0x130] sm:$0xff] }
 0x192   :  { %1909 = vst [vmem:[#allocation2 + $0xe8] sm:$0xff] %v1845_v51  ;;  %v1392_v52 = vpop.f32.mrb[60].mxu0  ;;  %v189_v51 = vld [vmem:[#allocation2 + $0x138] sm:$0xff] }
 0x193   :  { %v1681_v54 = vpop.f32.mrb[60].mxu1  ;;  %v1394_v55 = vpop.f32.mrb[61].mxu0 }
 0x194   :  { %v1682_v56 = vadd.f32 %v1681_v54, %v1392_v52  ;;  %v1683_v57 = vpop.f32.mrb[61].mxu1  ;;  %v1395_v58 = vpop.f32.mrb[62].mxu0 }
 0x195   :  { %v1684_v60 = vpop.f32.mrb[62].mxu1  ;;  %v1397_v61 = vpop.f32.mrb[63].mxu0 }
 0x196   :  { %v1846_v62 = vadd.f32 %v1682_v56, %v180_v53  ;;  %v1685_v63 = vadd.f32 %v1684_v60, %v1395_v58  ;;  %v1686_v0 = vpop.f32.mrb[63].mxu1 }
 0x198   :  { %1910 = vst [vmem:[#allocation2 + $0xf0] sm:$0xff] %v1846_v62  ;;  %v1847_v1 = vadd.f32 %v1685_v63, %v181_v59  ;;  %v190_v59 = vld [vmem:[#allocation2 + $0x140] sm:$0xff] }
 0x19a   :  { %1911 = vst [vmem:[#allocation2 + $0xf8] sm:$0xff] %v1847_v1  ;;  %v1400_v2 = vpop.f32.mrb[64].mxu0  ;;  %v191_v1 = vld [vmem:[#allocation2 + $0x148] sm:$0xff] }
 0x19b   :  { %v1689_v4 = vpop.f32.mrb[64].mxu1  ;;  %v1402_v5 = vpop.f32.mrb[65].mxu0 }
 0x19c   :  { %v1690_v6 = vadd.f32 %v1689_v4, %v1400_v2  ;;  %v1691_v7 = vpop.f32.mrb[65].mxu1  ;;  %v1403_v8 = vpop.f32.mrb[66].mxu0 }
 0x19d   :  { %v1692_v10 = vpop.f32.mrb[66].mxu1  ;;  %v1405_v11 = vpop.f32.mrb[67].mxu0 }
 0x19e   :  { %v1848_v12 = vadd.f32 %v1690_v6, %v182_v3  ;;  %v1693_v13 = vadd.f32 %v1692_v10, %v1403_v8  ;;  %v1694_v14 = vpop.f32.mrb[67].mxu1 }
 0x1a0   :  { %1912 = vst [vmem:[#allocation2 + $0x100] sm:$0xff] %v1848_v12  ;;  %v1849_v15 = vadd.f32 %v1693_v13, %v183_v9  ;;  %v192_v9 = vld [vmem:[#allocation2 + $0x150] sm:$0xff] }
 0x1a2   :  { %1913 = vst [vmem:[#allocation2 + $0x108] sm:$0xff] %v1849_v15  ;;  %v1408_v16 = vpop.f32.mrb[68].mxu0  ;;  %v193_v15 = vld [vmem:[#allocation2 + $0x158] sm:$0xff] }
 0x1a3   :  { %v1697_v18 = vpop.f32.mrb[68].mxu1  ;;  %v1410_v19 = vpop.f32.mrb[69].mxu0 }
 0x1a4   :  { %v1698_v20 = vadd.f32 %v1697_v18, %v1408_v16  ;;  %v1699_v21 = vpop.f32.mrb[69].mxu1  ;;  %v1411_v22 = vpop.f32.mrb[70].mxu0 }
 0x1a5   :  { %v1700_v24 = vpop.f32.mrb[70].mxu1  ;;  %v1413_v25 = vpop.f32.mrb[71].mxu0 }
 0x1a6   :  { %v1850_v26 = vadd.f32 %v1698_v20, %v184_v17  ;;  %v1701_v27 = vadd.f32 %v1700_v24, %v1411_v22  ;;  %v1702_v28 = vpop.f32.mrb[71].mxu1 }
 0x1a8   :  { %1914 = vst [vmem:[#allocation2 + $0x110] sm:$0xff] %v1850_v26  ;;  %v1851_v29 = vadd.f32 %v1701_v27, %v185_v23  ;;  %v194_v23 = vld [vmem:[#allocation2 + $0x160] sm:$0xff] }
 0x1aa   :  { %1915 = vst [vmem:[#allocation2 + $0x118] sm:$0xff] %v1851_v29  ;;  %v1416_v30 = vpop.f32.mrb[72].mxu0  ;;  %v195_v29 = vld [vmem:[#allocation2 + $0x168] sm:$0xff] }
 0x1ab   :  { %v1705_v32 = vpop.f32.mrb[72].mxu1  ;;  %v1418_v33 = vpop.f32.mrb[73].mxu0 }
 0x1ac   :  { %v1706_v34 = vadd.f32 %v1705_v32, %v1416_v30  ;;  %v1707_v35 = vpop.f32.mrb[73].mxu1  ;;  %v1419_v36 = vpop.f32.mrb[74].mxu0 }
 0x1ad   :  { %v1708_v38 = vpop.f32.mrb[74].mxu1  ;;  %v1421_v39 = vpop.f32.mrb[75].mxu0 }
 0x1ae   :  { %v1852_v40 = vadd.f32 %v1706_v34, %v186_v31  ;;  %v1709_v41 = vadd.f32 %v1708_v38, %v1419_v36  ;;  %v1710_v42 = vpop.f32.mrb[75].mxu1 }
 0x1b0   :  { %1916 = vst [vmem:[#allocation2 + $0x120] sm:$0xff] %v1852_v40  ;;  %v1853_v43 = vadd.f32 %v1709_v41, %v187_v37  ;;  %v196_v37 = vld [vmem:[#allocation2 + $0x170] sm:$0xff] }
 0x1b2   :  { %1917 = vst [vmem:[#allocation2 + $0x128] sm:$0xff] %v1853_v43  ;;  %v1424_v44 = vpop.f32.mrb[76].mxu0  ;;  %v197_v43 = vld [vmem:[#allocation2 + $0x178] sm:$0xff] }
 0x1b3   :  { %v1713_v46 = vpop.f32.mrb[76].mxu1  ;;  %v1426_v47 = vpop.f32.mrb[77].mxu0 }
 0x1b4   :  { %v1714_v48 = vadd.f32 %v1713_v46, %v1424_v44  ;;  %v1715_v49 = vpop.f32.mrb[77].mxu1  ;;  %v1427_v50 = vpop.f32.mrb[78].mxu0 }
 0x1b5   :  { %v1716_v52 = vpop.f32.mrb[78].mxu1  ;;  %v1429_v53 = vpop.f32.mrb[79].mxu0 }
 0x1b6   :  { %v1854_v54 = vadd.f32 %v1714_v48, %v188_v45  ;;  %v1717_v55 = vadd.f32 %v1716_v52, %v1427_v50  ;;  %v1718_v56 = vpop.f32.mrb[79].mxu1 }
 0x1b8   :  { %1918 = vst [vmem:[#allocation2 + $0x130] sm:$0xff] %v1854_v54  ;;  %v1855_v57 = vadd.f32 %v1717_v55, %v189_v51  ;;  %v198_v51 = vld [vmem:[#allocation2 + $0x180] sm:$0xff] }
 0x1ba   :  { %1919 = vst [vmem:[#allocation2 + $0x138] sm:$0xff] %v1855_v57  ;;  %v1432_v58 = vpop.f32.mrb[80].mxu0  ;;  %v199_v57 = vld [vmem:[#allocation2 + $0x188] sm:$0xff] }
 0x1bb   :  { %v1721_v60 = vpop.f32.mrb[80].mxu1  ;;  %v1434_v61 = vpop.f32.mrb[81].mxu0 }
 0x1bc   :  { %v1722_v62 = vadd.f32 %v1721_v60, %v1432_v58  ;;  %v1723_v63 = vpop.f32.mrb[81].mxu1  ;;  %v1435_v0 = vpop.f32.mrb[82].mxu0 }
 0x1bd   :  { %v1724_v2 = vpop.f32.mrb[82].mxu1  ;;  %v1437_v3 = vpop.f32.mrb[83].mxu0 }
 0x1be   :  { %v1856_v4 = vadd.f32 %v1722_v62, %v190_v59  ;;  %v1725_v5 = vadd.f32 %v1724_v2, %v1435_v0  ;;  %v1726_v6 = vpop.f32.mrb[83].mxu1 }
 0x1c0   :  { %1920 = vst [vmem:[#allocation2 + $0x140] sm:$0xff] %v1856_v4  ;;  %v1857_v7 = vadd.f32 %v1725_v5, %v191_v1  ;;  %v200_v1 = vld [vmem:[#allocation2 + $0x190] sm:$0xff] }
 0x1c2   :  { %1921 = vst [vmem:[#allocation2 + $0x148] sm:$0xff] %v1857_v7  ;;  %v1440_v8 = vpop.f32.mrb[84].mxu0  ;;  %v201_v7 = vld [vmem:[#allocation2 + $0x198] sm:$0xff] }
 0x1c3   :  { %v1729_v10 = vpop.f32.mrb[84].mxu1  ;;  %v1442_v11 = vpop.f32.mrb[85].mxu0 }
 0x1c4   :  { %v1730_v12 = vadd.f32 %v1729_v10, %v1440_v8  ;;  %v1731_v13 = vpop.f32.mrb[85].mxu1  ;;  %v1443_v14 = vpop.f32.mrb[86].mxu0 }
 0x1c5   :  { %v1732_v16 = vpop.f32.mrb[86].mxu1  ;;  %v1445_v17 = vpop.f32.mrb[87].mxu0 }
 0x1c6   :  { %v1858_v18 = vadd.f32 %v1730_v12, %v192_v9  ;;  %v1733_v19 = vadd.f32 %v1732_v16, %v1443_v14  ;;  %v1734_v20 = vpop.f32.mrb[87].mxu1 }
 0x1c8   :  { %1922 = vst [vmem:[#allocation2 + $0x150] sm:$0xff] %v1858_v18  ;;  %v1859_v21 = vadd.f32 %v1733_v19, %v193_v15  ;;  %v202_v15 = vld [vmem:[#allocation2 + $0x1a0] sm:$0xff] }
 0x1ca   :  { %1923 = vst [vmem:[#allocation2 + $0x158] sm:$0xff] %v1859_v21  ;;  %v1448_v22 = vpop.f32.mrb[88].mxu0  ;;  %v203_v21 = vld [vmem:[#allocation2 + $0x1a8] sm:$0xff] }
 0x1cb   :  { %v1737_v24 = vpop.f32.mrb[88].mxu1  ;;  %v1450_v25 = vpop.f32.mrb[89].mxu0 }
 0x1cc   :  { %v1738_v26 = vadd.f32 %v1737_v24, %v1448_v22  ;;  %v1739_v27 = vpop.f32.mrb[89].mxu1  ;;  %v1451_v28 = vpop.f32.mrb[90].mxu0 }
 0x1cd   :  { %v1740_v30 = vpop.f32.mrb[90].mxu1  ;;  %v1453_v31 = vpop.f32.mrb[91].mxu0 }
 0x1ce   :  { %v1860_v32 = vadd.f32 %v1738_v26, %v194_v23  ;;  %v1741_v33 = vadd.f32 %v1740_v30, %v1451_v28  ;;  %v1742_v34 = vpop.f32.mrb[91].mxu1 }
 0x1d0   :  { %1924 = vst [vmem:[#allocation2 + $0x160] sm:$0xff] %v1860_v32  ;;  %v1861_v35 = vadd.f32 %v1741_v33, %v195_v29  ;;  %v204_v29 = vld [vmem:[#allocation2 + $0x1b0] sm:$0xff] }
 0x1d2   :  { %1925 = vst [vmem:[#allocation2 + $0x168] sm:$0xff] %v1861_v35  ;;  %v1456_v36 = vpop.f32.mrb[92].mxu0  ;;  %v205_v35 = vld [vmem:[#allocation2 + $0x1b8] sm:$0xff] }
 0x1d3   :  { %v1745_v38 = vpop.f32.mrb[92].mxu1  ;;  %v1458_v39 = vpop.f32.mrb[93].mxu0 }
 0x1d4   :  { %v1746_v40 = vadd.f32 %v1745_v38, %v1456_v36  ;;  %v1747_v41 = vpop.f32.mrb[93].mxu1  ;;  %v1459_v42 = vpop.f32.mrb[94].mxu0 }
 0x1d5   :  { %v1748_v44 = vpop.f32.mrb[94].mxu1  ;;  %v1461_v45 = vpop.f32.mrb[95].mxu0 }
 0x1d6   :  { %v1862_v46 = vadd.f32 %v1746_v40, %v196_v37  ;;  %v1749_v47 = vadd.f32 %v1748_v44, %v1459_v42  ;;  %v1750_v48 = vpop.f32.mrb[95].mxu1 }
 0x1d8   :  { %1926 = vst [vmem:[#allocation2 + $0x170] sm:$0xff] %v1862_v46  ;;  %v1863_v49 = vadd.f32 %v1749_v47, %v197_v43  ;;  %v206_v43 = vld [vmem:[#allocation2 + $0x1c0] sm:$0xff] }
 0x1da   :  { %1927 = vst [vmem:[#allocation2 + $0x178] sm:$0xff] %v1863_v49  ;;  %v1464_v50 = vpop.f32.mrb[96].mxu0  ;;  %v207_v49 = vld [vmem:[#allocation2 + $0x1c8] sm:$0xff] }
 0x1db   :  { %v1753_v52 = vpop.f32.mrb[96].mxu1  ;;  %v1466_v53 = vpop.f32.mrb[97].mxu0 }
 0x1dc   :  { %v1754_v54 = vadd.f32 %v1753_v52, %v1464_v50  ;;  %v1755_v55 = vpop.f32.mrb[97].mxu1  ;;  %v1467_v56 = vpop.f32.mrb[98].mxu0 }
 0x1dd   :  { %v1756_v58 = vpop.f32.mrb[98].mxu1  ;;  %v1469_v59 = vpop.f32.mrb[99].mxu0 }
 0x1de   :  { %v1864_v60 = vadd.f32 %v1754_v54, %v198_v51  ;;  %v1757_v61 = vadd.f32 %v1756_v58, %v1467_v56  ;;  %v1758_v62 = vpop.f32.mrb[99].mxu1 }
 0x1e0   :  { %1928 = vst [vmem:[#allocation2 + $0x180] sm:$0xff] %v1864_v60  ;;  %v1865_v63 = vadd.f32 %v1757_v61, %v199_v57  ;;  %v208_v57 = vld [vmem:[#allocation2 + $0x1d0] sm:$0xff] }
 0x1e2   :  { %1929 = vst [vmem:[#allocation2 + $0x188] sm:$0xff] %v1865_v63  ;;  %v1472_v0 = vpop.f32.mrb[100].mxu0  ;;  %v209_v63 = vld [vmem:[#allocation2 + $0x1d8] sm:$0xff] }
 0x1e3   :  { %v1761_v2 = vpop.f32.mrb[100].mxu1  ;;  %v1474_v3 = vpop.f32.mrb[101].mxu0 }
 0x1e4   :  { %v1762_v4 = vadd.f32 %v1761_v2, %v1472_v0  ;;  %v1763_v5 = vpop.f32.mrb[101].mxu1  ;;  %v1475_v6 = vpop.f32.mrb[102].mxu0 }
 0x1e5   :  { %v1764_v8 = vpop.f32.mrb[102].mxu1  ;;  %v1477_v9 = vpop.f32.mrb[103].mxu0 }
 0x1e6   :  { %v1866_v10 = vadd.f32 %v1762_v4, %v200_v1  ;;  %v1765_v11 = vadd.f32 %v1764_v8, %v1475_v6  ;;  %v1766_v12 = vpop.f32.mrb[103].mxu1 }
 0x1e8   :  { %1930 = vst [vmem:[#allocation2 + $0x190] sm:$0xff] %v1866_v10  ;;  %v1867_v13 = vadd.f32 %v1765_v11, %v201_v7  ;;  %v210_v7 = vld [vmem:[#allocation2 + $0x1e0] sm:$0xff] }
 0x1ea   :  { %1931 = vst [vmem:[#allocation2 + $0x198] sm:$0xff] %v1867_v13  ;;  %v1480_v14 = vpop.f32.mrb[104].mxu0  ;;  %v211_v13 = vld [vmem:[#allocation2 + $0x1e8] sm:$0xff] }
 0x1eb   :  { %v1769_v16 = vpop.f32.mrb[104].mxu1  ;;  %v1482_v17 = vpop.f32.mrb[105].mxu0 }
 0x1ec   :  { %v1770_v18 = vadd.f32 %v1769_v16, %v1480_v14  ;;  %v1771_v19 = vpop.f32.mrb[105].mxu1  ;;  %v1483_v20 = vpop.f32.mrb[106].mxu0 }
 0x1ed   :  { %v1772_v22 = vpop.f32.mrb[106].mxu1  ;;  %v1485_v23 = vpop.f32.mrb[107].mxu0 }
 0x1ee   :  { %v1868_v24 = vadd.f32 %v1770_v18, %v202_v15  ;;  %v1773_v25 = vadd.f32 %v1772_v22, %v1483_v20  ;;  %v1774_v26 = vpop.f32.mrb[107].mxu1 }
 0x1f0   :  { %1932 = vst [vmem:[#allocation2 + $0x1a0] sm:$0xff] %v1868_v24  ;;  %v1869_v27 = vadd.f32 %v1773_v25, %v203_v21  ;;  %v212_v21 = vld [vmem:[#allocation2 + $0x1f0] sm:$0xff] }
 0x1f2   :  { %1933 = vst [vmem:[#allocation2 + $0x1a8] sm:$0xff] %v1869_v27  ;;  %v1488_v28 = vpop.f32.mrb[108].mxu0  ;;  %v213_v27 = vld [vmem:[#allocation2 + $0x1f8] sm:$0xff] }
 0x1f3   :  { %v1777_v30 = vpop.f32.mrb[108].mxu1  ;;  %v1490_v31 = vpop.f32.mrb[109].mxu0 }
 0x1f4   :  { %v1778_v32 = vadd.f32 %v1777_v30, %v1488_v28  ;;  %v1779_v33 = vpop.f32.mrb[109].mxu1  ;;  %v1491_v34 = vpop.f32.mrb[110].mxu0 }
 0x1f5   :  { %v1780_v36 = vpop.f32.mrb[110].mxu1  ;;  %v1493_v37 = vpop.f32.mrb[111].mxu0 }
 0x1f6   :  { %v1870_v38 = vadd.f32 %v1778_v32, %v204_v29  ;;  %v1781_v39 = vadd.f32 %v1780_v36, %v1491_v34  ;;  %v1782_v40 = vpop.f32.mrb[111].mxu1 }
 0x1f8   :  { %1934 = vst [vmem:[#allocation2 + $0x1b0] sm:$0xff] %v1870_v38  ;;  %v1871_v41 = vadd.f32 %v1781_v39, %v205_v35 }
 0x1fa   :  { %1935 = vst [vmem:[#allocation2 + $0x1b8] sm:$0xff] %v1871_v41  ;;  %v1496_v42 = vpop.f32.mrb[112].mxu0 }
 0x1fb   :  { %v1785_v44 = vpop.f32.mrb[112].mxu1  ;;  %v1498_v45 = vpop.f32.mrb[113].mxu0 }
 0x1fc   :  { %v1786_v46 = vadd.f32 %v1785_v44, %v1496_v42  ;;  %v1787_v47 = vpop.f32.mrb[113].mxu1  ;;  %v1499_v48 = vpop.f32.mrb[114].mxu0 }
 0x1fd   :  { %v1788_v50 = vpop.f32.mrb[114].mxu1  ;;  %v1501_v51 = vpop.f32.mrb[115].mxu0 }
 0x1fe   :  { %v1872_v52 = vadd.f32 %v1786_v46, %v206_v43  ;;  %v1789_v53 = vadd.f32 %v1788_v50, %v1499_v48  ;;  %v1790_v54 = vpop.f32.mrb[115].mxu1 }
 0x200   :  { %1936 = vst [vmem:[#allocation2 + $0x1c0] sm:$0xff] %v1872_v52  ;;  %v1873_v55 = vadd.f32 %v1789_v53, %v207_v49 }
 0x202   :  { %1937 = vst [vmem:[#allocation2 + $0x1c8] sm:$0xff] %v1873_v55  ;;  %v1504_v56 = vpop.f32.mrb[116].mxu0 }
 0x203   :  { %v1793_v58 = vpop.f32.mrb[116].mxu1  ;;  %v1506_v59 = vpop.f32.mrb[117].mxu0 }
 0x204   :  { %v1794_v60 = vadd.f32 %v1793_v58, %v1504_v56  ;;  %v1795_v61 = vpop.f32.mrb[117].mxu1  ;;  %v1507_v62 = vpop.f32.mrb[118].mxu0 }
 0x205   :  { %v1796_v0 = vpop.f32.mrb[118].mxu1  ;;  %v1509_v1 = vpop.f32.mrb[119].mxu0 }
 0x206   :  { %v1874_v2 = vadd.f32 %v1794_v60, %v208_v57  ;;  %v1797_v3 = vadd.f32 %v1796_v0, %v1507_v62  ;;  %v1798_v4 = vpop.f32.mrb[119].mxu1 }
 0x208   :  { %1938 = vst [vmem:[#allocation2 + $0x1d0] sm:$0xff] %v1874_v2  ;;  %v1875_v5 = vadd.f32 %v1797_v3, %v209_v63 }
 0x20a   :  { %1939 = vst [vmem:[#allocation2 + $0x1d8] sm:$0xff] %v1875_v5  ;;  %v1512_v6 = vpop.f32.mrb[120].mxu0 }
 0x20b   :  { %v1801_v8 = vpop.f32.mrb[120].mxu1  ;;  %v1514_v9 = vpop.f32.mrb[121].mxu0 }
 0x20c   :  { %v1802_v10 = vadd.f32 %v1801_v8, %v1512_v6  ;;  %v1803_v11 = vpop.f32.mrb[121].mxu1  ;;  %v1515_v12 = vpop.f32.mrb[122].mxu0 }
 0x20d   :  { %v1804_v14 = vpop.f32.mrb[122].mxu1  ;;  %v1517_v15 = vpop.f32.mrb[123].mxu0 }
 0x20e   :  { %v1876_v16 = vadd.f32 %v1802_v10, %v210_v7  ;;  %v1805_v17 = vadd.f32 %v1804_v14, %v1515_v12  ;;  %v1806_v18 = vpop.f32.mrb[123].mxu1 }
 0x210   :  { %1940 = vst [vmem:[#allocation2 + $0x1e0] sm:$0xff] %v1876_v16  ;;  %v1877_v19 = vadd.f32 %v1805_v17, %v211_v13 }
 0x212   :  { %1941 = vst [vmem:[#allocation2 + $0x1e8] sm:$0xff] %v1877_v19  ;;  %v1520_v20 = vpop.f32.mrb[124].mxu0 }
 0x213   :  { %v1809_v22 = vpop.f32.mrb[124].mxu1  ;;  %v1522_v23 = vpop.f32.mrb[125].mxu0 }
 0x214   :  { %v1810_v24 = vadd.f32 %v1809_v22, %v1520_v20  ;;  %v1811_v25 = vpop.f32.mrb[125].mxu1  ;;  %v1523_v26 = vpop.f32.mrb[126].mxu0 }
 0x215   :  { %v1812_v28 = vpop.f32.mrb[126].mxu1  ;;  %v1525_v29 = vpop.f32.mrb[127].mxu0 }
 0x216   :  { %v1878_v30 = vadd.f32 %v1810_v24, %v212_v21  ;;  %v1813_v31 = vadd.f32 %v1812_v28, %v1523_v26  ;;  %v1814_v32 = vpop.f32.mrb[127].mxu1 }
 0x218   :  { %1942 = vst [vmem:[#allocation2 + $0x1f0] sm:$0xff] %v1878_v30  ;;  %v1879_v33 = vadd.f32 %v1813_v31, %v213_v27 }
 0x21a   :  { %1943 = vst [vmem:[#allocation2 + $0x1f8] sm:$0xff] %v1879_v33 }
 0x21b PF:  { %v2013_v34 = vld [vmem:[%s3968_s4 + $0x10] sm:$0xff]  ;;  %v2011_v35 = vld [vmem:[%s3968_s4] sm:$0xff]  ;;  %v3063_v36 = vmov 0   ;;  %v2014_v37 = vld [vmem:[%s3968_s4 + $0x18] sm:$0xff] }
 0x21c   :  { %3060 = vset.pattern.permute.xlu1 %v3063_v36  ;;  %3059 = vset.pattern.permute.xlu0 %v3063_v36  ;;  %v2012_v38 = vld [vmem:[%s3968_s4 + $0x8] sm:$0xff]  ;;  %v2015_v40 = vld [vmem:[%s3968_s4 + $0x20] sm:$0xff]  ;;  %v2018_v41 = vld [vmem:[%s3968_s4 + $0x38] sm:$0xff] }
 0x21d   :  { %2087 = vperm.xlu1 %3060, %v2013_v34   ;;  %2077 = vperm.xlu0 %3059, %v2011_v35   ;;  %v2016_v39 = vld [vmem:[%s3968_s4 + $0x28] sm:$0xff]  ;;  %v2017_v42 = vld [vmem:[%s3968_s4 + $0x30] sm:$0xff]  ;;  %v2019_v44 = vld [vmem:[%s3968_s4 + $0x40] sm:$0xff] }
 0x21e   :  { %v2020_v43 = vld [vmem:[%s3968_s4 + $0x48] sm:$0xff]  ;;  %v2022_v45 = vld [vmem:[%s3968_s4 + $0x58] sm:$0xff]  ;;  %v2021_v46 = vld [vmem:[%s3968_s4 + $0x50] sm:$0xff] }
 0x21f   :  { %v2024_v47 = vld [vmem:[%s3968_s4 + $0x68] sm:$0xff]  ;;  %v2023_v48 = vld [vmem:[%s3968_s4 + $0x60] sm:$0xff]  ;;  %v2026_v49 = vld [vmem:[%s3968_s4 + $0x78] sm:$0xff] }
 0x220   :  { %v2025_v50 = vld [vmem:[%s3968_s4 + $0x70] sm:$0xff]  ;;  %v2028_v51 = vld [vmem:[%s3968_s4 + $0x88] sm:$0xff]  ;;  %v2027_v52 = vld [vmem:[%s3968_s4 + $0x80] sm:$0xff] }
 0x221   :  { %2092 = vperm.xlu1 %3060, %v2014_v37   ;;  %2082 = vperm.xlu0 %3059, %v2012_v38   ;;  %v2030_v53 = vld [vmem:[%s3968_s4 + $0x98] sm:$0xff]  ;;  %v2029_v54 = vld [vmem:[%s3968_s4 + $0x90] sm:$0xff]  ;;  %v2032_v55 = vld [vmem:[%s3968_s4 + $0xa8] sm:$0xff] }
 0x222   :  { %v2031_v56 = vld [vmem:[%s3968_s4 + $0xa0] sm:$0xff]  ;;  %v2034_v57 = vld [vmem:[%s3968_s4 + $0xb8] sm:$0xff]  ;;  %v2033_v58 = vld [vmem:[%s3968_s4 + $0xb0] sm:$0xff] }
 0x223   :  { %v2036_v59 = vld [vmem:[%s3968_s4 + $0xc8] sm:$0xff]  ;;  %v2035_v60 = vld [vmem:[%s3968_s4 + $0xc0] sm:$0xff]  ;;  %v2038_v61 = vld [vmem:[%s3968_s4 + $0xd8] sm:$0xff] }
 0x224   :  { %v2037_v62 = vld [vmem:[%s3968_s4 + $0xd0] sm:$0xff]  ;;  %v2040_v63 = vld [vmem:[%s3968_s4 + $0xe8] sm:$0xff]  ;;  %v2039_v0 = vld [vmem:[%s3968_s4 + $0xe0] sm:$0xff] }
 0x225   :  { %2102 = vperm.xlu1 %3060, %v2016_v39   ;;  %2097 = vperm.xlu0 %3059, %v2015_v40   ;;  %v2042_v1 = vld [vmem:[%s3968_s4 + $0xf8] sm:$0xff]  ;;  %v2041_v2 = vld [vmem:[%s3968_s4 + $0xf0] sm:$0xff]  ;;  %v2044_v3 = vld [vmem:[%s3968_s4 + $0x108] sm:$0xff] }
 0x226   :  { %v2043_v4 = vld [vmem:[%s3968_s4 + $0x100] sm:$0xff]  ;;  %v2046_v5 = vld [vmem:[%s3968_s4 + $0x118] sm:$0xff]  ;;  %v2045_v6 = vld [vmem:[%s3968_s4 + $0x110] sm:$0xff] }
 0x227   :  { %v2048_v7 = vld [vmem:[%s3968_s4 + $0x128] sm:$0xff]  ;;  %v2047_v8 = vld [vmem:[%s3968_s4 + $0x120] sm:$0xff]  ;;  %v2050_v9 = vld [vmem:[%s3968_s4 + $0x138] sm:$0xff] }
 0x228   :  { %v2049_v10 = vld [vmem:[%s3968_s4 + $0x130] sm:$0xff]  ;;  %v2052_v11 = vld [vmem:[%s3968_s4 + $0x148] sm:$0xff]  ;;  %v2051_v12 = vld [vmem:[%s3968_s4 + $0x140] sm:$0xff] }
 0x229   :  { %2112 = vperm.xlu1 %3060, %v2018_v41   ;;  %2107 = vperm.xlu0 %3059, %v2017_v42   ;;  %v2054_v13 = vld [vmem:[%s3968_s4 + $0x158] sm:$0xff]  ;;  %v2053_v14 = vld [vmem:[%s3968_s4 + $0x150] sm:$0xff]  ;;  %v2056_v15 = vld [vmem:[%s3968_s4 + $0x168] sm:$0xff] }
 0x22a   :  { %v2055_v16 = vld [vmem:[%s3968_s4 + $0x160] sm:$0xff]  ;;  %v2058_v17 = vld [vmem:[%s3968_s4 + $0x178] sm:$0xff]  ;;  %v2057_v18 = vld [vmem:[%s3968_s4 + $0x170] sm:$0xff] }
 0x22b   :  { %v2060_v19 = vld [vmem:[%s3968_s4 + $0x188] sm:$0xff]  ;;  %v2059_v20 = vld [vmem:[%s3968_s4 + $0x180] sm:$0xff]  ;;  %v2062_v21 = vld [vmem:[%s3968_s4 + $0x198] sm:$0xff] }
 0x22c   :  { %v2061_v22 = vld [vmem:[%s3968_s4 + $0x190] sm:$0xff]  ;;  %v2064_v23 = vld [vmem:[%s3968_s4 + $0x1a8] sm:$0xff]  ;;  %v2063_v24 = vld [vmem:[%s3968_s4 + $0x1a0] sm:$0xff] }
 0x22d   :  { %2122 = vperm.xlu1 %3060, %v2020_v43   ;;  %2117 = vperm.xlu0 %3059, %v2019_v44   ;;  %v2066_v25 = vld [vmem:[%s3968_s4 + $0x1b8] sm:$0xff]  ;;  %v2065_v26 = vld [vmem:[%s3968_s4 + $0x1b0] sm:$0xff]  ;;  %v2068_v27 = vld [vmem:[%s3968_s4 + $0x1c8] sm:$0xff] }
 0x22e   :  { %v2067_v28 = vld [vmem:[%s3968_s4 + $0x1c0] sm:$0xff]  ;;  %v2070_v29 = vld [vmem:[%s3968_s4 + $0x1d8] sm:$0xff]  ;;  %v2069_v30 = vld [vmem:[%s3968_s4 + $0x1d0] sm:$0xff] }
 0x22f   :  { %v2072_v31 = vld [vmem:[%s3968_s4 + $0x1e8] sm:$0xff]  ;;  %v2071_v32 = vld [vmem:[%s3968_s4 + $0x1e0] sm:$0xff]  ;;  %v2074_v33 = vld [vmem:[%s3968_s4 + $0x1f8] sm:$0xff] }
 0x230   :  { %v2073_v34 = vld [vmem:[%s3968_s4 + $0x1f0] sm:$0xff]  ;;  %v1947_v36 = vld [vmem:[#allocation2] sm:$0xff]  ;;  %v1950_v43 = vld [vmem:[#allocation2 + $0x18] sm:$0xff] }
 0x231   :  { %2132 = vperm.xlu1 %3060, %v2022_v45   ;;  %2127 = vperm.xlu0 %3059, %v2021_v46   ;;  %v1949_v35 = vld [vmem:[#allocation2 + $0x10] sm:$0xff]  ;;  %v2459_v39 = vld [vmem:[%s3969_s5] sm:$0xff]  ;;  %v1948_v44 = vld [vmem:[#allocation2 + $0x8] sm:$0xff] }
 0x232   :  { %v2461_v37 = vld [vmem:[%s3969_s5 + $0x10] sm:$0xff] }
 0x235   :  { %2142 = vperm.xlu1 %3060, %v2024_v47   ;;  %2137 = vperm.xlu0 %3059, %v2023_v48   ;;  %v2462_v47 = vld [vmem:[%s3969_s5 + $0x18] sm:$0xff] }
 0x239   :  { %2152 = vperm.xlu1 %3060, %v2026_v49   ;;  %2147 = vperm.xlu0 %3059, %v2025_v50   ;;  %v2460_v49 = vld [vmem:[%s3969_s5 + $0x8] sm:$0xff] }
 0x23d   :  { %2162 = vperm.xlu1 %3060, %v2028_v51   ;;  %2157 = vperm.xlu0 %3059, %v2027_v52  }
 0x241   :  { %2172 = vperm.xlu1 %3060, %v2030_v53   ;;  %2167 = vperm.xlu0 %3059, %v2029_v54   ;;  %v1952_v53 = vld [vmem:[#allocation2 + $0x28] sm:$0xff]  ;;  %v1951_v54 = vld [vmem:[#allocation2 + $0x20] sm:$0xff] }
 0x245   :  { %2182 = vperm.xlu1 %3060, %v2032_v55   ;;  %2177 = vperm.xlu0 %3059, %v2031_v56  }
 0x249   :  { %2192 = vperm.xlu1 %3060, %v2034_v57   ;;  %2187 = vperm.xlu0 %3059, %v2033_v58   ;;  %v2464_v57 = vld [vmem:[%s3969_s5 + $0x28] sm:$0xff] }
 0x24d   :  { %2202 = vperm.xlu1 %3060, %v2036_v59   ;;  %2197 = vperm.xlu0 %3059, %v2035_v60   ;;  %v2463_v59 = vld [vmem:[%s3969_s5 + $0x20] sm:$0xff] }
 0x251   :  { %2212 = vperm.xlu1 %3060, %v2038_v61   ;;  %2207 = vperm.xlu0 %3059, %v2037_v62  }
 0x255   :  { %2222 = vperm.xlu1 %3060, %v2040_v63   ;;  %2217 = vperm.xlu0 %3059, %v2039_v0   ;;  %v1954_v63 = vld [vmem:[#allocation2 + $0x38] sm:$0xff]  ;;  %v1953_v0 = vld [vmem:[#allocation2 + $0x30] sm:$0xff] }
 0x259   :  { %2232 = vperm.xlu1 %3060, %v2042_v1   ;;  %2227 = vperm.xlu0 %3059, %v2041_v2  }
 0x25d   :  { %2242 = vperm.xlu1 %3060, %v2044_v3   ;;  %2237 = vperm.xlu0 %3059, %v2043_v4   ;;  %v2466_v3 = vld [vmem:[%s3969_s5 + $0x38] sm:$0xff] }
 0x261   :  { %2252 = vperm.xlu1 %3060, %v2046_v5   ;;  %2247 = vperm.xlu0 %3059, %v2045_v6   ;;  %v2465_v5 = vld [vmem:[%s3969_s5 + $0x30] sm:$0xff] }
 0x265   :  { %2262 = vperm.xlu1 %3060, %v2048_v7   ;;  %2257 = vperm.xlu0 %3059, %v2047_v8  }
 0x269   :  { %2272 = vperm.xlu1 %3060, %v2050_v9   ;;  %2267 = vperm.xlu0 %3059, %v2049_v10   ;;  %v1956_v9 = vld [vmem:[#allocation2 + $0x48] sm:$0xff]  ;;  %v1955_v10 = vld [vmem:[#allocation2 + $0x40] sm:$0xff] }
 0x26d   :  { %2282 = vperm.xlu1 %3060, %v2052_v11   ;;  %2277 = vperm.xlu0 %3059, %v2051_v12  }
 0x271   :  { %2292 = vperm.xlu1 %3060, %v2054_v13   ;;  %2287 = vperm.xlu0 %3059, %v2053_v14   ;;  %v2468_v13 = vld [vmem:[%s3969_s5 + $0x48] sm:$0xff] }
 0x275   :  { %2302 = vperm.xlu1 %3060, %v2056_v15   ;;  %2297 = vperm.xlu0 %3059, %v2055_v16   ;;  %v2467_v15 = vld [vmem:[%s3969_s5 + $0x40] sm:$0xff] }
 0x279   :  { %2312 = vperm.xlu1 %3060, %v2058_v17   ;;  %2307 = vperm.xlu0 %3059, %v2057_v18  }
 0x27d   :  { %2322 = vperm.xlu1 %3060, %v2060_v19   ;;  %2317 = vperm.xlu0 %3059, %v2059_v20   ;;  %v1958_v19 = vld [vmem:[#allocation2 + $0x58] sm:$0xff]  ;;  %v1957_v20 = vld [vmem:[#allocation2 + $0x50] sm:$0xff] }
 0x281   :  { %2332 = vperm.xlu1 %3060, %v2062_v21   ;;  %2327 = vperm.xlu0 %3059, %v2061_v22  }
 0x285   :  { %2342 = vperm.xlu1 %3060, %v2064_v23   ;;  %2337 = vperm.xlu0 %3059, %v2063_v24   ;;  %v2470_v23 = vld [vmem:[%s3969_s5 + $0x58] sm:$0xff] }
 0x289   :  { %2352 = vperm.xlu1 %3060, %v2066_v25   ;;  %2347 = vperm.xlu0 %3059, %v2065_v26   ;;  %v2469_v25 = vld [vmem:[%s3969_s5 + $0x50] sm:$0xff] }
 0x28d   :  { %2362 = vperm.xlu1 %3060, %v2068_v27   ;;  %2357 = vperm.xlu0 %3059, %v2067_v28  }
 0x291   :  { %2372 = vperm.xlu1 %3060, %v2070_v29   ;;  %2367 = vperm.xlu0 %3059, %v2069_v30   ;;  %v1960_v29 = vld [vmem:[#allocation2 + $0x68] sm:$0xff]  ;;  %v1959_v30 = vld [vmem:[#allocation2 + $0x60] sm:$0xff] }
 0x295   :  { %2382 = vperm.xlu1 %3060, %v2072_v31   ;;  %2377 = vperm.xlu0 %3059, %v2071_v32  }
 0x299   :  { %2392 = vperm.xlu1 %3060, %v2074_v33   ;;  %2387 = vperm.xlu0 %3059, %v2073_v34   ;;  %v2472_v33 = vld [vmem:[%s3969_s5 + $0x68] sm:$0xff] }
 0x29c   :  { %v2088_v38 = vpop.permute.xlu1 %2087  ;;  %v2078_v40 = vpop.permute.xlu0 %2077 }
 0x29d   :  { %v2397_v41 = vmul.f32 %v2088_v38, %v1949_v35  ;;  %v2395_v42 = vmul.f32 %v2078_v40, %v1947_v36  ;;  %v2471_v35 = vld [vmem:[%s3969_s5 + $0x60] sm:$0xff]  ;;  %v1961_v40 = vld [vmem:[#allocation2 + $0x70] sm:$0xff] }
 0x29f   :  { %v2525_v45 = vadd.f32 %v2461_v37, %v2397_v41  ;;  %v2523_v46 = vadd.f32 %v2459_v39, %v2395_v42  ;;  %v1962_v39 = vld [vmem:[#allocation2 + $0x78] sm:$0xff] }
 0x2a0   :  { %v2093_v48 = vpop.permute.xlu1 %2092  ;;  %v2083_v50 = vpop.permute.xlu0 %2082 }
 0x2a1   :  { %2589 = vst [vmem:[%s3970_s6 + $0x10] sm:$0xff] %v2525_v45  ;;  %2587 = vst [vmem:[%s3970_s6] sm:$0xff] %v2523_v46  ;;  %v2398_v51 = vmul.f32 %v2093_v48, %v1950_v43  ;;  %v2396_v52 = vmul.f32 %v2083_v50, %v1948_v44  ;;  %v2474_v43 = vld [vmem:[%s3969_s5 + $0x78] sm:$0xff]  ;;  %v2473_v45 = vld [vmem:[%s3969_s5 + $0x70] sm:$0xff] }
 0x2a2   :  { %v1963_v50 = vld [vmem:[#allocation2 + $0x80] sm:$0xff] }
 0x2a3   :  { %v2526_v55 = vadd.f32 %v2462_v47, %v2398_v51  ;;  %v2524_v56 = vadd.f32 %v2460_v49, %v2396_v52  ;;  %v1964_v49 = vld [vmem:[#allocation2 + $0x88] sm:$0xff] }
 0x2a4   :  { %v2103_v58 = vpop.permute.xlu1 %2102  ;;  %v2098_v60 = vpop.permute.xlu0 %2097 }
 0x2a5   :  { %2590 = vst [vmem:[%s3970_s6 + $0x18] sm:$0xff] %v2526_v55  ;;  %2588 = vst [vmem:[%s3970_s6 + $0x8] sm:$0xff] %v2524_v56  ;;  %v2400_v61 = vmul.f32 %v2103_v58, %v1952_v53  ;;  %v2399_v62 = vmul.f32 %v2098_v60, %v1951_v54  ;;  %v2476_v53 = vld [vmem:[%s3969_s5 + $0x88] sm:$0xff]  ;;  %v2475_v55 = vld [vmem:[%s3969_s5 + $0x80] sm:$0xff] }
 0x2a6   :  { %v1965_v60 = vld [vmem:[#allocation2 + $0x90] sm:$0xff] }
 0x2a7   :  { %v2528_v1 = vadd.f32 %v2464_v57, %v2400_v61  ;;  %v2527_v2 = vadd.f32 %v2463_v59, %v2399_v62  ;;  %v1966_v59 = vld [vmem:[#allocation2 + $0x98] sm:$0xff] }
 0x2a8   :  { %v2113_v4 = vpop.permute.xlu1 %2112  ;;  %v2108_v6 = vpop.permute.xlu0 %2107 }
 0x2a9   :  { %2592 = vst [vmem:[%s3970_s6 + $0x28] sm:$0xff] %v2528_v1  ;;  %2591 = vst [vmem:[%s3970_s6 + $0x20] sm:$0xff] %v2527_v2  ;;  %v2402_v7 = vmul.f32 %v2113_v4, %v1954_v63  ;;  %v2401_v8 = vmul.f32 %v2108_v6, %v1953_v0  ;;  %v2478_v63 = vld [vmem:[%s3969_s5 + $0x98] sm:$0xff]  ;;  %v2477_v1 = vld [vmem:[%s3969_s5 + $0x90] sm:$0xff] }
 0x2aa   :  { %v1967_v6 = vld [vmem:[#allocation2 + $0xa0] sm:$0xff] }
 0x2ab   :  { %v2530_v11 = vadd.f32 %v2466_v3, %v2402_v7  ;;  %v2529_v12 = vadd.f32 %v2465_v5, %v2401_v8  ;;  %v1968_v5 = vld [vmem:[#allocation2 + $0xa8] sm:$0xff] }
 0x2ac   :  { %v2123_v14 = vpop.permute.xlu1 %2122  ;;  %v2118_v16 = vpop.permute.xlu0 %2117 }
 0x2ad   :  { %2594 = vst [vmem:[%s3970_s6 + $0x38] sm:$0xff] %v2530_v11  ;;  %2593 = vst [vmem:[%s3970_s6 + $0x30] sm:$0xff] %v2529_v12  ;;  %v2404_v17 = vmul.f32 %v2123_v14, %v1956_v9  ;;  %v2403_v18 = vmul.f32 %v2118_v16, %v1955_v10  ;;  %v2480_v9 = vld [vmem:[%s3969_s5 + $0xa8] sm:$0xff]  ;;  %v2479_v11 = vld [vmem:[%s3969_s5 + $0xa0] sm:$0xff] }
 0x2ae   :  { %v1969_v16 = vld [vmem:[#allocation2 + $0xb0] sm:$0xff] }
 0x2af   :  { %v2532_v21 = vadd.f32 %v2468_v13, %v2404_v17  ;;  %v2531_v22 = vadd.f32 %v2467_v15, %v2403_v18  ;;  %v1970_v15 = vld [vmem:[#allocation2 + $0xb8] sm:$0xff] }
 0x2b0   :  { %v2133_v24 = vpop.permute.xlu1 %2132  ;;  %v2128_v26 = vpop.permute.xlu0 %2127 }
 0x2b1   :  { %2596 = vst [vmem:[%s3970_s6 + $0x48] sm:$0xff] %v2532_v21  ;;  %2595 = vst [vmem:[%s3970_s6 + $0x40] sm:$0xff] %v2531_v22  ;;  %v2406_v27 = vmul.f32 %v2133_v24, %v1958_v19  ;;  %v2405_v28 = vmul.f32 %v2128_v26, %v1957_v20  ;;  %v2482_v19 = vld [vmem:[%s3969_s5 + $0xb8] sm:$0xff]  ;;  %v2481_v21 = vld [vmem:[%s3969_s5 + $0xb0] sm:$0xff] }
 0x2b2   :  { %v1971_v26 = vld [vmem:[#allocation2 + $0xc0] sm:$0xff] }
 0x2b3   :  { %v2534_v31 = vadd.f32 %v2470_v23, %v2406_v27  ;;  %v2533_v32 = vadd.f32 %v2469_v25, %v2405_v28  ;;  %v1972_v25 = vld [vmem:[#allocation2 + $0xc8] sm:$0xff] }
 0x2b4   :  { %v2143_v34 = vpop.permute.xlu1 %2142  ;;  %v2138_v36 = vpop.permute.xlu0 %2137 }
 0x2b5   :  { %2598 = vst [vmem:[%s3970_s6 + $0x58] sm:$0xff] %v2534_v31  ;;  %2597 = vst [vmem:[%s3970_s6 + $0x50] sm:$0xff] %v2533_v32  ;;  %v2408_v37 = vmul.f32 %v2143_v34, %v1960_v29  ;;  %v2407_v38 = vmul.f32 %v2138_v36, %v1959_v30  ;;  %v2484_v29 = vld [vmem:[%s3969_s5 + $0xc8] sm:$0xff]  ;;  %v2483_v31 = vld [vmem:[%s3969_s5 + $0xc0] sm:$0xff] }
 0x2b6   :  { %v1973_v36 = vld [vmem:[#allocation2 + $0xd0] sm:$0xff] }
 0x2b7   :  { %v2536_v41 = vadd.f32 %v2472_v33, %v2408_v37  ;;  %v2535_v42 = vadd.f32 %v2471_v35, %v2407_v38  ;;  %v1974_v35 = vld [vmem:[#allocation2 + $0xd8] sm:$0xff] }
 0x2b8   :  { %v2153_v44 = vpop.permute.xlu1 %2152  ;;  %v2148_v46 = vpop.permute.xlu0 %2147 }
 0x2b9   :  { %2600 = vst [vmem:[%s3970_s6 + $0x68] sm:$0xff] %v2536_v41  ;;  %2599 = vst [vmem:[%s3970_s6 + $0x60] sm:$0xff] %v2535_v42  ;;  %v2410_v47 = vmul.f32 %v2153_v44, %v1962_v39  ;;  %v2409_v48 = vmul.f32 %v2148_v46, %v1961_v40  ;;  %v2486_v39 = vld [vmem:[%s3969_s5 + $0xd8] sm:$0xff]  ;;  %v2485_v41 = vld [vmem:[%s3969_s5 + $0xd0] sm:$0xff] }
 0x2ba   :  { %v1975_v46 = vld [vmem:[#allocation2 + $0xe0] sm:$0xff] }
 0x2bb   :  { %v2538_v51 = vadd.f32 %v2474_v43, %v2410_v47  ;;  %v2537_v52 = vadd.f32 %v2473_v45, %v2409_v48  ;;  %v1976_v45 = vld [vmem:[#allocation2 + $0xe8] sm:$0xff] }
 0x2bc   :  { %v2163_v54 = vpop.permute.xlu1 %2162  ;;  %v2158_v56 = vpop.permute.xlu0 %2157 }
 0x2bd   :  { %2602 = vst [vmem:[%s3970_s6 + $0x78] sm:$0xff] %v2538_v51  ;;  %2601 = vst [vmem:[%s3970_s6 + $0x70] sm:$0xff] %v2537_v52  ;;  %v2412_v57 = vmul.f32 %v2163_v54, %v1964_v49  ;;  %v2411_v58 = vmul.f32 %v2158_v56, %v1963_v50  ;;  %v2488_v49 = vld [vmem:[%s3969_s5 + $0xe8] sm:$0xff]  ;;  %v2487_v51 = vld [vmem:[%s3969_s5 + $0xe0] sm:$0xff] }
 0x2be   :  { %v1977_v56 = vld [vmem:[#allocation2 + $0xf0] sm:$0xff] }
 0x2bf   :  { %v2540_v61 = vadd.f32 %v2476_v53, %v2412_v57  ;;  %v2539_v62 = vadd.f32 %v2475_v55, %v2411_v58  ;;  %v1978_v55 = vld [vmem:[#allocation2 + $0xf8] sm:$0xff] }
 0x2c0   :  { %v2173_v0 = vpop.permute.xlu1 %2172  ;;  %v2168_v2 = vpop.permute.xlu0 %2167 }
 0x2c1   :  { %2604 = vst [vmem:[%s3970_s6 + $0x88] sm:$0xff] %v2540_v61  ;;  %2603 = vst [vmem:[%s3970_s6 + $0x80] sm:$0xff] %v2539_v62  ;;  %v2414_v3 = vmul.f32 %v2173_v0, %v1966_v59  ;;  %v2413_v4 = vmul.f32 %v2168_v2, %v1965_v60  ;;  %v2490_v59 = vld [vmem:[%s3969_s5 + $0xf8] sm:$0xff]  ;;  %v2489_v61 = vld [vmem:[%s3969_s5 + $0xf0] sm:$0xff] }
 0x2c2   :  { %v1979_v2 = vld [vmem:[#allocation2 + $0x100] sm:$0xff] }
 0x2c3   :  { %v2542_v7 = vadd.f32 %v2478_v63, %v2414_v3  ;;  %v2541_v8 = vadd.f32 %v2477_v1, %v2413_v4  ;;  %v1980_v1 = vld [vmem:[#allocation2 + $0x108] sm:$0xff] }
 0x2c4   :  { %v2183_v10 = vpop.permute.xlu1 %2182  ;;  %v2178_v12 = vpop.permute.xlu0 %2177 }
 0x2c5   :  { %2606 = vst [vmem:[%s3970_s6 + $0x98] sm:$0xff] %v2542_v7  ;;  %2605 = vst [vmem:[%s3970_s6 + $0x90] sm:$0xff] %v2541_v8  ;;  %v2416_v13 = vmul.f32 %v2183_v10, %v1968_v5  ;;  %v2415_v14 = vmul.f32 %v2178_v12, %v1967_v6  ;;  %v2492_v5 = vld [vmem:[%s3969_s5 + $0x108] sm:$0xff]  ;;  %v2491_v7 = vld [vmem:[%s3969_s5 + $0x100] sm:$0xff] }
 0x2c6   :  { %v1981_v12 = vld [vmem:[#allocation2 + $0x110] sm:$0xff] }
 0x2c7   :  { %v2544_v17 = vadd.f32 %v2480_v9, %v2416_v13  ;;  %v2543_v18 = vadd.f32 %v2479_v11, %v2415_v14  ;;  %v1982_v11 = vld [vmem:[#allocation2 + $0x118] sm:$0xff] }
 0x2c8   :  { %v2193_v20 = vpop.permute.xlu1 %2192  ;;  %v2188_v22 = vpop.permute.xlu0 %2187 }
 0x2c9   :  { %2608 = vst [vmem:[%s3970_s6 + $0xa8] sm:$0xff] %v2544_v17  ;;  %2607 = vst [vmem:[%s3970_s6 + $0xa0] sm:$0xff] %v2543_v18  ;;  %v2418_v23 = vmul.f32 %v2193_v20, %v1970_v15  ;;  %v2417_v24 = vmul.f32 %v2188_v22, %v1969_v16  ;;  %v2494_v15 = vld [vmem:[%s3969_s5 + $0x118] sm:$0xff]  ;;  %v2493_v17 = vld [vmem:[%s3969_s5 + $0x110] sm:$0xff] }
 0x2ca   :  { %v1983_v22 = vld [vmem:[#allocation2 + $0x120] sm:$0xff] }
 0x2cb   :  { %v2546_v27 = vadd.f32 %v2482_v19, %v2418_v23  ;;  %v2545_v28 = vadd.f32 %v2481_v21, %v2417_v24  ;;  %v1984_v21 = vld [vmem:[#allocation2 + $0x128] sm:$0xff] }
 0x2cc   :  { %v2203_v30 = vpop.permute.xlu1 %2202  ;;  %v2198_v32 = vpop.permute.xlu0 %2197 }
 0x2cd   :  { %2610 = vst [vmem:[%s3970_s6 + $0xb8] sm:$0xff] %v2546_v27  ;;  %2609 = vst [vmem:[%s3970_s6 + $0xb0] sm:$0xff] %v2545_v28  ;;  %v2420_v33 = vmul.f32 %v2203_v30, %v1972_v25  ;;  %v2419_v34 = vmul.f32 %v2198_v32, %v1971_v26  ;;  %v2496_v25 = vld [vmem:[%s3969_s5 + $0x128] sm:$0xff]  ;;  %v2495_v27 = vld [vmem:[%s3969_s5 + $0x120] sm:$0xff] }
 0x2ce   :  { %v1985_v32 = vld [vmem:[#allocation2 + $0x130] sm:$0xff] }
 0x2cf   :  { %v2548_v37 = vadd.f32 %v2484_v29, %v2420_v33  ;;  %v2547_v38 = vadd.f32 %v2483_v31, %v2419_v34  ;;  %v1986_v31 = vld [vmem:[#allocation2 + $0x138] sm:$0xff] }
 0x2d0   :  { %v2213_v40 = vpop.permute.xlu1 %2212  ;;  %v2208_v42 = vpop.permute.xlu0 %2207 }
 0x2d1   :  { %2612 = vst [vmem:[%s3970_s6 + $0xc8] sm:$0xff] %v2548_v37  ;;  %2611 = vst [vmem:[%s3970_s6 + $0xc0] sm:$0xff] %v2547_v38  ;;  %v2422_v43 = vmul.f32 %v2213_v40, %v1974_v35  ;;  %v2421_v44 = vmul.f32 %v2208_v42, %v1973_v36  ;;  %v2498_v35 = vld [vmem:[%s3969_s5 + $0x138] sm:$0xff]  ;;  %v2497_v37 = vld [vmem:[%s3969_s5 + $0x130] sm:$0xff] }
 0x2d2   :  { %v1987_v42 = vld [vmem:[#allocation2 + $0x140] sm:$0xff] }
 0x2d3   :  { %v2550_v47 = vadd.f32 %v2486_v39, %v2422_v43  ;;  %v2549_v48 = vadd.f32 %v2485_v41, %v2421_v44  ;;  %v1988_v41 = vld [vmem:[#allocation2 + $0x148] sm:$0xff] }
 0x2d4   :  { %v2223_v50 = vpop.permute.xlu1 %2222  ;;  %v2218_v52 = vpop.permute.xlu0 %2217 }
 0x2d5   :  { %2614 = vst [vmem:[%s3970_s6 + $0xd8] sm:$0xff] %v2550_v47  ;;  %2613 = vst [vmem:[%s3970_s6 + $0xd0] sm:$0xff] %v2549_v48  ;;  %v2424_v53 = vmul.f32 %v2223_v50, %v1976_v45  ;;  %v2423_v54 = vmul.f32 %v2218_v52, %v1975_v46  ;;  %v2500_v45 = vld [vmem:[%s3969_s5 + $0x148] sm:$0xff]  ;;  %v2499_v47 = vld [vmem:[%s3969_s5 + $0x140] sm:$0xff] }
 0x2d6   :  { %v1989_v52 = vld [vmem:[#allocation2 + $0x150] sm:$0xff] }
 0x2d7   :  { %v2552_v57 = vadd.f32 %v2488_v49, %v2424_v53  ;;  %v2551_v58 = vadd.f32 %v2487_v51, %v2423_v54  ;;  %v1990_v51 = vld [vmem:[#allocation2 + $0x158] sm:$0xff] }
 0x2d8   :  { %v2233_v60 = vpop.permute.xlu1 %2232  ;;  %v2228_v62 = vpop.permute.xlu0 %2227 }
 0x2d9   :  { %2616 = vst [vmem:[%s3970_s6 + $0xe8] sm:$0xff] %v2552_v57  ;;  %2615 = vst [vmem:[%s3970_s6 + $0xe0] sm:$0xff] %v2551_v58  ;;  %v2426_v63 = vmul.f32 %v2233_v60, %v1978_v55  ;;  %v2425_v0 = vmul.f32 %v2228_v62, %v1977_v56  ;;  %v2502_v55 = vld [vmem:[%s3969_s5 + $0x158] sm:$0xff]  ;;  %v2501_v57 = vld [vmem:[%s3969_s5 + $0x150] sm:$0xff] }
 0x2da   :  { %v1991_v62 = vld [vmem:[#allocation2 + $0x160] sm:$0xff] }
 0x2db   :  { %v2554_v3 = vadd.f32 %v2490_v59, %v2426_v63  ;;  %v2553_v4 = vadd.f32 %v2489_v61, %v2425_v0  ;;  %v1992_v61 = vld [vmem:[#allocation2 + $0x168] sm:$0xff] }
 0x2dc   :  { %v2243_v6 = vpop.permute.xlu1 %2242  ;;  %v2238_v8 = vpop.permute.xlu0 %2237 }
 0x2dd   :  { %2618 = vst [vmem:[%s3970_s6 + $0xf8] sm:$0xff] %v2554_v3  ;;  %2617 = vst [vmem:[%s3970_s6 + $0xf0] sm:$0xff] %v2553_v4  ;;  %v2428_v9 = vmul.f32 %v2243_v6, %v1980_v1  ;;  %v2427_v10 = vmul.f32 %v2238_v8, %v1979_v2  ;;  %v2504_v1 = vld [vmem:[%s3969_s5 + $0x168] sm:$0xff]  ;;  %v2503_v3 = vld [vmem:[%s3969_s5 + $0x160] sm:$0xff] }
 0x2de   :  { %v1993_v8 = vld [vmem:[#allocation2 + $0x170] sm:$0xff] }
 0x2df   :  { %v2556_v13 = vadd.f32 %v2492_v5, %v2428_v9  ;;  %v2555_v14 = vadd.f32 %v2491_v7, %v2427_v10  ;;  %v1994_v7 = vld [vmem:[#allocation2 + $0x178] sm:$0xff] }
 0x2e0   :  { %v2253_v16 = vpop.permute.xlu1 %2252  ;;  %v2248_v18 = vpop.permute.xlu0 %2247 }
 0x2e1   :  { %2620 = vst [vmem:[%s3970_s6 + $0x108] sm:$0xff] %v2556_v13  ;;  %2619 = vst [vmem:[%s3970_s6 + $0x100] sm:$0xff] %v2555_v14  ;;  %v2430_v19 = vmul.f32 %v2253_v16, %v1982_v11  ;;  %v2429_v20 = vmul.f32 %v2248_v18, %v1981_v12  ;;  %v2506_v11 = vld [vmem:[%s3969_s5 + $0x178] sm:$0xff]  ;;  %v2505_v13 = vld [vmem:[%s3969_s5 + $0x170] sm:$0xff] }
 0x2e2   :  { %v1995_v18 = vld [vmem:[#allocation2 + $0x180] sm:$0xff] }
 0x2e3   :  { %v2558_v23 = vadd.f32 %v2494_v15, %v2430_v19  ;;  %v2557_v24 = vadd.f32 %v2493_v17, %v2429_v20  ;;  %v1996_v17 = vld [vmem:[#allocation2 + $0x188] sm:$0xff] }
 0x2e4   :  { %v2263_v26 = vpop.permute.xlu1 %2262  ;;  %v2258_v28 = vpop.permute.xlu0 %2257 }
 0x2e5   :  { %2622 = vst [vmem:[%s3970_s6 + $0x118] sm:$0xff] %v2558_v23  ;;  %2621 = vst [vmem:[%s3970_s6 + $0x110] sm:$0xff] %v2557_v24  ;;  %v2432_v29 = vmul.f32 %v2263_v26, %v1984_v21  ;;  %v2431_v30 = vmul.f32 %v2258_v28, %v1983_v22  ;;  %v2508_v21 = vld [vmem:[%s3969_s5 + $0x188] sm:$0xff]  ;;  %v2507_v23 = vld [vmem:[%s3969_s5 + $0x180] sm:$0xff] }
 0x2e6   :  { %v1997_v28 = vld [vmem:[#allocation2 + $0x190] sm:$0xff] }
 0x2e7   :  { %v2560_v33 = vadd.f32 %v2496_v25, %v2432_v29  ;;  %v2559_v34 = vadd.f32 %v2495_v27, %v2431_v30  ;;  %v1998_v27 = vld [vmem:[#allocation2 + $0x198] sm:$0xff] }
 0x2e8   :  { %v2273_v36 = vpop.permute.xlu1 %2272  ;;  %v2268_v38 = vpop.permute.xlu0 %2267 }
 0x2e9   :  { %2624 = vst [vmem:[%s3970_s6 + $0x128] sm:$0xff] %v2560_v33  ;;  %2623 = vst [vmem:[%s3970_s6 + $0x120] sm:$0xff] %v2559_v34  ;;  %v2434_v39 = vmul.f32 %v2273_v36, %v1986_v31  ;;  %v2433_v40 = vmul.f32 %v2268_v38, %v1985_v32  ;;  %v2510_v31 = vld [vmem:[%s3969_s5 + $0x198] sm:$0xff]  ;;  %v2509_v33 = vld [vmem:[%s3969_s5 + $0x190] sm:$0xff] }
 0x2ea   :  { %v1999_v38 = vld [vmem:[#allocation2 + $0x1a0] sm:$0xff] }
 0x2eb   :  { %v2562_v43 = vadd.f32 %v2498_v35, %v2434_v39  ;;  %v2561_v44 = vadd.f32 %v2497_v37, %v2433_v40  ;;  %v2000_v37 = vld [vmem:[#allocation2 + $0x1a8] sm:$0xff] }
 0x2ec   :  { %v2283_v46 = vpop.permute.xlu1 %2282  ;;  %v2278_v48 = vpop.permute.xlu0 %2277 }
 0x2ed   :  { %2626 = vst [vmem:[%s3970_s6 + $0x138] sm:$0xff] %v2562_v43  ;;  %2625 = vst [vmem:[%s3970_s6 + $0x130] sm:$0xff] %v2561_v44  ;;  %v2436_v49 = vmul.f32 %v2283_v46, %v1988_v41  ;;  %v2435_v50 = vmul.f32 %v2278_v48, %v1987_v42  ;;  %v2512_v41 = vld [vmem:[%s3969_s5 + $0x1a8] sm:$0xff]  ;;  %v2511_v43 = vld [vmem:[%s3969_s5 + $0x1a0] sm:$0xff] }
 0x2ee   :  { %v2001_v48 = vld [vmem:[#allocation2 + $0x1b0] sm:$0xff] }
 0x2ef   :  { %v2564_v53 = vadd.f32 %v2500_v45, %v2436_v49  ;;  %v2563_v54 = vadd.f32 %v2499_v47, %v2435_v50  ;;  %v2002_v47 = vld [vmem:[#allocation2 + $0x1b8] sm:$0xff] }
 0x2f0   :  { %v2293_v56 = vpop.permute.xlu1 %2292  ;;  %v2288_v58 = vpop.permute.xlu0 %2287 }
 0x2f1   :  { %2628 = vst [vmem:[%s3970_s6 + $0x148] sm:$0xff] %v2564_v53  ;;  %2627 = vst [vmem:[%s3970_s6 + $0x140] sm:$0xff] %v2563_v54  ;;  %v2438_v59 = vmul.f32 %v2293_v56, %v1990_v51  ;;  %v2437_v60 = vmul.f32 %v2288_v58, %v1989_v52  ;;  %v2514_v51 = vld [vmem:[%s3969_s5 + $0x1b8] sm:$0xff]  ;;  %v2513_v53 = vld [vmem:[%s3969_s5 + $0x1b0] sm:$0xff] }
 0x2f2   :  { %v2003_v58 = vld [vmem:[#allocation2 + $0x1c0] sm:$0xff] }
 0x2f3   :  { %v2566_v63 = vadd.f32 %v2502_v55, %v2438_v59  ;;  %v2565_v0 = vadd.f32 %v2501_v57, %v2437_v60  ;;  %v2004_v57 = vld [vmem:[#allocation2 + $0x1c8] sm:$0xff] }
 0x2f4   :  { %v2303_v2 = vpop.permute.xlu1 %2302  ;;  %v2298_v4 = vpop.permute.xlu0 %2297 }
 0x2f5   :  { %2630 = vst [vmem:[%s3970_s6 + $0x158] sm:$0xff] %v2566_v63  ;;  %2629 = vst [vmem:[%s3970_s6 + $0x150] sm:$0xff] %v2565_v0  ;;  %v2440_v5 = vmul.f32 %v2303_v2, %v1992_v61  ;;  %v2439_v6 = vmul.f32 %v2298_v4, %v1991_v62  ;;  %v2516_v61 = vld [vmem:[%s3969_s5 + $0x1c8] sm:$0xff]  ;;  %v2515_v63 = vld [vmem:[%s3969_s5 + $0x1c0] sm:$0xff] }
 0x2f6   :  { %v2005_v4 = vld [vmem:[#allocation2 + $0x1d0] sm:$0xff] }
 0x2f7   :  { %v2568_v9 = vadd.f32 %v2504_v1, %v2440_v5  ;;  %v2567_v10 = vadd.f32 %v2503_v3, %v2439_v6  ;;  %v2006_v3 = vld [vmem:[#allocation2 + $0x1d8] sm:$0xff] }
 0x2f8   :  { %v2313_v12 = vpop.permute.xlu1 %2312  ;;  %v2308_v14 = vpop.permute.xlu0 %2307 }
 0x2f9   :  { %2632 = vst [vmem:[%s3970_s6 + $0x168] sm:$0xff] %v2568_v9  ;;  %2631 = vst [vmem:[%s3970_s6 + $0x160] sm:$0xff] %v2567_v10  ;;  %v2442_v15 = vmul.f32 %v2313_v12, %v1994_v7  ;;  %v2441_v16 = vmul.f32 %v2308_v14, %v1993_v8  ;;  %v2518_v7 = vld [vmem:[%s3969_s5 + $0x1d8] sm:$0xff]  ;;  %v2517_v9 = vld [vmem:[%s3969_s5 + $0x1d0] sm:$0xff] }
 0x2fa   :  { %v2007_v14 = vld [vmem:[#allocation2 + $0x1e0] sm:$0xff] }
 0x2fb   :  { %v2570_v19 = vadd.f32 %v2506_v11, %v2442_v15  ;;  %v2569_v20 = vadd.f32 %v2505_v13, %v2441_v16  ;;  %v2008_v13 = vld [vmem:[#allocation2 + $0x1e8] sm:$0xff] }
 0x2fc   :  { %v2323_v22 = vpop.permute.xlu1 %2322  ;;  %v2318_v24 = vpop.permute.xlu0 %2317 }
 0x2fd   :  { %2634 = vst [vmem:[%s3970_s6 + $0x178] sm:$0xff] %v2570_v19  ;;  %2633 = vst [vmem:[%s3970_s6 + $0x170] sm:$0xff] %v2569_v20  ;;  %v2444_v25 = vmul.f32 %v2323_v22, %v1996_v17  ;;  %v2443_v26 = vmul.f32 %v2318_v24, %v1995_v18  ;;  %v2520_v17 = vld [vmem:[%s3969_s5 + $0x1e8] sm:$0xff]  ;;  %v2519_v19 = vld [vmem:[%s3969_s5 + $0x1e0] sm:$0xff] }
 0x2fe   :  { %v2009_v24 = vld [vmem:[#allocation2 + $0x1f0] sm:$0xff] }
 0x2ff   :  { %v2572_v29 = vadd.f32 %v2508_v21, %v2444_v25  ;;  %v2571_v30 = vadd.f32 %v2507_v23, %v2443_v26  ;;  %v2010_v23 = vld [vmem:[#allocation2 + $0x1f8] sm:$0xff] }
 0x300   :  { %v2333_v32 = vpop.permute.xlu1 %2332  ;;  %v2328_v34 = vpop.permute.xlu0 %2327 }
 0x301   :  { %2636 = vst [vmem:[%s3970_s6 + $0x188] sm:$0xff] %v2572_v29  ;;  %2635 = vst [vmem:[%s3970_s6 + $0x180] sm:$0xff] %v2571_v30  ;;  %v2446_v35 = vmul.f32 %v2333_v32, %v1998_v27  ;;  %v2445_v36 = vmul.f32 %v2328_v34, %v1997_v28  ;;  %v2522_v27 = vld [vmem:[%s3969_s5 + $0x1f8] sm:$0xff]  ;;  %v2521_v29 = vld [vmem:[%s3969_s5 + $0x1f0] sm:$0xff] }
 0x303   :  { %v2574_v39 = vadd.f32 %v2510_v31, %v2446_v35  ;;  %v2573_v40 = vadd.f32 %v2509_v33, %v2445_v36 }
 0x304   :  { %v2343_v42 = vpop.permute.xlu1 %2342  ;;  %v2338_v44 = vpop.permute.xlu0 %2337 }
 0x305   :  { %2638 = vst [vmem:[%s3970_s6 + $0x198] sm:$0xff] %v2574_v39  ;;  %2637 = vst [vmem:[%s3970_s6 + $0x190] sm:$0xff] %v2573_v40  ;;  %v2448_v45 = vmul.f32 %v2343_v42, %v2000_v37  ;;  %v2447_v46 = vmul.f32 %v2338_v44, %v1999_v38 }
 0x307   :  { %v2576_v49 = vadd.f32 %v2512_v41, %v2448_v45  ;;  %v2575_v50 = vadd.f32 %v2511_v43, %v2447_v46 }
 0x308   :  { %v2353_v52 = vpop.permute.xlu1 %2352  ;;  %v2348_v54 = vpop.permute.xlu0 %2347 }
 0x309   :  { %2640 = vst [vmem:[%s3970_s6 + $0x1a8] sm:$0xff] %v2576_v49  ;;  %2639 = vst [vmem:[%s3970_s6 + $0x1a0] sm:$0xff] %v2575_v50  ;;  %v2450_v55 = vmul.f32 %v2353_v52, %v2002_v47  ;;  %v2449_v56 = vmul.f32 %v2348_v54, %v2001_v48 }
 0x30b   :  { %v2578_v59 = vadd.f32 %v2514_v51, %v2450_v55  ;;  %v2577_v60 = vadd.f32 %v2513_v53, %v2449_v56 }
 0x30c   :  { %v2363_v62 = vpop.permute.xlu1 %2362  ;;  %v2358_v0 = vpop.permute.xlu0 %2357 }
 0x30d   :  { %2642 = vst [vmem:[%s3970_s6 + $0x1b8] sm:$0xff] %v2578_v59  ;;  %2641 = vst [vmem:[%s3970_s6 + $0x1b0] sm:$0xff] %v2577_v60  ;;  %v2452_v1 = vmul.f32 %v2363_v62, %v2004_v57  ;;  %v2451_v2 = vmul.f32 %v2358_v0, %v2003_v58 }
 0x30f   :  { %v2580_v5 = vadd.f32 %v2516_v61, %v2452_v1  ;;  %v2579_v6 = vadd.f32 %v2515_v63, %v2451_v2 }
 0x310   :  { %v2373_v8 = vpop.permute.xlu1 %2372  ;;  %v2368_v10 = vpop.permute.xlu0 %2367 }
 0x311   :  { %2644 = vst [vmem:[%s3970_s6 + $0x1c8] sm:$0xff] %v2580_v5  ;;  %2643 = vst [vmem:[%s3970_s6 + $0x1c0] sm:$0xff] %v2579_v6  ;;  %v2454_v11 = vmul.f32 %v2373_v8, %v2006_v3  ;;  %v2453_v12 = vmul.f32 %v2368_v10, %v2005_v4 }
 0x313   :  { %v2582_v15 = vadd.f32 %v2518_v7, %v2454_v11  ;;  %v2581_v16 = vadd.f32 %v2517_v9, %v2453_v12 }
 0x314   :  { %v2383_v18 = vpop.permute.xlu1 %2382  ;;  %v2378_v20 = vpop.permute.xlu0 %2377 }
 0x315   :  { %2646 = vst [vmem:[%s3970_s6 + $0x1d8] sm:$0xff] %v2582_v15  ;;  %2645 = vst [vmem:[%s3970_s6 + $0x1d0] sm:$0xff] %v2581_v16  ;;  %v2456_v21 = vmul.f32 %v2383_v18, %v2008_v13  ;;  %v2455_v22 = vmul.f32 %v2378_v20, %v2007_v14 }
 0x317   :  { %v2584_v25 = vadd.f32 %v2520_v17, %v2456_v21  ;;  %v2583_v26 = vadd.f32 %v2519_v19, %v2455_v22 }
 0x318   :  { %v2393_v28 = vpop.permute.xlu1 %2392  ;;  %v2388_v30 = vpop.permute.xlu0 %2387 }
 0x319   :  { %2648 = vst [vmem:[%s3970_s6 + $0x1e8] sm:$0xff] %v2584_v25  ;;  %2647 = vst [vmem:[%s3970_s6 + $0x1e0] sm:$0xff] %v2583_v26  ;;  %v2458_v31 = vmul.f32 %v2393_v28, %v2010_v23  ;;  %v2457_v32 = vmul.f32 %v2388_v30, %v2009_v24 }
 0x31b   :  { %v2586_v33 = vadd.f32 %v2522_v27, %v2458_v31  ;;  %v2585_v34 = vadd.f32 %v2521_v29, %v2457_v32 }
 0x31d   :  { %2650 = vst [vmem:[%s3970_s6 + $0x1f8] sm:$0xff] %v2586_v33  ;;  %2649 = vst [vmem:[%s3970_s6 + $0x1f0] sm:$0xff] %v2585_v34 }

// kernel: gnn_forward.7
= control target key start
LH: loop header
LB: loop body
LE: loop exit
PB: predicated region body
PF: predicated region fallthrough
CT: control target
= control target key end

     0   :  { %v3700_v0 = vmov 0.0   ;;  %s4509_s0 = inlined_call_operand.<no memory space> [shape: s32[1], index: 0, kind: input, shape index: {}]   ;;  %s4510_s1 = inlined_call_operand.<no memory space> [shape: s32[1], index: 1, kind: input, shape index: {}]   ;;  %s4511_s4 = inlined_call_operand.vmem [shape: f32[512,1], index: 4, kind: input, shape index: {}]   ;;  %s4512_s5 = inlined_call_operand.vmem [shape: f32[512,128], index: 5, kind: input, shape index: {}]   ;;  %s4513_s6 = inlined_call_operand.vmem [shape: bf16[512,128], index: 6, kind: output, shape index: {}]   ;;  %s4514_s2 = inlined_call_operand.vmem [shape: bf16[512,512], index: 2, kind: input, shape index: {}]   ;;  %s4515_s3 = inlined_call_operand.vmem [shape: bf16[512,128], index: 3, kind: input, shape index: {}]  }
   0x1   :  { %s2987_s23 = sshll.u32 %s4510_s1, 2  ;;  %s2989_s26 = sshll.u32 %s4510_s1, 6  ;;  %80 = vst [vmem:[#allocation2] sm:$0xff] %v3700_v0  ;;  %81 = vst [vmem:[#allocation2 + $0x8] sm:$0xff] %v3700_v0 }
   0x2   :  { %82 = vst [vmem:[#allocation2 + $0x10] sm:$0xff] %v3700_v0  ;;  %83 = vst [vmem:[#allocation2 + $0x18] sm:$0xff] %v3700_v0  ;;  %p58_p0 = scmp.lt.s32.totalorder %s2987_s23, 3  ;;  %p68_p1 = scmp.lt.s32.totalorder %s2989_s26, 63 }
   0x3   :  { %84 = vst [vmem:[#allocation2 + $0x20] sm:$0xff] %v3700_v0  ;;  %85 = vst [vmem:[#allocation2 + $0x28] sm:$0xff] %v3700_v0  ;;  %p2991_p2 = scmp.eq.s32.totalorder %s4509_s0, 0 }
   0x4   :  { %86 = vst [vmem:[#allocation2 + $0x30] sm:$0xff] %v3700_v0  ;;  %87 = vst [vmem:[#allocation2 + $0x38] sm:$0xff] %v3700_v0  ;;  %s4517_s23 = smov (!%p58_p0, %s2987_s23), 3  ;;  %s4519_s26 = smov (!%p68_p1, %s2989_s26), 63 }
   0x5   :  { %88 = vst [vmem:[#allocation2 + $0x40] sm:$0xff] %v3700_v0  ;;  %89 = vst [vmem:[#allocation2 + $0x48] sm:$0xff] %v3700_v0  ;;  %s2988_s11 = sshll.u32 %s4517_s23, 2  ;;  %s2990_s15 = sshll.u32 %s4519_s26, 2  ;;  %v3701_v2 = vmov (!%p2991_p2), 0  }
   0x6   :  { %90 = vst [vmem:[#allocation2 + $0x50] sm:$0xff] %v3700_v0  ;;  %91 = vst [vmem:[#allocation2 + $0x58] sm:$0xff] %v3700_v0  ;;  %s3827_s14 = scalar_lea.vmem %s4514_s2, %s2988_s11  ;;  %s3832_s18 = scalar_lea.vmem %s4515_s3, %s2990_s15  ;;  %1238 = vmatprep.subr.bf16.mxu0 (!%p2991_p2), %v3701_v2  ;;  %1527 = vmatprep.subr.bf16.mxu1 (!%p2991_p2), %v3701_v2 }
   0x7   :  { %92 = vst [vmem:[#allocation2 + $0x60] sm:$0xff] %v3700_v0  ;;  %93 = vst [vmem:[#allocation2 + $0x68] sm:$0xff] %v3700_v0  ;;  %v3474_v1 = vld [vmem:[%s3832_s18] sm:$0xff] (!%p2991_p2)   ;;  %v3476_v4 = vld [vmem:[%s3832_s18 + $0x8] sm:$0xff] (!%p2991_p2)  }
   0x8   :  { %94 = vst [vmem:[#allocation2 + $0x70] sm:$0xff] %v3700_v0  ;;  %95 = vst [vmem:[#allocation2 + $0x78] sm:$0xff] %v3700_v0  ;;  %v3475_v3 = vld [vmem:[%s3832_s18 + $0x80] sm:$0xff] (!%p2991_p2)   ;;  %1239 = vmatpush1.bf16.msra.mxu0 (!%p2991_p2), %v3474_v1  ;;  %v3477_v5 = vld [vmem:[%s3832_s18 + $0x88] sm:$0xff] (!%p2991_p2)  }
   0x9   :  { %96 = vst [vmem:[#allocation2 + $0x80] sm:$0xff] %v3700_v0  ;;  %97 = vst [vmem:[#allocation2 + $0x88] sm:$0xff] %v3700_v0  ;;  %1528 = vmatpush1.bf16.msra.mxu1 (!%p2991_p2), %v3475_v3  ;;  %1240 = vmatprep.subr.bf16.mxu0 (!%p2991_p2), %v3701_v2  ;;  %v3478_v6 = vld [vmem:[%s3832_s18 + $0x10] sm:$0xff] (!%p2991_p2)   ;;  %v3480_v8 = vld [vmem:[%s3832_s18 + $0x18] sm:$0xff] (!%p2991_p2)  }
   0xa   :  { %98 = vst [vmem:[#allocation2 + $0x90] sm:$0xff] %v3700_v0  ;;  %99 = vst [vmem:[#allocation2 + $0x98] sm:$0xff] %v3700_v0  ;;  %1529 = vmatprep.subr.bf16.mxu1 (!%p2991_p2), %v3701_v2  ;;  %v3479_v7 = vld [vmem:[%s3832_s18 + $0x90] sm:$0xff] (!%p2991_p2)   ;;  %v3481_v9 = vld [vmem:[%s3832_s18 + $0x98] sm:$0xff] (!%p2991_p2)  }
   0xb   :  { %100 = vst [vmem:[#allocation2 + $0xa0] sm:$0xff] %v3700_v0  ;;  %101 = vst [vmem:[#allocation2 + $0xa8] sm:$0xff] %v3700_v0  ;;  %v3482_v10 = vld [vmem:[%s3832_s18 + $0x20] sm:$0xff] (!%p2991_p2)   ;;  %v3484_v12 = vld [vmem:[%s3832_s18 + $0x28] sm:$0xff] (!%p2991_p2)  }
   0xc   :  { %102 = vst [vmem:[#allocation2 + $0xb0] sm:$0xff] %v3700_v0  ;;  %103 = vst [vmem:[#allocation2 + $0xb8] sm:$0xff] %v3700_v0  ;;  %1241 = vmatpush1.bf16.msra.mxu0 (!%p2991_p2), %v3476_v4  ;;  %v3483_v11 = vld [vmem:[%s3832_s18 + $0xa0] sm:$0xff] (!%p2991_p2)   ;;  %v3485_v13 = vld [vmem:[%s3832_s18 + $0xa8] sm:$0xff] (!%p2991_p2)  }
   0xd   :  { %104 = vst [vmem:[#allocation2 + $0xc0] sm:$0xff] %v3700_v0  ;;  %105 = vst [vmem:[#allocation2 + $0xc8] sm:$0xff] %v3700_v0  ;;  %1530 = vmatpush1.bf16.msra.mxu1 (!%p2991_p2), %v3477_v5  ;;  %1242 = vmatprep.subr.bf16.mxu0 (!%p2991_p2), %v3701_v2  ;;  %v3486_v14 = vld [vmem:[%s3832_s18 + $0x30] sm:$0xff] (!%p2991_p2)   ;;  %v3488_v16 = vld [vmem:[%s3832_s18 + $0x38] sm:$0xff] (!%p2991_p2)  }
   0xe   :  { %106 = vst [vmem:[#allocation2 + $0xd0] sm:$0xff] %v3700_v0  ;;  %107 = vst [vmem:[#allocation2 + $0xd8] sm:$0xff] %v3700_v0  ;;  %1531 = vmatprep.subr.bf16.mxu1 (!%p2991_p2), %v3701_v2  ;;  %v3487_v15 = vld [vmem:[%s3832_s18 + $0xb0] sm:$0xff] (!%p2991_p2)   ;;  %v3489_v17 = vld [vmem:[%s3832_s18 + $0xb8] sm:$0xff] (!%p2991_p2)  }
   0xf   :  { %108 = vst [vmem:[#allocation2 + $0xe0] sm:$0xff] %v3700_v0  ;;  %109 = vst [vmem:[#allocation2 + $0xe8] sm:$0xff] %v3700_v0  ;;  %v3490_v18 = vld [vmem:[%s3832_s18 + $0x40] sm:$0xff] (!%p2991_p2)   ;;  %v3492_v21 = vld [vmem:[%s3832_s18 + $0x48] sm:$0xff] (!%p2991_p2)  }
  0x10   :  { %110 = vst [vmem:[#allocation2 + $0xf0] sm:$0xff] %v3700_v0  ;;  %111 = vst [vmem:[#allocation2 + $0xf8] sm:$0xff] %v3700_v0  ;;  %1243 = vmatpush1.bf16.msra.mxu0 (!%p2991_p2), %v3478_v6  ;;  %v3491_v19 = vld [vmem:[%s3832_s18 + $0xc0] sm:$0xff] (!%p2991_p2)   ;;  %v3511_v22 = vld [vmem:[%s3827_s14 + $0xc] ss:$16 sps:$4 sm:$0xff] (!%p2991_p2)  }
  0x11   :  { %112 = vst [vmem:[#allocation2 + $0x100] sm:$0xff] %v3700_v0  ;;  %113 = vst [vmem:[#allocation2 + $0x108] sm:$0xff] %v3700_v0  ;;  %1532 = vmatpush1.bf16.msra.mxu1 (!%p2991_p2), %v3479_v7  ;;  %1244 = vmatprep.subr.bf16.mxu0 (!%p2991_p2), %v3701_v2  ;;  %v3508_v20 = vld [vmem:[%s3827_s14 + $0x4] ss:$16 sps:$4 sm:$0xff] (!%p2991_p2)   ;;  %v3493_v23 = vld [vmem:[%s3832_s18 + $0xc8] sm:$0xff] (!%p2991_p2)  }
  0x12   :  { %114 = vst [vmem:[#allocation2 + $0x110] sm:$0xff] %v3700_v0  ;;  %115 = vst [vmem:[#allocation2 + $0x118] sm:$0xff] %v3700_v0  ;;  %1533 = vmatprep.subr.bf16.mxu1 (!%p2991_p2), %v3701_v2  ;;  %1270 = vmatprep.mubr.bf16.mxu0 (!%p2991_p2), %v3508_v20  ;;  %v3494_v24 = vld [vmem:[%s3832_s18 + $0x50] sm:$0xff] (!%p2991_p2)   ;;  %v3496_v26 = vld [vmem:[%s3832_s18 + $0x58] sm:$0xff] (!%p2991_p2)  }
  0x13   :  { %116 = vst [vmem:[#allocation2 + $0x120] sm:$0xff] %v3700_v0  ;;  %117 = vst [vmem:[#allocation2 + $0x128] sm:$0xff] %v3700_v0  ;;  %1559 = vmatprep.mubr.bf16.mxu1 (!%p2991_p2), %v3511_v22  ;;  %v3495_v25 = vld [vmem:[%s3832_s18 + $0xd0] sm:$0xff] (!%p2991_p2)   ;;  %v3497_v27 = vld [vmem:[%s3832_s18 + $0xd8] sm:$0xff] (!%p2991_p2)  }
  0x14   :  { %118 = vst [vmem:[#allocation2 + $0x130] sm:$0xff] %v3700_v0  ;;  %119 = vst [vmem:[#allocation2 + $0x138] sm:$0xff] %v3700_v0  ;;  %1245 = vmatpush1.bf16.msra.mxu0 (!%p2991_p2), %v3480_v8  ;;  %v3498_v28 = vld [vmem:[%s3832_s18 + $0x60] sm:$0xff] (!%p2991_p2)   ;;  %v3500_v30 = vld [vmem:[%s3832_s18 + $0x68] sm:$0xff] (!%p2991_p2)  }
  0x15   :  { %120 = vst [vmem:[#allocation2 + $0x140] sm:$0xff] %v3700_v0  ;;  %121 = vst [vmem:[#allocation2 + $0x148] sm:$0xff] %v3700_v0  ;;  %1534 = vmatpush1.bf16.msra.mxu1 (!%p2991_p2), %v3481_v9  ;;  %1246 = vmatprep.subr.bf16.mxu0 (!%p2991_p2), %v3701_v2  ;;  %v3499_v29 = vld [vmem:[%s3832_s18 + $0xe0] sm:$0xff] (!%p2991_p2)   ;;  %v3501_v31 = vld [vmem:[%s3832_s18 + $0xe8] sm:$0xff] (!%p2991_p2)  }
  0x16   :  { %122 = vst [vmem:[#allocation2 + $0x150] sm:$0xff] %v3700_v0  ;;  %123 = vst [vmem:[#allocation2 + $0x158] sm:$0xff] %v3700_v0  ;;  %1535 = vmatprep.subr.bf16.mxu1 (!%p2991_p2), %v3701_v2  ;;  %v3502_v32 = vld [vmem:[%s3832_s18 + $0x70] sm:$0xff] (!%p2991_p2)   ;;  %v3504_v34 = vld [vmem:[%s3832_s18 + $0x78] sm:$0xff] (!%p2991_p2)  }
  0x17   :  { %124 = vst [vmem:[#allocation2 + $0x160] sm:$0xff] %v3700_v0  ;;  %125 = vst [vmem:[#allocation2 + $0x168] sm:$0xff] %v3700_v0  ;;  %v3503_v33 = vld [vmem:[%s3832_s18 + $0xf0] sm:$0xff] (!%p2991_p2)   ;;  %v3505_v35 = vld [vmem:[%s3832_s18 + $0xf8] sm:$0xff] (!%p2991_p2)  }
  0x18   :  { %126 = vst [vmem:[#allocation2 + $0x170] sm:$0xff] %v3700_v0  ;;  %127 = vst [vmem:[#allocation2 + $0x178] sm:$0xff] %v3700_v0  ;;  %1247 = vmatpush1.bf16.msra.mxu0 (!%p2991_p2), %v3482_v10  ;;  %v3506_v36 = vld [vmem:[%s3827_s14] ss:$16 sps:$4 sm:$0xff] (!%p2991_p2)   ;;  %v3509_v37 = vld [vmem:[%s3827_s14 + $0x8] ss:$16 sps:$4 sm:$0xff] (!%p2991_p2)  }
  0x19   :  { %128 = vst [vmem:[#allocation2 + $0x180] sm:$0xff] %v3700_v0  ;;  %129 = vst [vmem:[#allocation2 + $0x188] sm:$0xff] %v3700_v0  ;;  %1536 = vmatpush1.bf16.msra.mxu1 (!%p2991_p2), %v3483_v11  ;;  %1248 = vmatprep.subr.bf16.mxu0 (!%p2991_p2), %v3701_v2  ;;  %v3512_v38 = vld [vmem:[%s3827_s14 + $0x24] ss:$16 sps:$4 sm:$0xff] (!%p2991_p2)   ;;  %v3514_v39 = vld [vmem:[%s3827_s14 + $0x2c] ss:$16 sps:$4 sm:$0xff] (!%p2991_p2)  }
  0x1a   :  { %130 = vst [vmem:[#allocation2 + $0x190] sm:$0xff] %v3700_v0  ;;  %131 = vst [vmem:[#allocation2 + $0x198] sm:$0xff] %v3700_v0  ;;  %149 = sbr.rel (%p2991_p2) target bundleno = 539 (0x21b), region = 25  ;;  %1537 = vmatprep.subr.bf16.mxu1 (!%p2991_p2), %v3701_v2  ;;  %v3516_v40 = vld [vmem:[%s3827_s14 + $0x20] ss:$16 sps:$4 sm:$0xff] (!%p2991_p2)  }
  0x1b   :  { %132 = vst [vmem:[#allocation2 + $0x1a0] sm:$0xff] %v3700_v0  ;;  %133 = vst [vmem:[#allocation2 + $0x1a8] sm:$0xff] %v3700_v0  ;;  %v3517_v41 = vld [vmem:[%s3827_s14 + $0x28] ss:$16 sps:$4 sm:$0xff] (!%p2991_p2)   ;;  %v3518_v42 = vld [vmem:[%s3827_s14 + $0x44] ss:$16 sps:$4 sm:$0xff] (!%p2991_p2)  }
  0x1c   :  { %134 = vst [vmem:[#allocation2 + $0x1b0] sm:$0xff] %v3700_v0  ;;  %135 = vst [vmem:[#allocation2 + $0x1b8] sm:$0xff] %v3700_v0  ;;  %1249 = vmatpush1.bf16.msra.mxu0 (!%p2991_p2), %v3484_v12  ;;  %v3520_v43 = vld [vmem:[%s3827_s14 + $0x4c] ss:$16 sps:$4 sm:$0xff] (!%p2991_p2)   ;;  %v3522_v44 = vld [vmem:[%s3827_s14 + $0x40] ss:$16 sps:$4 sm:$0xff] (!%p2991_p2)  }
  0x1d   :  { %136 = vst [vmem:[#allocation2 + $0x1c0] sm:$0xff] %v3700_v0  ;;  %137 = vst [vmem:[#allocation2 + $0x1c8] sm:$0xff] %v3700_v0  ;;  %1538 = vmatpush1.bf16.msra.mxu1 (!%p2991_p2), %v3485_v13  ;;  %1250 = vmatprep.subr.bf16.mxu0 (!%p2991_p2), %v3701_v2  ;;  %v3523_v45 = vld [vmem:[%s3827_s14 + $0x48] ss:$16 sps:$4 sm:$0xff] (!%p2991_p2)   ;;  %v3524_v46 = vld [vmem:[%s3827_s14 + $0x64] ss:$16 sps:$4 sm:$0xff] (!%p2991_p2)  }
  0x1e   :  { %138 = vst [vmem:[#allocation2 + $0x1d0] sm:$0xff] %v3700_v0  ;;  %139 = vst [vmem:[#allocation2 + $0x1d8] sm:$0xff] %v3700_v0  ;;  %1539 = vmatprep.subr.bf16.mxu1 (!%p2991_p2), %v3701_v2  ;;  %v3526_v47 = vld [vmem:[%s3827_s14 + $0x6c] ss:$16 sps:$4 sm:$0xff] (!%p2991_p2)   ;;  %v3528_v48 = vld [vmem:[%s3827_s14 + $0x60] ss:$16 sps:$4 sm:$0xff] (!%p2991_p2)  }
  0x1f   :  { %140 = vst [vmem:[#allocation2 + $0x1e0] sm:$0xff] %v3700_v0  ;;  %141 = vst [vmem:[#allocation2 + $0x1e8] sm:$0xff] %v3700_v0  ;;  %v3529_v49 = vld [vmem:[%s3827_s14 + $0x68] ss:$16 sps:$4 sm:$0xff] (!%p2991_p2)   ;;  %v3530_v50 = vld [vmem:[%s3827_s14 + $0x84] ss:$16 sps:$4 sm:$0xff] (!%p2991_p2)  }
  0x20   :  { %142 = vst [vmem:[#allocation2 + $0x1f0] sm:$0xff] %v3700_v0  ;;  %143 = vst [vmem:[#allocation2 + $0x1f8] sm:$0xff] %v3700_v0  ;;  %1251 = vmatpush1.bf16.msra.mxu0 (!%p2991_p2), %v3486_v14  ;;  %v3532_v51 = vld [vmem:[%s3827_s14 + $0x8c] ss:$16 sps:$4 sm:$0xff] (!%p2991_p2)   ;;  %v3534_v52 = vld [vmem:[%s3827_s14 + $0x80] ss:$16 sps:$4 sm:$0xff] (!%p2991_p2)  }
  0x21   :  { %1540 = vmatpush1.bf16.msra.mxu1 %v3487_v15  ;;  %1252 = vmatprep.subr.bf16.mxu0 %v3701_v2  ;;  %v3535_v53 = vld [vmem:[%s3827_s14 + $0x88] ss:$16 sps:$4 sm:$0xff]   ;;  %v3536_v54 = vld [vmem:[%s3827_s14 + $0xa4] ss:$16 sps:$4 sm:$0xff]   ;;  %v3538_v55 = vld [vmem:[%s3827_s14 + $0xac] ss:$16 sps:$4 sm:$0xff]  }
  0x22   :  { %1541 = vmatprep.subr.bf16.mxu1 %v3701_v2  ;;  %v3540_v56 = vld [vmem:[%s3827_s14 + $0xa0] ss:$16 sps:$4 sm:$0xff]   ;;  %v3541_v57 = vld [vmem:[%s3827_s14 + $0xa8] ss:$16 sps:$4 sm:$0xff]   ;;  %v3542_v58 = vld [vmem:[%s3827_s14 + $0xc4] ss:$16 sps:$4 sm:$0xff]  }
  0x23   :  { %v3544_v59 = vld [vmem:[%s3827_s14 + $0xcc] ss:$16 sps:$4 sm:$0xff]   ;;  %v3546_v60 = vld [vmem:[%s3827_s14 + $0xc0] ss:$16 sps:$4 sm:$0xff]   ;;  %v3547_v61 = vld [vmem:[%s3827_s14 + $0xc8] ss:$16 sps:$4 sm:$0xff]  }
  0x24   :  { %1253 = vmatpush1.bf16.msra.mxu0 %v3488_v16  ;;  %v3548_v62 = vld [vmem:[%s3827_s14 + $0xe4] ss:$16 sps:$4 sm:$0xff]   ;;  %v3550_v63 = vld [vmem:[%s3827_s14 + $0xec] ss:$16 sps:$4 sm:$0xff]   ;;  %v3552_v0 = vld [vmem:[%s3827_s14 + $0xe0] ss:$16 sps:$4 sm:$0xff]  }
  0x25   :  { %1542 = vmatpush1.bf16.msra.mxu1 %v3489_v17  ;;  %1254 = vmatprep.subr.bf16.mxu0 %v3701_v2  ;;  %v3553_v1 = vld [vmem:[%s3827_s14 + $0xe8] ss:$16 sps:$4 sm:$0xff]   ;;  %v3556_v3 = vld [vmem:[%s3827_s14 + $0x10c] ss:$16 sps:$4 sm:$0xff]   ;;  %v3558_v4 = vld [vmem:[%s3827_s14 + $0x100] ss:$16 sps:$4 sm:$0xff]  }
  0x26   :  { %1543 = vmatprep.subr.bf16.mxu1 %v3701_v2  ;;  %v3559_v5 = vld [vmem:[%s3827_s14 + $0x108] ss:$16 sps:$4 sm:$0xff]   ;;  %v3560_v6 = vld [vmem:[%s3827_s14 + $0x124] ss:$16 sps:$4 sm:$0xff]   ;;  %v3562_v7 = vld [vmem:[%s3827_s14 + $0x12c] ss:$16 sps:$4 sm:$0xff]  }
  0x27   :  { %v3564_v8 = vld [vmem:[%s3827_s14 + $0x120] ss:$16 sps:$4 sm:$0xff]   ;;  %v3565_v9 = vld [vmem:[%s3827_s14 + $0x128] ss:$16 sps:$4 sm:$0xff]   ;;  %v3566_v10 = vld [vmem:[%s3827_s14 + $0x144] ss:$16 sps:$4 sm:$0xff]  }
  0x28   :  { %1255 = vmatpush1.bf16.msra.mxu0 %v3490_v18  ;;  %v3568_v11 = vld [vmem:[%s3827_s14 + $0x14c] ss:$16 sps:$4 sm:$0xff]   ;;  %v3570_v12 = vld [vmem:[%s3827_s14 + $0x140] ss:$16 sps:$4 sm:$0xff]   ;;  %v3571_v13 = vld [vmem:[%s3827_s14 + $0x148] ss:$16 sps:$4 sm:$0xff]  }
  0x29   :  { %1544 = vmatpush1.bf16.msra.mxu1 %v3491_v19  ;;  %1256 = vmatprep.subr.bf16.mxu0 %v3701_v2  ;;  %v3572_v14 = vld [vmem:[%s3827_s14 + $0x164] ss:$16 sps:$4 sm:$0xff]   ;;  %v3574_v15 = vld [vmem:[%s3827_s14 + $0x16c] ss:$16 sps:$4 sm:$0xff]   ;;  %v3576_v16 = vld [vmem:[%s3827_s14 + $0x160] ss:$16 sps:$4 sm:$0xff]  }
  0x2a   :  { %1545 = vmatprep.subr.bf16.mxu1 %v3701_v2  ;;  %v3577_v17 = vld [vmem:[%s3827_s14 + $0x168] ss:$16 sps:$4 sm:$0xff]   ;;  %v3578_v18 = vld [vmem:[%s3827_s14 + $0x184] ss:$16 sps:$4 sm:$0xff]   ;;  %v3580_v19 = vld [vmem:[%s3827_s14 + $0x18c] ss:$16 sps:$4 sm:$0xff]  }
  0x2b   :  { %v3582_v20 = vld [vmem:[%s3827_s14 + $0x180] ss:$16 sps:$4 sm:$0xff]   ;;  %v3584_v22 = vld [vmem:[%s3827_s14 + $0x1a4] ss:$16 sps:$4 sm:$0xff]  }
  0x2c   :  { %1257 = vmatpush1.bf16.msra.mxu0 %v3492_v21  ;;  %v3583_v21 = vld [vmem:[%s3827_s14 + $0x188] ss:$16 sps:$4 sm:$0xff]  }
  0x2d   :  { %1546 = vmatpush1.bf16.msra.mxu1 %v3493_v23  ;;  %1258 = vmatprep.subr.bf16.mxu0 %v3701_v2  ;;  %v3586_v23 = vld [vmem:[%s3827_s14 + $0x1ac] ss:$16 sps:$4 sm:$0xff]  }
  0x2e   :  { %1547 = vmatprep.subr.bf16.mxu1 %v3701_v2 }
  0x30   :  { %1259 = vmatpush1.bf16.msra.mxu0 %v3494_v24  ;;  %v3588_v24 = vld [vmem:[%s3827_s14 + $0x1a0] ss:$16 sps:$4 sm:$0xff]  }
  0x31   :  { %1548 = vmatpush1.bf16.msra.mxu1 %v3495_v25  ;;  %1260 = vmatprep.subr.bf16.mxu0 %v3701_v2  ;;  %v3589_v25 = vld [vmem:[%s3827_s14 + $0x1a8] ss:$16 sps:$4 sm:$0xff]  }
  0x32   :  { %1549 = vmatprep.subr.bf16.mxu1 %v3701_v2 }
  0x34   :  { %1261 = vmatpush1.bf16.msra.mxu0 %v3496_v26  ;;  %v3590_v26 = vld [vmem:[%s3827_s14 + $0x1c4] ss:$16 sps:$4 sm:$0xff]  }
  0x35   :  { %1550 = vmatpush1.bf16.msra.mxu1 %v3497_v27  ;;  %1262 = vmatprep.subr.bf16.mxu0 %v3701_v2  ;;  %v3592_v27 = vld [vmem:[%s3827_s14 + $0x1cc] ss:$16 sps:$4 sm:$0xff]  }
  0x36   :  { %1551 = vmatprep.subr.bf16.mxu1 %v3701_v2 }
  0x38   :  { %1263 = vmatpush1.bf16.msra.mxu0 %v3498_v28  ;;  %v3594_v28 = vld [vmem:[%s3827_s14 + $0x1c0] ss:$16 sps:$4 sm:$0xff]  }
  0x39   :  { %1552 = vmatpush1.bf16.msra.mxu1 %v3499_v29  ;;  %1264 = vmatprep.subr.bf16.mxu0 %v3701_v2  ;;  %v3595_v29 = vld [vmem:[%s3827_s14 + $0x1c8] ss:$16 sps:$4 sm:$0xff]  }
  0x3a   :  { %1553 = vmatprep.subr.bf16.mxu1 %v3701_v2 }
  0x3c   :  { %1265 = vmatpush1.bf16.msra.mxu0 %v3500_v30  ;;  %v3596_v30 = vld [vmem:[%s3827_s14 + $0x1e4] ss:$16 sps:$4 sm:$0xff]  }
  0x3d   :  { %1554 = vmatpush1.bf16.msra.mxu1 %v3501_v31  ;;  %1266 = vmatprep.subr.bf16.mxu0 %v3701_v2  ;;  %v3598_v31 = vld [vmem:[%s3827_s14 + $0x1ec] ss:$16 sps:$4 sm:$0xff]  }
  0x3e   :  { %1555 = vmatprep.subr.bf16.mxu1 %v3701_v2 }
  0x40   :  { %1267 = vmatpush1.bf16.msra.mxu0 %v3502_v32  ;;  %v3600_v32 = vld [vmem:[%s3827_s14 + $0x1e0] ss:$16 sps:$4 sm:$0xff]  }
  0x41   :  { %1556 = vmatpush1.bf16.msra.mxu1 %v3503_v33  ;;  %1268 = vmatprep.subr.bf16.mxu0 %v3701_v2  ;;  %v3601_v33 = vld [vmem:[%s3827_s14 + $0x1e8] ss:$16 sps:$4 sm:$0xff]  }
  0x42   :  { %1557 = vmatprep.subr.bf16.mxu1 %v3701_v2  ;;  %v3554_v2 = vld [vmem:[%s3827_s14 + $0x104] ss:$16 sps:$4 sm:$0xff]  }
  0x44   :  { %1269 = vmatpush1.bf16.msra.mxu0 %v3504_v34  ;;  %v3602_v34 = vld [vmem:[%s3827_s14 + $0x204] ss:$16 sps:$4 sm:$0xff]  }
  0x45   :  { %1558 = vmatpush1.bf16.msra.mxu1 %v3505_v35  ;;  %v3604_v35 = vld [vmem:[%s3827_s14 + $0x20c] ss:$16 sps:$4 sm:$0xff]  }
  0x47   :  { %1271 = vmatmul.mubr.bf16.vlgmr.msra.gmra.mrb[0].mxu0 %v3506_v36  ;;  %v3606_v36 = vld [vmem:[%s3827_s14 + $0x200] ss:$16 sps:$4 sm:$0xff]  }
  0x48   :  { %1560 = vmatmul.mubr.bf16.vlgmr.msra.gmra.mrb[0].mxu1 %v3509_v37  ;;  %1278 = vmatprep.mubr.bf16.mxu0 %v3512_v38  ;;  %v3607_v37 = vld [vmem:[%s3827_s14 + $0x208] ss:$16 sps:$4 sm:$0xff]   ;;  %v3608_v38 = vld [vmem:[%s3827_s14 + $0x224] ss:$16 sps:$4 sm:$0xff]  }
  0x49   :  { %1567 = vmatprep.mubr.bf16.mxu1 %v3514_v39  ;;  %v3610_v39 = vld [vmem:[%s3827_s14 + $0x22c] ss:$16 sps:$4 sm:$0xff]  }
  0x4f   :  { %1279 = vmatmul.mubr.bf16.gmra.mrb[4].mxu0 %v3516_v40  ;;  %v3612_v40 = vld [vmem:[%s3827_s14 + $0x220] ss:$16 sps:$4 sm:$0xff]  }
  0x50   :  { %1568 = vmatmul.mubr.bf16.gmra.mrb[4].mxu1 %v3517_v41  ;;  %1286 = vmatprep.mubr.bf16.mxu0 %v3518_v42  ;;  %v3613_v41 = vld [vmem:[%s3827_s14 + $0x228] ss:$16 sps:$4 sm:$0xff]   ;;  %v3614_v42 = vld [vmem:[%s3827_s14 + $0x244] ss:$16 sps:$4 sm:$0xff]  }
  0x51   :  { %1575 = vmatprep.mubr.bf16.mxu1 %v3520_v43  ;;  %v3616_v43 = vld [vmem:[%s3827_s14 + $0x24c] ss:$16 sps:$4 sm:$0xff]  }
  0x57   :  { %1287 = vmatmul.mubr.bf16.gmra.mrb[8].mxu0 %v3522_v44  ;;  %v3618_v44 = vld [vmem:[%s3827_s14 + $0x240] ss:$16 sps:$4 sm:$0xff]  }
  0x58   :  { %1576 = vmatmul.mubr.bf16.gmra.mrb[8].mxu1 %v3523_v45  ;;  %1294 = vmatprep.mubr.bf16.mxu0 %v3524_v46  ;;  %v3619_v45 = vld [vmem:[%s3827_s14 + $0x248] ss:$16 sps:$4 sm:$0xff]   ;;  %v3620_v46 = vld [vmem:[%s3827_s14 + $0x264] ss:$16 sps:$4 sm:$0xff]  }
  0x59   :  { %1583 = vmatprep.mubr.bf16.mxu1 %v3526_v47  ;;  %v3622_v47 = vld [vmem:[%s3827_s14 + $0x26c] ss:$16 sps:$4 sm:$0xff]  }
  0x5f   :  { %1295 = vmatmul.mubr.bf16.gmra.mrb[12].mxu0 %v3528_v48  ;;  %v3624_v48 = vld [vmem:[%s3827_s14 + $0x260] ss:$16 sps:$4 sm:$0xff]  }
  0x60   :  { %1584 = vmatmul.mubr.bf16.gmra.mrb[12].mxu1 %v3529_v49  ;;  %1302 = vmatprep.mubr.bf16.mxu0 %v3530_v50  ;;  %v3625_v49 = vld [vmem:[%s3827_s14 + $0x268] ss:$16 sps:$4 sm:$0xff]   ;;  %v3626_v50 = vld [vmem:[%s3827_s14 + $0x284] ss:$16 sps:$4 sm:$0xff]  }
  0x61   :  { %1591 = vmatprep.mubr.bf16.mxu1 %v3532_v51  ;;  %v3628_v51 = vld [vmem:[%s3827_s14 + $0x28c] ss:$16 sps:$4 sm:$0xff]  }
  0x67   :  { %1303 = vmatmul.mubr.bf16.gmra.mrb[16].mxu0 %v3534_v52  ;;  %v3630_v52 = vld [vmem:[%s3827_s14 + $0x280] ss:$16 sps:$4 sm:$0xff]  }
  0x68   :  { %1592 = vmatmul.mubr.bf16.gmra.mrb[16].mxu1 %v3535_v53  ;;  %1310 = vmatprep.mubr.bf16.mxu0 %v3536_v54  ;;  %v3631_v53 = vld [vmem:[%s3827_s14 + $0x288] ss:$16 sps:$4 sm:$0xff]   ;;  %v3632_v54 = vld [vmem:[%s3827_s14 + $0x2a4] ss:$16 sps:$4 sm:$0xff]  }
  0x69   :  { %1599 = vmatprep.mubr.bf16.mxu1 %v3538_v55  ;;  %v3634_v55 = vld [vmem:[%s3827_s14 + $0x2ac] ss:$16 sps:$4 sm:$0xff]  }
  0x6f   :  { %1311 = vmatmul.mubr.bf16.gmra.mrb[20].mxu0 %v3540_v56  ;;  %v3636_v56 = vld [vmem:[%s3827_s14 + $0x2a0] ss:$16 sps:$4 sm:$0xff]  }
  0x70   :  { %1600 = vmatmul.mubr.bf16.gmra.mrb[20].mxu1 %v3541_v57  ;;  %1318 = vmatprep.mubr.bf16.mxu0 %v3542_v58  ;;  %v3637_v57 = vld [vmem:[%s3827_s14 + $0x2a8] ss:$16 sps:$4 sm:$0xff]   ;;  %v3638_v58 = vld [vmem:[%s3827_s14 + $0x2c4] ss:$16 sps:$4 sm:$0xff]  }
  0x71   :  { %1607 = vmatprep.mubr.bf16.mxu1 %v3544_v59  ;;  %v3640_v59 = vld [vmem:[%s3827_s14 + $0x2cc] ss:$16 sps:$4 sm:$0xff]  }
  0x77   :  { %1319 = vmatmul.mubr.bf16.gmra.mrb[24].mxu0 %v3546_v60  ;;  %v3642_v60 = vld [vmem:[%s3827_s14 + $0x2c0] ss:$16 sps:$4 sm:$0xff]  }
  0x78   :  { %1608 = vmatmul.mubr.bf16.gmra.mrb[24].mxu1 %v3547_v61  ;;  %1326 = vmatprep.mubr.bf16.mxu0 %v3548_v62  ;;  %v3643_v61 = vld [vmem:[%s3827_s14 + $0x2c8] ss:$16 sps:$4 sm:$0xff]   ;;  %v3644_v62 = vld [vmem:[%s3827_s14 + $0x2e4] ss:$16 sps:$4 sm:$0xff]  }
  0x79   :  { %1615 = vmatprep.mubr.bf16.mxu1 %v3550_v63  ;;  %v3646_v63 = vld [vmem:[%s3827_s14 + $0x2ec] ss:$16 sps:$4 sm:$0xff]  }
  0x7f   :  { %1327 = vmatmul.mubr.bf16.gmra.mrb[28].mxu0 %v3552_v0  ;;  %v3648_v0 = vld [vmem:[%s3827_s14 + $0x2e0] ss:$16 sps:$4 sm:$0xff]  }
  0x80   :  { %1616 = vmatmul.mubr.bf16.gmra.mrb[28].mxu1 %v3553_v1  ;;  %1334 = vmatprep.mubr.bf16.mxu0 %v3554_v2  ;;  %v3649_v1 = vld [vmem:[%s3827_s14 + $0x2e8] ss:$16 sps:$4 sm:$0xff]   ;;  %v3650_v2 = vld [vmem:[%s3827_s14 + $0x304] ss:$16 sps:$4 sm:$0xff]  }
  0x81   :  { %1623 = vmatprep.mubr.bf16.mxu1 %v3556_v3  ;;  %v3652_v3 = vld [vmem:[%s3827_s14 + $0x30c] ss:$16 sps:$4 sm:$0xff]  }
  0x87   :  { %1335 = vmatmul.mubr.bf16.gmra.mrb[32].mxu0 %v3558_v4  ;;  %v3654_v4 = vld [vmem:[%s3827_s14 + $0x300] ss:$16 sps:$4 sm:$0xff]  }
  0x88   :  { %1624 = vmatmul.mubr.bf16.gmra.mrb[32].mxu1 %v3559_v5  ;;  %1342 = vmatprep.mubr.bf16.mxu0 %v3560_v6  ;;  %v3655_v5 = vld [vmem:[%s3827_s14 + $0x308] ss:$16 sps:$4 sm:$0xff]   ;;  %v3656_v6 = vld [vmem:[%s3827_s14 + $0x324] ss:$16 sps:$4 sm:$0xff]  }
  0x89   :  { %1631 = vmatprep.mubr.bf16.mxu1 %v3562_v7  ;;  %v3658_v7 = vld [vmem:[%s3827_s14 + $0x32c] ss:$16 sps:$4 sm:$0xff]  }
  0x8f   :  { %1343 = vmatmul.mubr.bf16.gmra.mrb[36].mxu0 %v3564_v8  ;;  %v3660_v8 = vld [vmem:[%s3827_s14 + $0x320] ss:$16 sps:$4 sm:$0xff]  }
  0x90   :  { %1632 = vmatmul.mubr.bf16.gmra.mrb[36].mxu1 %v3565_v9  ;;  %1350 = vmatprep.mubr.bf16.mxu0 %v3566_v10  ;;  %v3661_v9 = vld [vmem:[%s3827_s14 + $0x328] ss:$16 sps:$4 sm:$0xff]   ;;  %v3662_v10 = vld [vmem:[%s3827_s14 + $0x344] ss:$16 sps:$4 sm:$0xff]  }
  0x91   :  { %1639 = vmatprep.mubr.bf16.mxu1 %v3568_v11  ;;  %v3664_v11 = vld [vmem:[%s3827_s14 + $0x34c] ss:$16 sps:$4 sm:$0xff]  }
  0x97   :  { %1351 = vmatmul.mubr.bf16.gmra.mrb[40].mxu0 %v3570_v12  ;;  %v3666_v12 = vld [vmem:[%s3827_s14 + $0x340] ss:$16 sps:$4 sm:$0xff]  }
  0x98   :  { %1640 = vmatmul.mubr.bf16.gmra.mrb[40].mxu1 %v3571_v13  ;;  %1358 = vmatprep.mubr.bf16.mxu0 %v3572_v14  ;;  %v3667_v13 = vld [vmem:[%s3827_s14 + $0x348] ss:$16 sps:$4 sm:$0xff]   ;;  %v3668_v14 = vld [vmem:[%s3827_s14 + $0x364] ss:$16 sps:$4 sm:$0xff]  }
  0x99   :  { %1647 = vmatprep.mubr.bf16.mxu1 %v3574_v15  ;;  %v3670_v15 = vld [vmem:[%s3827_s14 + $0x36c] ss:$16 sps:$4 sm:$0xff]  }
  0x9f   :  { %1359 = vmatmul.mubr.bf16.gmra.mrb[44].mxu0 %v3576_v16 }
  0xa0   :  { %1648 = vmatmul.mubr.bf16.gmra.mrb[44].mxu1 %v3577_v17  ;;  %1366 = vmatprep.mubr.bf16.mxu0 %v3578_v18  ;;  %v150_v17 = vld [vmem:[#allocation2] sm:$0xff] }
  0xa1   :  { %1655 = vmatprep.mubr.bf16.mxu1 %v3580_v19 }
  0xa7   :  { %1367 = vmatmul.mubr.bf16.gmra.mrb[48].mxu0 %v3582_v20  ;;  %v3672_v20 = vld [vmem:[%s3827_s14 + $0x360] ss:$16 sps:$4 sm:$0xff]  }
  0xa8   :  { %1656 = vmatmul.mubr.bf16.gmra.mrb[48].mxu1 %v3583_v21  ;;  %1374 = vmatprep.mubr.bf16.mxu0 %v3584_v22 }
  0xa9   :  { %1663 = vmatprep.mubr.bf16.mxu1 %v3586_v23 }
  0xaf   :  { %1375 = vmatmul.mubr.bf16.gmra.mrb[52].mxu0 %v3588_v24  ;;  %v3673_v24 = vld [vmem:[%s3827_s14 + $0x368] ss:$16 sps:$4 sm:$0xff]  }
  0xb0   :  { %1664 = vmatmul.mubr.bf16.gmra.mrb[52].mxu1 %v3589_v25  ;;  %1382 = vmatprep.mubr.bf16.mxu0 %v3590_v26  ;;  %v3674_v25 = vld [vmem:[%s3827_s14 + $0x384] ss:$16 sps:$4 sm:$0xff]   ;;  %v151_v26 = vld [vmem:[#allocation2 + $0x8] sm:$0xff] }
  0xb1   :  { %1671 = vmatprep.mubr.bf16.mxu1 %v3592_v27 }
  0xb7   :  { %1383 = vmatmul.mubr.bf16.gmra.mrb[56].mxu0 %v3594_v28 }
  0xb8   :  { %1672 = vmatmul.mubr.bf16.gmra.mrb[56].mxu1 %v3595_v29  ;;  %1390 = vmatprep.mubr.bf16.mxu0 %v3596_v30  ;;  %v3676_v29 = vld [vmem:[%s3827_s14 + $0x38c] ss:$16 sps:$4 sm:$0xff]  }
  0xb9   :  { %1679 = vmatprep.mubr.bf16.mxu1 %v3598_v31 }
  0xbf   :  { %1391 = vmatmul.mubr.bf16.gmra.mrb[60].mxu0 %v3600_v32 }
  0xc0   :  { %1680 = vmatmul.mubr.bf16.gmra.mrb[60].mxu1 %v3601_v33  ;;  %1398 = vmatprep.mubr.bf16.mxu0 %v3602_v34 }
  0xc1   :  { %1687 = vmatprep.mubr.bf16.mxu1 %v3604_v35  ;;  %v152_v35 = vld [vmem:[#allocation2 + $0x10] sm:$0xff] }
  0xc7   :  { %1399 = vmatmul.mubr.bf16.gmra.mrb[64].mxu0 %v3606_v36 }
  0xc8   :  { %1688 = vmatmul.mubr.bf16.gmra.mrb[64].mxu1 %v3607_v37  ;;  %1406 = vmatprep.mubr.bf16.mxu0 %v3608_v38  ;;  %v3678_v38 = vld [vmem:[%s3827_s14 + $0x380] ss:$16 sps:$4 sm:$0xff]  }
  0xc9   :  { %1695 = vmatprep.mubr.bf16.mxu1 %v3610_v39 }
  0xcf   :  { %1407 = vmatmul.mubr.bf16.gmra.mrb[68].mxu0 %v3612_v40 }
  0xd0   :  { %1696 = vmatmul.mubr.bf16.gmra.mrb[68].mxu1 %v3613_v41  ;;  %1414 = vmatprep.mubr.bf16.mxu0 %v3614_v42  ;;  %v3679_v42 = vld [vmem:[%s3827_s14 + $0x388] ss:$16 sps:$4 sm:$0xff]  }
  0xd1   :  { %1703 = vmatprep.mubr.bf16.mxu1 %v3616_v43  ;;  %v3680_v43 = vld [vmem:[%s3827_s14 + $0x3a4] ss:$16 sps:$4 sm:$0xff]  }
  0xd7   :  { %1415 = vmatmul.mubr.bf16.gmra.mrb[72].mxu0 %v3618_v44  ;;  %v153_v44 = vld [vmem:[#allocation2 + $0x18] sm:$0xff] }
  0xd8   :  { %1704 = vmatmul.mubr.bf16.gmra.mrb[72].mxu1 %v3619_v45  ;;  %1422 = vmatprep.mubr.bf16.mxu0 %v3620_v46 }
  0xd9   :  { %1711 = vmatprep.mubr.bf16.mxu1 %v3622_v47  ;;  %v3682_v47 = vld [vmem:[%s3827_s14 + $0x3ac] ss:$16 sps:$4 sm:$0xff]  }
  0xdf   :  { %1423 = vmatmul.mubr.bf16.gmra.mrb[76].mxu0 %v3624_v48 }
  0xe0   :  { %1712 = vmatmul.mubr.bf16.gmra.mrb[76].mxu1 %v3625_v49  ;;  %1430 = vmatprep.mubr.bf16.mxu0 %v3626_v50 }
  0xe1   :  { %1719 = vmatprep.mubr.bf16.mxu1 %v3628_v51 }
  0xe7   :  { %1431 = vmatmul.mubr.bf16.gmra.mrb[80].mxu0 %v3630_v52 }
  0xe8   :  { %1720 = vmatmul.mubr.bf16.gmra.mrb[80].mxu1 %v3631_v53  ;;  %1438 = vmatprep.mubr.bf16.mxu0 %v3632_v54  ;;  %v154_v53 = vld [vmem:[#allocation2 + $0x20] sm:$0xff] }
  0xe9   :  { %1727 = vmatprep.mubr.bf16.mxu1 %v3634_v55 }
  0xef   :  { %1439 = vmatmul.mubr.bf16.gmra.mrb[84].mxu0 %v3636_v56  ;;  %v3684_v56 = vld [vmem:[%s3827_s14 + $0x3a0] ss:$16 sps:$4 sm:$0xff]  }
  0xf0   :  { %1728 = vmatmul.mubr.bf16.gmra.mrb[84].mxu1 %v3637_v57  ;;  %1446 = vmatprep.mubr.bf16.mxu0 %v3638_v58 }
  0xf1   :  { %1735 = vmatprep.mubr.bf16.mxu1 %v3640_v59 }
  0xf7   :  { %1447 = vmatmul.mubr.bf16.gmra.mrb[88].mxu0 %v3642_v60  ;;  %v3685_v60 = vld [vmem:[%s3827_s14 + $0x3a8] ss:$16 sps:$4 sm:$0xff]  }
  0xf8   :  { %1736 = vmatmul.mubr.bf16.gmra.mrb[88].mxu1 %v3643_v61  ;;  %1454 = vmatprep.mubr.bf16.mxu0 %v3644_v62  ;;  %v3686_v61 = vld [vmem:[%s3827_s14 + $0x3c4] ss:$16 sps:$4 sm:$0xff]   ;;  %v155_v62 = vld [vmem:[#allocation2 + $0x28] sm:$0xff] }
  0xf9   :  { %1743 = vmatprep.mubr.bf16.mxu1 %v3646_v63 }
  0xff   :  { %1455 = vmatmul.mubr.bf16.gmra.mrb[92].mxu0 %v3648_v0 }
 0x100   :  { %1744 = vmatmul.mubr.bf16.gmra.mrb[92].mxu1 %v3649_v1  ;;  %1462 = vmatprep.mubr.bf16.mxu0 %v3650_v2  ;;  %v3688_v1 = vld [vmem:[%s3827_s14 + $0x3cc] ss:$16 sps:$4 sm:$0xff]  }
 0x101   :  { %1751 = vmatprep.mubr.bf16.mxu1 %v3652_v3 }
 0x107   :  { %1463 = vmatmul.mubr.bf16.gmra.mrb[96].mxu0 %v3654_v4 }
 0x108   :  { %1752 = vmatmul.mubr.bf16.gmra.mrb[96].mxu1 %v3655_v5  ;;  %1470 = vmatprep.mubr.bf16.mxu0 %v3656_v6 }
 0x109   :  { %1759 = vmatprep.mubr.bf16.mxu1 %v3658_v7  ;;  %v156_v7 = vld [vmem:[#allocation2 + $0x30] sm:$0xff] }
 0x10f   :  { %1471 = vmatmul.mubr.bf16.gmra.mrb[100].mxu0 %v3660_v8 }
 0x110   :  { %1760 = vmatmul.mubr.bf16.gmra.mrb[100].mxu1 %v3661_v9  ;;  %1478 = vmatprep.mubr.bf16.mxu0 %v3662_v10  ;;  %v3690_v10 = vld [vmem:[%s3827_s14 + $0x3c0] ss:$16 sps:$4 sm:$0xff]  }
 0x111   :  { %1767 = vmatprep.mubr.bf16.mxu1 %v3664_v11 }
 0x117   :  { %1479 = vmatmul.mubr.bf16.gmra.mrb[104].mxu0 %v3666_v12 }
 0x118   :  { %1768 = vmatmul.mubr.bf16.gmra.mrb[104].mxu1 %v3667_v13  ;;  %1486 = vmatprep.mubr.bf16.mxu0 %v3668_v14  ;;  %v3691_v14 = vld [vmem:[%s3827_s14 + $0x3c8] ss:$16 sps:$4 sm:$0xff]  }
 0x119   :  { %1775 = vmatprep.mubr.bf16.mxu1 %v3670_v15  ;;  %v3692_v15 = vld [vmem:[%s3827_s14 + $0x3e4] ss:$16 sps:$4 sm:$0xff]  }
 0x11a   :  { %v1272_v16 = vpop.f32.mrb[0].mxu0 }
 0x11b   :  { %v1561_v18 = vpop.f32.mrb[0].mxu1  ;;  %v1274_v19 = vpop.f32.mrb[1].mxu0 }
 0x11c   :  { %v1562_v21 = vadd.f32 %v1561_v18, %v1272_v16  ;;  %v1563_v22 = vpop.f32.mrb[1].mxu1  ;;  %v1275_v23 = vpop.f32.mrb[2].mxu0  ;;  %v157_v16 = vld [vmem:[#allocation2 + $0x38] sm:$0xff] }
 0x11d   :  { %v1564_v27 = vpop.f32.mrb[2].mxu1  ;;  %v1277_v28 = vpop.f32.mrb[3].mxu0  ;;  %v3694_v19 = vld [vmem:[%s3827_s14 + $0x3ec] ss:$16 sps:$4 sm:$0xff]  }
 0x11e   :  { %v1816_v30 = vadd.f32 %v1562_v21, %v150_v17  ;;  %v1565_v31 = vadd.f32 %v1564_v27, %v1275_v23  ;;  %v1566_v32 = vpop.f32.mrb[3].mxu1  ;;  %v3696_v28 = vld [vmem:[%s3827_s14 + $0x3e0] ss:$16 sps:$4 sm:$0xff]  }
 0x11f   :  { %1487 = vmatmul.mubr.bf16.gmra.mrb[108].mxu0 %v3672_v20  ;;  %v3697_v32 = vld [vmem:[%s3827_s14 + $0x3e8] ss:$16 sps:$4 sm:$0xff]  }
 0x120   :  { %1880 = vst [vmem:[#allocation2] sm:$0xff] %v1816_v30  ;;  %v1817_v33 = vadd.f32 %v1565_v31, %v151_v26  ;;  %1776 = vmatmul.mubr.bf16.gmra.mrb[108].mxu1 %v3673_v24  ;;  %1494 = vmatprep.mubr.bf16.mxu0 %v3674_v25  ;;  %v158_v25 = vld [vmem:[#allocation2 + $0x40] sm:$0xff] }
 0x121   :  { %1783 = vmatprep.mubr.bf16.mxu1 %v3676_v29 }
 0x122   :  { %1881 = vst [vmem:[#allocation2 + $0x8] sm:$0xff] %v1817_v33  ;;  %v1280_v34 = vpop.f32.mrb[4].mxu0  ;;  %v159_v33 = vld [vmem:[#allocation2 + $0x48] sm:$0xff] }
 0x123   :  { %v1569_v36 = vpop.f32.mrb[4].mxu1  ;;  %v1282_v37 = vpop.f32.mrb[5].mxu0 }
 0x124   :  { %v1570_v39 = vadd.f32 %v1569_v36, %v1280_v34  ;;  %v1571_v40 = vpop.f32.mrb[5].mxu1  ;;  %v1283_v41 = vpop.f32.mrb[6].mxu0 }
 0x125   :  { %v1572_v45 = vpop.f32.mrb[6].mxu1  ;;  %v1285_v46 = vpop.f32.mrb[7].mxu0 }
 0x126   :  { %v1818_v48 = vadd.f32 %v1570_v39, %v152_v35  ;;  %v1573_v49 = vadd.f32 %v1572_v45, %v1283_v41  ;;  %v1574_v50 = vpop.f32.mrb[7].mxu1  ;;  %v160_v41 = vld [vmem:[#allocation2 + $0x50] sm:$0xff] }
 0x127   :  { %1495 = vmatmul.mubr.bf16.gmra.mrb[112].mxu0 %v3678_v38 }
 0x128   :  { %1882 = vst [vmem:[#allocation2 + $0x10] sm:$0xff] %v1818_v48  ;;  %v1819_v51 = vadd.f32 %v1573_v49, %v153_v44  ;;  %1784 = vmatmul.mubr.bf16.gmra.mrb[112].mxu1 %v3679_v42  ;;  %1502 = vmatprep.mubr.bf16.mxu0 %v3680_v43 }
 0x129   :  { %1791 = vmatprep.mubr.bf16.mxu1 %v3682_v47  ;;  %v161_v47 = vld [vmem:[#allocation2 + $0x58] sm:$0xff] }
 0x12a   :  { %1883 = vst [vmem:[#allocation2 + $0x18] sm:$0xff] %v1819_v51  ;;  %v1288_v52 = vpop.f32.mrb[8].mxu0 }
 0x12b   :  { %v1577_v54 = vpop.f32.mrb[8].mxu1  ;;  %v1290_v55 = vpop.f32.mrb[9].mxu0 }
 0x12c   :  { %v1578_v57 = vadd.f32 %v1577_v54, %v1288_v52  ;;  %v1579_v58 = vpop.f32.mrb[9].mxu1  ;;  %v1291_v59 = vpop.f32.mrb[10].mxu0  ;;  %v162_v55 = vld [vmem:[#allocation2 + $0x60] sm:$0xff] }
 0x12d   :  { %v1580_v63 = vpop.f32.mrb[10].mxu1  ;;  %v1293_v0 = vpop.f32.mrb[11].mxu0 }
 0x12e   :  { %v1820_v2 = vadd.f32 %v1578_v57, %v154_v53  ;;  %v1581_v3 = vadd.f32 %v1580_v63, %v1291_v59  ;;  %v1582_v4 = vpop.f32.mrb[11].mxu1 }
 0x12f   :  { %1503 = vmatmul.mubr.bf16.gmra.mrb[116].mxu0 %v3684_v56 }
 0x130   :  { %1884 = vst [vmem:[#allocation2 + $0x20] sm:$0xff] %v1820_v2  ;;  %v1821_v5 = vadd.f32 %v1581_v3, %v155_v62  ;;  %1792 = vmatmul.mubr.bf16.gmra.mrb[116].mxu1 %v3685_v60  ;;  %1510 = vmatprep.mubr.bf16.mxu0 %v3686_v61  ;;  %v163_v61 = vld [vmem:[#allocation2 + $0x68] sm:$0xff] }
 0x131   :  { %1799 = vmatprep.mubr.bf16.mxu1 %v3688_v1 }
 0x132   :  { %1885 = vst [vmem:[#allocation2 + $0x28] sm:$0xff] %v1821_v5  ;;  %v1296_v6 = vpop.f32.mrb[12].mxu0  ;;  %v164_v5 = vld [vmem:[#allocation2 + $0x70] sm:$0xff] }
 0x133   :  { %v1585_v8 = vpop.f32.mrb[12].mxu1  ;;  %v1298_v9 = vpop.f32.mrb[13].mxu0 }
 0x134   :  { %v1586_v11 = vadd.f32 %v1585_v8, %v1296_v6  ;;  %v1587_v12 = vpop.f32.mrb[13].mxu1  ;;  %v1299_v13 = vpop.f32.mrb[14].mxu0 }
 0x135   :  { %v1588_v17 = vpop.f32.mrb[14].mxu1  ;;  %v1301_v18 = vpop.f32.mrb[15].mxu0 }
 0x136   :  { %v1822_v20 = vadd.f32 %v1586_v11, %v156_v7  ;;  %v1589_v21 = vadd.f32 %v1588_v17, %v1299_v13  ;;  %v1590_v22 = vpop.f32.mrb[15].mxu1  ;;  %v165_v11 = vld [vmem:[#allocation2 + $0x78] sm:$0xff] }
 0x137   :  { %1511 = vmatmul.mubr.bf16.gmra.mrb[120].mxu0 %v3690_v10 }
 0x138   :  { %1886 = vst [vmem:[#allocation2 + $0x30] sm:$0xff] %v1822_v20  ;;  %v1823_v23 = vadd.f32 %v1589_v21, %v157_v16  ;;  %1800 = vmatmul.mubr.bf16.gmra.mrb[120].mxu1 %v3691_v14  ;;  %1518 = vmatprep.mubr.bf16.mxu0 %v3692_v15 }
 0x139   :  { %1807 = vmatprep.mubr.bf16.mxu1 %v3694_v19  ;;  %v166_v19 = vld [vmem:[#allocation2 + $0x80] sm:$0xff] }
 0x13a   :  { %1887 = vst [vmem:[#allocation2 + $0x38] sm:$0xff] %v1823_v23  ;;  %v1304_v24 = vpop.f32.mrb[16].mxu0 }
 0x13b   :  { %v1593_v26 = vpop.f32.mrb[16].mxu1  ;;  %v1306_v27 = vpop.f32.mrb[17].mxu0 }
 0x13c   :  { %v1594_v29 = vadd.f32 %v1593_v26, %v1304_v24  ;;  %v1595_v30 = vpop.f32.mrb[17].mxu1  ;;  %v1307_v31 = vpop.f32.mrb[18].mxu0 }
 0x13d   :  { %v1596_v34 = vpop.f32.mrb[18].mxu1  ;;  %v1309_v35 = vpop.f32.mrb[19].mxu0 }
 0x13e   :  { %v1824_v36 = vadd.f32 %v1594_v29, %v158_v25  ;;  %v1597_v37 = vadd.f32 %v1596_v34, %v1307_v31  ;;  %v1598_v38 = vpop.f32.mrb[19].mxu1  ;;  %v167_v25 = vld [vmem:[#allocation2 + $0x88] sm:$0xff] }
 0x13f   :  { %1519 = vmatmul.mubr.bf16.gmra.mrb[124].mxu0 %v3696_v28 }
 0x140   :  { %1888 = vst [vmem:[#allocation2 + $0x40] sm:$0xff] %v1824_v36  ;;  %v1825_v39 = vadd.f32 %v1597_v37, %v159_v33  ;;  %1808 = vmatmul.mubr.bf16.gmra.mrb[124].mxu1 %v3697_v32  ;;  %v168_v33 = vld [vmem:[#allocation2 + $0x90] sm:$0xff] }
 0x142   :  { %1889 = vst [vmem:[#allocation2 + $0x48] sm:$0xff] %v1825_v39  ;;  %v1312_v40 = vpop.f32.mrb[20].mxu0  ;;  %v169_v39 = vld [vmem:[#allocation2 + $0x98] sm:$0xff] }
 0x143   :  { %v1601_v42 = vpop.f32.mrb[20].mxu1  ;;  %v1314_v43 = vpop.f32.mrb[21].mxu0 }
 0x144   :  { %v1602_v44 = vadd.f32 %v1601_v42, %v1312_v40  ;;  %v1603_v45 = vpop.f32.mrb[21].mxu1  ;;  %v1315_v46 = vpop.f32.mrb[22].mxu0 }
 0x145   :  { %v1604_v48 = vpop.f32.mrb[22].mxu1  ;;  %v1317_v49 = vpop.f32.mrb[23].mxu0 }
 0x146   :  { %v1826_v50 = vadd.f32 %v1602_v44, %v160_v41  ;;  %v1605_v51 = vadd.f32 %v1604_v48, %v1315_v46  ;;  %v1606_v52 = vpop.f32.mrb[23].mxu1 }
 0x148   :  { %1890 = vst [vmem:[#allocation2 + $0x50] sm:$0xff] %v1826_v50  ;;  %v1827_v53 = vadd.f32 %v1605_v51, %v161_v47  ;;  %v170_v47 = vld [vmem:[#allocation2 + $0xa0] sm:$0xff] }
 0x14a   :  { %1891 = vst [vmem:[#allocation2 + $0x58] sm:$0xff] %v1827_v53  ;;  %v1320_v54 = vpop.f32.mrb[24].mxu0  ;;  %v171_v53 = vld [vmem:[#allocation2 + $0xa8] sm:$0xff] }
 0x14b   :  { %v1609_v56 = vpop.f32.mrb[24].mxu1  ;;  %v1322_v57 = vpop.f32.mrb[25].mxu0 }
 0x14c   :  { %v1610_v58 = vadd.f32 %v1609_v56, %v1320_v54  ;;  %v1611_v59 = vpop.f32.mrb[25].mxu1  ;;  %v1323_v60 = vpop.f32.mrb[26].mxu0 }
 0x14d   :  { %v1612_v62 = vpop.f32.mrb[26].mxu1  ;;  %v1325_v63 = vpop.f32.mrb[27].mxu0 }
 0x14e   :  { %v1828_v0 = vadd.f32 %v1610_v58, %v162_v55  ;;  %v1613_v1 = vadd.f32 %v1612_v62, %v1323_v60  ;;  %v1614_v2 = vpop.f32.mrb[27].mxu1 }
 0x150   :  { %1892 = vst [vmem:[#allocation2 + $0x60] sm:$0xff] %v1828_v0  ;;  %v1829_v3 = vadd.f32 %v1613_v1, %v163_v61  ;;  %v172_v61 = vld [vmem:[#allocation2 + $0xb0] sm:$0xff] }
 0x152   :  { %1893 = vst [vmem:[#allocation2 + $0x68] sm:$0xff] %v1829_v3  ;;  %v1328_v4 = vpop.f32.mrb[28].mxu0  ;;  %v173_v3 = vld [vmem:[#allocation2 + $0xb8] sm:$0xff] }
 0x153   :  { %v1617_v6 = vpop.f32.mrb[28].mxu1  ;;  %v1330_v7 = vpop.f32.mrb[29].mxu0 }
 0x154   :  { %v1618_v8 = vadd.f32 %v1617_v6, %v1328_v4  ;;  %v1619_v9 = vpop.f32.mrb[29].mxu1  ;;  %v1331_v10 = vpop.f32.mrb[30].mxu0 }
 0x155   :  { %v1620_v12 = vpop.f32.mrb[30].mxu1  ;;  %v1333_v13 = vpop.f32.mrb[31].mxu0 }
 0x156   :  { %v1830_v14 = vadd.f32 %v1618_v8, %v164_v5  ;;  %v1621_v15 = vadd.f32 %v1620_v12, %v1331_v10  ;;  %v1622_v16 = vpop.f32.mrb[31].mxu1 }
 0x158   :  { %1894 = vst [vmem:[#allocation2 + $0x70] sm:$0xff] %v1830_v14  ;;  %v1831_v17 = vadd.f32 %v1621_v15, %v165_v11  ;;  %v174_v11 = vld [vmem:[#allocation2 + $0xc0] sm:$0xff] }
 0x15a   :  { %1895 = vst [vmem:[#allocation2 + $0x78] sm:$0xff] %v1831_v17  ;;  %v1336_v18 = vpop.f32.mrb[32].mxu0  ;;  %v175_v17 = vld [vmem:[#allocation2 + $0xc8] sm:$0xff] }
 0x15b   :  { %v1625_v20 = vpop.f32.mrb[32].mxu1  ;;  %v1338_v21 = vpop.f32.mrb[33].mxu0 }
 0x15c   :  { %v1626_v22 = vadd.f32 %v1625_v20, %v1336_v18  ;;  %v1627_v23 = vpop.f32.mrb[33].mxu1  ;;  %v1339_v24 = vpop.f32.mrb[34].mxu0 }
 0x15d   :  { %v1628_v26 = vpop.f32.mrb[34].mxu1  ;;  %v1341_v27 = vpop.f32.mrb[35].mxu0 }
 0x15e   :  { %v1832_v28 = vadd.f32 %v1626_v22, %v166_v19  ;;  %v1629_v29 = vadd.f32 %v1628_v26, %v1339_v24  ;;  %v1630_v30 = vpop.f32.mrb[35].mxu1 }
 0x160   :  { %1896 = vst [vmem:[#allocation2 + $0x80] sm:$0xff] %v1832_v28  ;;  %v1833_v31 = vadd.f32 %v1629_v29, %v167_v25  ;;  %v176_v25 = vld [vmem:[#allocation2 + $0xd0] sm:$0xff] }
 0x162   :  { %1897 = vst [vmem:[#allocation2 + $0x88] sm:$0xff] %v1833_v31  ;;  %v1344_v32 = vpop.f32.mrb[36].mxu0  ;;  %v177_v31 = vld [vmem:[#allocation2 + $0xd8] sm:$0xff] }
 0x163   :  { %v1633_v34 = vpop.f32.mrb[36].mxu1  ;;  %v1346_v35 = vpop.f32.mrb[37].mxu0 }
 0x164   :  { %v1634_v36 = vadd.f32 %v1633_v34, %v1344_v32  ;;  %v1635_v37 = vpop.f32.mrb[37].mxu1  ;;  %v1347_v38 = vpop.f32.mrb[38].mxu0 }
 0x165   :  { %v1636_v40 = vpop.f32.mrb[38].mxu1  ;;  %v1349_v41 = vpop.f32.mrb[39].mxu0 }
 0x166   :  { %v1834_v42 = vadd.f32 %v1634_v36, %v168_v33  ;;  %v1637_v43 = vadd.f32 %v1636_v40, %v1347_v38  ;;  %v1638_v44 = vpop.f32.mrb[39].mxu1 }
 0x168   :  { %1898 = vst [vmem:[#allocation2 + $0x90] sm:$0xff] %v1834_v42  ;;  %v1835_v45 = vadd.f32 %v1637_v43, %v169_v39  ;;  %v178_v39 = vld [vmem:[#allocation2 + $0xe0] sm:$0xff] }
 0x16a   :  { %1899 = vst [vmem:[#allocation2 + $0x98] sm:$0xff] %v1835_v45  ;;  %v1352_v46 = vpop.f32.mrb[40].mxu0  ;;  %v179_v45 = vld [vmem:[#allocation2 + $0xe8] sm:$0xff] }
 0x16b   :  { %v1641_v48 = vpop.f32.mrb[40].mxu1  ;;  %v1354_v49 = vpop.f32.mrb[41].mxu0 }
 0x16c   :  { %v1642_v50 = vadd.f32 %v1641_v48, %v1352_v46  ;;  %v1643_v51 = vpop.f32.mrb[41].mxu1  ;;  %v1355_v52 = vpop.f32.mrb[42].mxu0 }
 0x16d   :  { %v1644_v54 = vpop.f32.mrb[42].mxu1  ;;  %v1357_v55 = vpop.f32.mrb[43].mxu0 }
 0x16e   :  { %v1836_v56 = vadd.f32 %v1642_v50, %v170_v47  ;;  %v1645_v57 = vadd.f32 %v1644_v54, %v1355_v52  ;;  %v1646_v58 = vpop.f32.mrb[43].mxu1 }
 0x170   :  { %1900 = vst [vmem:[#allocation2 + $0xa0] sm:$0xff] %v1836_v56  ;;  %v1837_v59 = vadd.f32 %v1645_v57, %v171_v53  ;;  %v180_v53 = vld [vmem:[#allocation2 + $0xf0] sm:$0xff] }
 0x172   :  { %1901 = vst [vmem:[#allocation2 + $0xa8] sm:$0xff] %v1837_v59  ;;  %v1360_v60 = vpop.f32.mrb[44].mxu0  ;;  %v181_v59 = vld [vmem:[#allocation2 + $0xf8] sm:$0xff] }
 0x173   :  { %v1649_v62 = vpop.f32.mrb[44].mxu1  ;;  %v1362_v63 = vpop.f32.mrb[45].mxu0 }
 0x174   :  { %v1650_v0 = vadd.f32 %v1649_v62, %v1360_v60  ;;  %v1651_v1 = vpop.f32.mrb[45].mxu1  ;;  %v1363_v2 = vpop.f32.mrb[46].mxu0 }
 0x175   :  { %v1652_v4 = vpop.f32.mrb[46].mxu1  ;;  %v1365_v5 = vpop.f32.mrb[47].mxu0 }
 0x176   :  { %v1838_v6 = vadd.f32 %v1650_v0, %v172_v61  ;;  %v1653_v7 = vadd.f32 %v1652_v4, %v1363_v2  ;;  %v1654_v8 = vpop.f32.mrb[47].mxu1 }
 0x178   :  { %1902 = vst [vmem:[#allocation2 + $0xb0] sm:$0xff] %v1838_v6  ;;  %v1839_v9 = vadd.f32 %v1653_v7, %v173_v3  ;;  %v182_v3 = vld [vmem:[#allocation2 + $0x100] sm:$0xff] }
 0x17a   :  { %1903 = vst [vmem:[#allocation2 + $0xb8] sm:$0xff] %v1839_v9  ;;  %v1368_v10 = vpop.f32.mrb[48].mxu0  ;;  %v183_v9 = vld [vmem:[#allocation2 + $0x108] sm:$0xff] }
 0x17b   :  { %v1657_v12 = vpop.f32.mrb[48].mxu1  ;;  %v1370_v13 = vpop.f32.mrb[49].mxu0 }
 0x17c   :  { %v1658_v14 = vadd.f32 %v1657_v12, %v1368_v10  ;;  %v1659_v15 = vpop.f32.mrb[49].mxu1  ;;  %v1371_v16 = vpop.f32.mrb[50].mxu0 }
 0x17d   :  { %v1660_v18 = vpop.f32.mrb[50].mxu1  ;;  %v1373_v19 = vpop.f32.mrb[51].mxu0 }
 0x17e   :  { %v1840_v20 = vadd.f32 %v1658_v14, %v174_v11  ;;  %v1661_v21 = vadd.f32 %v1660_v18, %v1371_v16  ;;  %v1662_v22 = vpop.f32.mrb[51].mxu1 }
 0x180   :  { %1904 = vst [vmem:[#allocation2 + $0xc0] sm:$0xff] %v1840_v20  ;;  %v1841_v23 = vadd.f32 %v1661_v21, %v175_v17  ;;  %v184_v17 = vld [vmem:[#allocation2 + $0x110] sm:$0xff] }
 0x182   :  { %1905 = vst [vmem:[#allocation2 + $0xc8] sm:$0xff] %v1841_v23  ;;  %v1376_v24 = vpop.f32.mrb[52].mxu0  ;;  %v185_v23 = vld [vmem:[#allocation2 + $0x118] sm:$0xff] }
 0x183   :  { %v1665_v26 = vpop.f32.mrb[52].mxu1  ;;  %v1378_v27 = vpop.f32.mrb[53].mxu0 }
 0x184   :  { %v1666_v28 = vadd.f32 %v1665_v26, %v1376_v24  ;;  %v1667_v29 = vpop.f32.mrb[53].mxu1  ;;  %v1379_v30 = vpop.f32.mrb[54].mxu0 }
 0x185   :  { %v1668_v32 = vpop.f32.mrb[54].mxu1  ;;  %v1381_v33 = vpop.f32.mrb[55].mxu0 }
 0x186   :  { %v1842_v34 = vadd.f32 %v1666_v28, %v176_v25  ;;  %v1669_v35 = vadd.f32 %v1668_v32, %v1379_v30  ;;  %v1670_v36 = vpop.f32.mrb[55].mxu1 }
 0x188   :  { %1906 = vst [vmem:[#allocation2 + $0xd0] sm:$0xff] %v1842_v34  ;;  %v1843_v37 = vadd.f32 %v1669_v35, %v177_v31  ;;  %v186_v31 = vld [vmem:[#allocation2 + $0x120] sm:$0xff] }
 0x18a   :  { %1907 = vst [vmem:[#allocation2 + $0xd8] sm:$0xff] %v1843_v37  ;;  %v1384_v38 = vpop.f32.mrb[56].mxu0  ;;  %v187_v37 = vld [vmem:[#allocation2 + $0x128] sm:$0xff] }
 0x18b   :  { %v1673_v40 = vpop.f32.mrb[56].mxu1  ;;  %v1386_v41 = vpop.f32.mrb[57].mxu0 }
 0x18c   :  { %v1674_v42 = vadd.f32 %v1673_v40, %v1384_v38  ;;  %v1675_v43 = vpop.f32.mrb[57].mxu1  ;;  %v1387_v44 = vpop.f32.mrb[58].mxu0 }
 0x18d   :  { %v1676_v46 = vpop.f32.mrb[58].mxu1  ;;  %v1389_v47 = vpop.f32.mrb[59].mxu0 }
 0x18e   :  { %v1844_v48 = vadd.f32 %v1674_v42, %v178_v39  ;;  %v1677_v49 = vadd.f32 %v1676_v46, %v1387_v44  ;;  %v1678_v50 = vpop.f32.mrb[59].mxu1 }
 0x190   :  { %1908 = vst [vmem:[#allocation2 + $0xe0] sm:$0xff] %v1844_v48  ;;  %v1845_v51 = vadd.f32 %v1677_v49, %v179_v45  ;;  %v188_v45 = vld [vmem:[#allocation2 + $0x130] sm:$0xff] }
 0x192   :  { %1909 = vst [vmem:[#allocation2 + $0xe8] sm:$0xff] %v1845_v51  ;;  %v1392_v52 = vpop.f32.mrb[60].mxu0  ;;  %v189_v51 = vld [vmem:[#allocation2 + $0x138] sm:$0xff] }
 0x193   :  { %v1681_v54 = vpop.f32.mrb[60].mxu1  ;;  %v1394_v55 = vpop.f32.mrb[61].mxu0 }
 0x194   :  { %v1682_v56 = vadd.f32 %v1681_v54, %v1392_v52  ;;  %v1683_v57 = vpop.f32.mrb[61].mxu1  ;;  %v1395_v58 = vpop.f32.mrb[62].mxu0 }
 0x195   :  { %v1684_v60 = vpop.f32.mrb[62].mxu1  ;;  %v1397_v61 = vpop.f32.mrb[63].mxu0 }
 0x196   :  { %v1846_v62 = vadd.f32 %v1682_v56, %v180_v53  ;;  %v1685_v63 = vadd.f32 %v1684_v60, %v1395_v58  ;;  %v1686_v0 = vpop.f32.mrb[63].mxu1 }
 0x198   :  { %1910 = vst [vmem:[#allocation2 + $0xf0] sm:$0xff] %v1846_v62  ;;  %v1847_v1 = vadd.f32 %v1685_v63, %v181_v59  ;;  %v190_v59 = vld [vmem:[#allocation2 + $0x140] sm:$0xff] }
 0x19a   :  { %1911 = vst [vmem:[#allocation2 + $0xf8] sm:$0xff] %v1847_v1  ;;  %v1400_v2 = vpop.f32.mrb[64].mxu0  ;;  %v191_v1 = vld [vmem:[#allocation2 + $0x148] sm:$0xff] }
 0x19b   :  { %v1689_v4 = vpop.f32.mrb[64].mxu1  ;;  %v1402_v5 = vpop.f32.mrb[65].mxu0 }
 0x19c   :  { %v1690_v6 = vadd.f32 %v1689_v4, %v1400_v2  ;;  %v1691_v7 = vpop.f32.mrb[65].mxu1  ;;  %v1403_v8 = vpop.f32.mrb[66].mxu0 }
 0x19d   :  { %v1692_v10 = vpop.f32.mrb[66].mxu1  ;;  %v1405_v11 = vpop.f32.mrb[67].mxu0 }
 0x19e   :  { %v1848_v12 = vadd.f32 %v1690_v6, %v182_v3  ;;  %v1693_v13 = vadd.f32 %v1692_v10, %v1403_v8  ;;  %v1694_v14 = vpop.f32.mrb[67].mxu1 }
 0x1a0   :  { %1912 = vst [vmem:[#allocation2 + $0x100] sm:$0xff] %v1848_v12  ;;  %v1849_v15 = vadd.f32 %v1693_v13, %v183_v9  ;;  %v192_v9 = vld [vmem:[#allocation2 + $0x150] sm:$0xff] }
 0x1a2   :  { %1913 = vst [vmem:[#allocation2 + $0x108] sm:$0xff] %v1849_v15  ;;  %v1408_v16 = vpop.f32.mrb[68].mxu0  ;;  %v193_v15 = vld [vmem:[#allocation2 + $0x158] sm:$0xff] }
 0x1a3   :  { %v1697_v18 = vpop.f32.mrb[68].mxu1  ;;  %v1410_v19 = vpop.f32.mrb[69].mxu0 }
 0x1a4   :  { %v1698_v20 = vadd.f32 %v1697_v18, %v1408_v16  ;;  %v1699_v21 = vpop.f32.mrb[69].mxu1  ;;  %v1411_v22 = vpop.f32.mrb[70].mxu0 }
 0x1a5   :  { %v1700_v24 = vpop.f32.mrb[70].mxu1  ;;  %v1413_v25 = vpop.f32.mrb[71].mxu0 }
 0x1a6   :  { %v1850_v26 = vadd.f32 %v1698_v20, %v184_v17  ;;  %v1701_v27 = vadd.f32 %v1700_v24, %v1411_v22  ;;  %v1702_v28 = vpop.f32.mrb[71].mxu1 }
 0x1a8   :  { %1914 = vst [vmem:[#allocation2 + $0x110] sm:$0xff] %v1850_v26  ;;  %v1851_v29 = vadd.f32 %v1701_v27, %v185_v23  ;;  %v194_v23 = vld [vmem:[#allocation2 + $0x160] sm:$0xff] }
 0x1aa   :  { %1915 = vst [vmem:[#allocation2 + $0x118] sm:$0xff] %v1851_v29  ;;  %v1416_v30 = vpop.f32.mrb[72].mxu0  ;;  %v195_v29 = vld [vmem:[#allocation2 + $0x168] sm:$0xff] }
 0x1ab   :  { %v1705_v32 = vpop.f32.mrb[72].mxu1  ;;  %v1418_v33 = vpop.f32.mrb[73].mxu0 }
 0x1ac   :  { %v1706_v34 = vadd.f32 %v1705_v32, %v1416_v30  ;;  %v1707_v35 = vpop.f32.mrb[73].mxu1  ;;  %v1419_v36 = vpop.f32.mrb[74].mxu0 }
 0x1ad   :  { %v1708_v38 = vpop.f32.mrb[74].mxu1  ;;  %v1421_v39 = vpop.f32.mrb[75].mxu0 }
 0x1ae   :  { %v1852_v40 = vadd.f32 %v1706_v34, %v186_v31  ;;  %v1709_v41 = vadd.f32 %v1708_v38, %v1419_v36  ;;  %v1710_v42 = vpop.f32.mrb[75].mxu1 }
 0x1b0   :  { %1916 = vst [vmem:[#allocation2 + $0x120] sm:$0xff] %v1852_v40  ;;  %v1853_v43 = vadd.f32 %v1709_v41, %v187_v37  ;;  %v196_v37 = vld [vmem:[#allocation2 + $0x170] sm:$0xff] }
 0x1b2   :  { %1917 = vst [vmem:[#allocation2 + $0x128] sm:$0xff] %v1853_v43  ;;  %v1424_v44 = vpop.f32.mrb[76].mxu0  ;;  %v197_v43 = vld [vmem:[#allocation2 + $0x178] sm:$0xff] }
 0x1b3   :  { %v1713_v46 = vpop.f32.mrb[76].mxu1  ;;  %v1426_v47 = vpop.f32.mrb[77].mxu0 }
 0x1b4   :  { %v1714_v48 = vadd.f32 %v1713_v46, %v1424_v44  ;;  %v1715_v49 = vpop.f32.mrb[77].mxu1  ;;  %v1427_v50 = vpop.f32.mrb[78].mxu0 }
 0x1b5   :  { %v1716_v52 = vpop.f32.mrb[78].mxu1  ;;  %v1429_v53 = vpop.f32.mrb[79].mxu0 }
 0x1b6   :  { %v1854_v54 = vadd.f32 %v1714_v48, %v188_v45  ;;  %v1717_v55 = vadd.f32 %v1716_v52, %v1427_v50  ;;  %v1718_v56 = vpop.f32.mrb[79].mxu1 }
 0x1b8   :  { %1918 = vst [vmem:[#allocation2 + $0x130] sm:$0xff] %v1854_v54  ;;  %v1855_v57 = vadd.f32 %v1717_v55, %v189_v51  ;;  %v198_v51 = vld [vmem:[#allocation2 + $0x180] sm:$0xff] }
 0x1ba   :  { %1919 = vst [vmem:[#allocation2 + $0x138] sm:$0xff] %v1855_v57  ;;  %v1432_v58 = vpop.f32.mrb[80].mxu0  ;;  %v199_v57 = vld [vmem:[#allocation2 + $0x188] sm:$0xff] }
 0x1bb   :  { %v1721_v60 = vpop.f32.mrb[80].mxu1  ;;  %v1434_v61 = vpop.f32.mrb[81].mxu0 }
 0x1bc   :  { %v1722_v62 = vadd.f32 %v1721_v60, %v1432_v58  ;;  %v1723_v63 = vpop.f32.mrb[81].mxu1  ;;  %v1435_v0 = vpop.f32.mrb[82].mxu0 }
 0x1bd   :  { %v1724_v2 = vpop.f32.mrb[82].mxu1  ;;  %v1437_v3 = vpop.f32.mrb[83].mxu0 }
 0x1be   :  { %v1856_v4 = vadd.f32 %v1722_v62, %v190_v59  ;;  %v1725_v5 = vadd.f32 %v1724_v2, %v1435_v0  ;;  %v1726_v6 = vpop.f32.mrb[83].mxu1 }
 0x1c0   :  { %1920 = vst [vmem:[#allocation2 + $0x140] sm:$0xff] %v1856_v4  ;;  %v1857_v7 = vadd.f32 %v1725_v5, %v191_v1  ;;  %v200_v1 = vld [vmem:[#allocation2 + $0x190] sm:$0xff] }
 0x1c2   :  { %1921 = vst [vmem:[#allocation2 + $0x148] sm:$0xff] %v1857_v7  ;;  %v1440_v8 = vpop.f32.mrb[84].mxu0  ;;  %v201_v7 = vld [vmem:[#allocation2 + $0x198] sm:$0xff] }
 0x1c3   :  { %v1729_v10 = vpop.f32.mrb[84].mxu1  ;;  %v1442_v11 = vpop.f32.mrb[85].mxu0 }
 0x1c4   :  { %v1730_v12 = vadd.f32 %v1729_v10, %v1440_v8  ;;  %v1731_v13 = vpop.f32.mrb[85].mxu1  ;;  %v1443_v14 = vpop.f32.mrb[86].mxu0 }
 0x1c5   :  { %v1732_v16 = vpop.f32.mrb[86].mxu1  ;;  %v1445_v17 = vpop.f32.mrb[87].mxu0 }
 0x1c6   :  { %v1858_v18 = vadd.f32 %v1730_v12, %v192_v9  ;;  %v1733_v19 = vadd.f32 %v1732_v16, %v1443_v14  ;;  %v1734_v20 = vpop.f32.mrb[87].mxu1 }
 0x1c8   :  { %1922 = vst [vmem:[#allocation2 + $0x150] sm:$0xff] %v1858_v18  ;;  %v1859_v21 = vadd.f32 %v1733_v19, %v193_v15  ;;  %v202_v15 = vld [vmem:[#allocation2 + $0x1a0] sm:$0xff] }
 0x1ca   :  { %1923 = vst [vmem:[#allocation2 + $0x158] sm:$0xff] %v1859_v21  ;;  %v1448_v22 = vpop.f32.mrb[88].mxu0  ;;  %v203_v21 = vld [vmem:[#allocation2 + $0x1a8] sm:$0xff] }
 0x1cb   :  { %v1737_v24 = vpop.f32.mrb[88].mxu1  ;;  %v1450_v25 = vpop.f32.mrb[89].mxu0 }
 0x1cc   :  { %v1738_v26 = vadd.f32 %v1737_v24, %v1448_v22  ;;  %v1739_v27 = vpop.f32.mrb[89].mxu1  ;;  %v1451_v28 = vpop.f32.mrb[90].mxu0 }
 0x1cd   :  { %v1740_v30 = vpop.f32.mrb[90].mxu1  ;;  %v1453_v31 = vpop.f32.mrb[91].mxu0 }
 0x1ce   :  { %v1860_v32 = vadd.f32 %v1738_v26, %v194_v23  ;;  %v1741_v33 = vadd.f32 %v1740_v30, %v1451_v28  ;;  %v1742_v34 = vpop.f32.mrb[91].mxu1 }
 0x1d0   :  { %1924 = vst [vmem:[#allocation2 + $0x160] sm:$0xff] %v1860_v32  ;;  %v1861_v35 = vadd.f32 %v1741_v33, %v195_v29  ;;  %v204_v29 = vld [vmem:[#allocation2 + $0x1b0] sm:$0xff] }
 0x1d2   :  { %1925 = vst [vmem:[#allocation2 + $0x168] sm:$0xff] %v1861_v35  ;;  %v1456_v36 = vpop.f32.mrb[92].mxu0  ;;  %v205_v35 = vld [vmem:[#allocation2 + $0x1b8] sm:$0xff] }
 0x1d3   :  { %v1745_v38 = vpop.f32.mrb[92].mxu1  ;;  %v1458_v39 = vpop.f32.mrb[93].mxu0 }
 0x1d4   :  { %v1746_v40 = vadd.f32 %v1745_v38, %v1456_v36  ;;  %v1747_v41 = vpop.f32.mrb[93].mxu1  ;;  %v1459_v42 = vpop.f32.mrb[94].mxu0 }
 0x1d5   :  { %v1748_v44 = vpop.f32.mrb[94].mxu1  ;;  %v1461_v45 = vpop.f32.mrb[95].mxu0 }
 0x1d6   :  { %v1862_v46 = vadd.f32 %v1746_v40, %v196_v37  ;;  %v1749_v47 = vadd.f32 %v1748_v44, %v1459_v42  ;;  %v1750_v48 = vpop.f32.mrb[95].mxu1 }
 0x1d8   :  { %1926 = vst [vmem:[#allocation2 + $0x170] sm:$0xff] %v1862_v46  ;;  %v1863_v49 = vadd.f32 %v1749_v47, %v197_v43  ;;  %v206_v43 = vld [vmem:[#allocation2 + $0x1c0] sm:$0xff] }
 0x1da   :  { %1927 = vst [vmem:[#allocation2 + $0x178] sm:$0xff] %v1863_v49  ;;  %v1464_v50 = vpop.f32.mrb[96].mxu0  ;;  %v207_v49 = vld [vmem:[#allocation2 + $0x1c8] sm:$0xff] }
 0x1db   :  { %v1753_v52 = vpop.f32.mrb[96].mxu1  ;;  %v1466_v53 = vpop.f32.mrb[97].mxu0 }
 0x1dc   :  { %v1754_v54 = vadd.f32 %v1753_v52, %v1464_v50  ;;  %v1755_v55 = vpop.f32.mrb[97].mxu1  ;;  %v1467_v56 = vpop.f32.mrb[98].mxu0 }
 0x1dd   :  { %v1756_v58 = vpop.f32.mrb[98].mxu1  ;;  %v1469_v59 = vpop.f32.mrb[99].mxu0 }
 0x1de   :  { %v1864_v60 = vadd.f32 %v1754_v54, %v198_v51  ;;  %v1757_v61 = vadd.f32 %v1756_v58, %v1467_v56  ;;  %v1758_v62 = vpop.f32.mrb[99].mxu1 }
 0x1e0   :  { %1928 = vst [vmem:[#allocation2 + $0x180] sm:$0xff] %v1864_v60  ;;  %v1865_v63 = vadd.f32 %v1757_v61, %v199_v57  ;;  %v208_v57 = vld [vmem:[#allocation2 + $0x1d0] sm:$0xff] }
 0x1e2   :  { %1929 = vst [vmem:[#allocation2 + $0x188] sm:$0xff] %v1865_v63  ;;  %v1472_v0 = vpop.f32.mrb[100].mxu0  ;;  %v209_v63 = vld [vmem:[#allocation2 + $0x1d8] sm:$0xff] }
 0x1e3   :  { %v1761_v2 = vpop.f32.mrb[100].mxu1  ;;  %v1474_v3 = vpop.f32.mrb[101].mxu0 }
 0x1e4   :  { %v1762_v4 = vadd.f32 %v1761_v2, %v1472_v0  ;;  %v1763_v5 = vpop.f32.mrb[101].mxu1  ;;  %v1475_v6 = vpop.f32.mrb[102].mxu0 }
 0x1e5   :  { %v1764_v8 = vpop.f32.mrb[102].mxu1  ;;  %v1477_v9 = vpop.f32.mrb[103].mxu0 }
 0x1e6   :  { %v1866_v10 = vadd.f32 %v1762_v4, %v200_v1  ;;  %v1765_v11 = vadd.f32 %v1764_v8, %v1475_v6  ;;  %v1766_v12 = vpop.f32.mrb[103].mxu1 }
 0x1e8   :  { %1930 = vst [vmem:[#allocation2 + $0x190] sm:$0xff] %v1866_v10  ;;  %v1867_v13 = vadd.f32 %v1765_v11, %v201_v7  ;;  %v210_v7 = vld [vmem:[#allocation2 + $0x1e0] sm:$0xff] }
 0x1ea   :  { %1931 = vst [vmem:[#allocation2 + $0x198] sm:$0xff] %v1867_v13  ;;  %v1480_v14 = vpop.f32.mrb[104].mxu0  ;;  %v211_v13 = vld [vmem:[#allocation2 + $0x1e8] sm:$0xff] }
 0x1eb   :  { %v1769_v16 = vpop.f32.mrb[104].mxu1  ;;  %v1482_v17 = vpop.f32.mrb[105].mxu0 }
 0x1ec   :  { %v1770_v18 = vadd.f32 %v1769_v16, %v1480_v14  ;;  %v1771_v19 = vpop.f32.mrb[105].mxu1  ;;  %v1483_v20 = vpop.f32.mrb[106].mxu0 }
 0x1ed   :  { %v1772_v22 = vpop.f32.mrb[106].mxu1  ;;  %v1485_v23 = vpop.f32.mrb[107].mxu0 }
 0x1ee   :  { %v1868_v24 = vadd.f32 %v1770_v18, %v202_v15  ;;  %v1773_v25 = vadd.f32 %v1772_v22, %v1483_v20  ;;  %v1774_v26 = vpop.f32.mrb[107].mxu1 }
 0x1f0   :  { %1932 = vst [vmem:[#allocation2 + $0x1a0] sm:$0xff] %v1868_v24  ;;  %v1869_v27 = vadd.f32 %v1773_v25, %v203_v21  ;;  %v212_v21 = vld [vmem:[#allocation2 + $0x1f0] sm:$0xff] }
 0x1f2   :  { %1933 = vst [vmem:[#allocation2 + $0x1a8] sm:$0xff] %v1869_v27  ;;  %v1488_v28 = vpop.f32.mrb[108].mxu0  ;;  %v213_v27 = vld [vmem:[#allocation2 + $0x1f8] sm:$0xff] }
 0x1f3   :  { %v1777_v30 = vpop.f32.mrb[108].mxu1  ;;  %v1490_v31 = vpop.f32.mrb[109].mxu0 }
 0x1f4   :  { %v1778_v32 = vadd.f32 %v1777_v30, %v1488_v28  ;;  %v1779_v33 = vpop.f32.mrb[109].mxu1  ;;  %v1491_v34 = vpop.f32.mrb[110].mxu0 }
 0x1f5   :  { %v1780_v36 = vpop.f32.mrb[110].mxu1  ;;  %v1493_v37 = vpop.f32.mrb[111].mxu0 }
 0x1f6   :  { %v1870_v38 = vadd.f32 %v1778_v32, %v204_v29  ;;  %v1781_v39 = vadd.f32 %v1780_v36, %v1491_v34  ;;  %v1782_v40 = vpop.f32.mrb[111].mxu1 }
 0x1f8   :  { %1934 = vst [vmem:[#allocation2 + $0x1b0] sm:$0xff] %v1870_v38  ;;  %v1871_v41 = vadd.f32 %v1781_v39, %v205_v35 }
 0x1fa   :  { %1935 = vst [vmem:[#allocation2 + $0x1b8] sm:$0xff] %v1871_v41  ;;  %v1496_v42 = vpop.f32.mrb[112].mxu0 }
 0x1fb   :  { %v1785_v44 = vpop.f32.mrb[112].mxu1  ;;  %v1498_v45 = vpop.f32.mrb[113].mxu0 }
 0x1fc   :  { %v1786_v46 = vadd.f32 %v1785_v44, %v1496_v42  ;;  %v1787_v47 = vpop.f32.mrb[113].mxu1  ;;  %v1499_v48 = vpop.f32.mrb[114].mxu0 }
 0x1fd   :  { %v1788_v50 = vpop.f32.mrb[114].mxu1  ;;  %v1501_v51 = vpop.f32.mrb[115].mxu0 }
 0x1fe   :  { %v1872_v52 = vadd.f32 %v1786_v46, %v206_v43  ;;  %v1789_v53 = vadd.f32 %v1788_v50, %v1499_v48  ;;  %v1790_v54 = vpop.f32.mrb[115].mxu1 }
 0x200   :  { %1936 = vst [vmem:[#allocation2 + $0x1c0] sm:$0xff] %v1872_v52  ;;  %v1873_v55 = vadd.f32 %v1789_v53, %v207_v49 }
 0x202   :  { %1937 = vst [vmem:[#allocation2 + $0x1c8] sm:$0xff] %v1873_v55  ;;  %v1504_v56 = vpop.f32.mrb[116].mxu0 }
 0x203   :  { %v1793_v58 = vpop.f32.mrb[116].mxu1  ;;  %v1506_v59 = vpop.f32.mrb[117].mxu0 }
 0x204   :  { %v1794_v60 = vadd.f32 %v1793_v58, %v1504_v56  ;;  %v1795_v61 = vpop.f32.mrb[117].mxu1  ;;  %v1507_v62 = vpop.f32.mrb[118].mxu0 }
 0x205   :  { %v1796_v0 = vpop.f32.mrb[118].mxu1  ;;  %v1509_v1 = vpop.f32.mrb[119].mxu0 }
 0x206   :  { %v1874_v2 = vadd.f32 %v1794_v60, %v208_v57  ;;  %v1797_v3 = vadd.f32 %v1796_v0, %v1507_v62  ;;  %v1798_v4 = vpop.f32.mrb[119].mxu1 }
 0x208   :  { %1938 = vst [vmem:[#allocation2 + $0x1d0] sm:$0xff] %v1874_v2  ;;  %v1875_v5 = vadd.f32 %v1797_v3, %v209_v63 }
 0x20a   :  { %1939 = vst [vmem:[#allocation2 + $0x1d8] sm:$0xff] %v1875_v5  ;;  %v1512_v6 = vpop.f32.mrb[120].mxu0 }
 0x20b   :  { %v1801_v8 = vpop.f32.mrb[120].mxu1  ;;  %v1514_v9 = vpop.f32.mrb[121].mxu0 }
 0x20c   :  { %v1802_v10 = vadd.f32 %v1801_v8, %v1512_v6  ;;  %v1803_v11 = vpop.f32.mrb[121].mxu1  ;;  %v1515_v12 = vpop.f32.mrb[122].mxu0 }
 0x20d   :  { %v1804_v14 = vpop.f32.mrb[122].mxu1  ;;  %v1517_v15 = vpop.f32.mrb[123].mxu0 }
 0x20e   :  { %v1876_v16 = vadd.f32 %v1802_v10, %v210_v7  ;;  %v1805_v17 = vadd.f32 %v1804_v14, %v1515_v12  ;;  %v1806_v18 = vpop.f32.mrb[123].mxu1 }
 0x210   :  { %1940 = vst [vmem:[#allocation2 + $0x1e0] sm:$0xff] %v1876_v16  ;;  %v1877_v19 = vadd.f32 %v1805_v17, %v211_v13 }
 0x212   :  { %1941 = vst [vmem:[#allocation2 + $0x1e8] sm:$0xff] %v1877_v19  ;;  %v1520_v20 = vpop.f32.mrb[124].mxu0 }
 0x213   :  { %v1809_v22 = vpop.f32.mrb[124].mxu1  ;;  %v1522_v23 = vpop.f32.mrb[125].mxu0 }
 0x214   :  { %v1810_v24 = vadd.f32 %v1809_v22, %v1520_v20  ;;  %v1811_v25 = vpop.f32.mrb[125].mxu1  ;;  %v1523_v26 = vpop.f32.mrb[126].mxu0 }
 0x215   :  { %v1812_v28 = vpop.f32.mrb[126].mxu1  ;;  %v1525_v29 = vpop.f32.mrb[127].mxu0 }
 0x216   :  { %v1878_v30 = vadd.f32 %v1810_v24, %v212_v21  ;;  %v1813_v31 = vadd.f32 %v1812_v28, %v1523_v26  ;;  %v1814_v32 = vpop.f32.mrb[127].mxu1 }
 0x218   :  { %1942 = vst [vmem:[#allocation2 + $0x1f0] sm:$0xff] %v1878_v30  ;;  %v1879_v33 = vadd.f32 %v1813_v31, %v213_v27 }
 0x21a   :  { %1943 = vst [vmem:[#allocation2 + $0x1f8] sm:$0xff] %v1879_v33 }
 0x21b PF:  { %v2013_v34 = vld [vmem:[%s4511_s4 + $0x10] sm:$0xff]  ;;  %v2011_v35 = vld [vmem:[%s4511_s4] sm:$0xff]  ;;  %v3702_v36 = vmov 0   ;;  %v2014_v37 = vld [vmem:[%s4511_s4 + $0x18] sm:$0xff] }
 0x21c   :  { %3699 = vset.pattern.permute.xlu1 %v3702_v36  ;;  %3698 = vset.pattern.permute.xlu0 %v3702_v36  ;;  %v2012_v38 = vld [vmem:[%s4511_s4 + $0x8] sm:$0xff]  ;;  %v2015_v40 = vld [vmem:[%s4511_s4 + $0x20] sm:$0xff]  ;;  %v2018_v41 = vld [vmem:[%s4511_s4 + $0x38] sm:$0xff] }
 0x21d   :  { %2087 = vperm.xlu1 %3699, %v2013_v34   ;;  %2077 = vperm.xlu0 %3698, %v2011_v35   ;;  %v2016_v39 = vld [vmem:[%s4511_s4 + $0x28] sm:$0xff]  ;;  %v2017_v42 = vld [vmem:[%s4511_s4 + $0x30] sm:$0xff]  ;;  %v2019_v44 = vld [vmem:[%s4511_s4 + $0x40] sm:$0xff] }
 0x21e   :  { %v2020_v43 = vld [vmem:[%s4511_s4 + $0x48] sm:$0xff]  ;;  %v2022_v45 = vld [vmem:[%s4511_s4 + $0x58] sm:$0xff]  ;;  %v2021_v46 = vld [vmem:[%s4511_s4 + $0x50] sm:$0xff] }
 0x21f   :  { %v2024_v47 = vld [vmem:[%s4511_s4 + $0x68] sm:$0xff]  ;;  %v2023_v48 = vld [vmem:[%s4511_s4 + $0x60] sm:$0xff]  ;;  %v2026_v49 = vld [vmem:[%s4511_s4 + $0x78] sm:$0xff] }
 0x220   :  { %v2025_v50 = vld [vmem:[%s4511_s4 + $0x70] sm:$0xff]  ;;  %v2028_v51 = vld [vmem:[%s4511_s4 + $0x88] sm:$0xff]  ;;  %v2027_v52 = vld [vmem:[%s4511_s4 + $0x80] sm:$0xff] }
 0x221   :  { %2092 = vperm.xlu1 %3699, %v2014_v37   ;;  %2082 = vperm.xlu0 %3698, %v2012_v38   ;;  %v2030_v53 = vld [vmem:[%s4511_s4 + $0x98] sm:$0xff]  ;;  %v2029_v54 = vld [vmem:[%s4511_s4 + $0x90] sm:$0xff]  ;;  %v2032_v55 = vld [vmem:[%s4511_s4 + $0xa8] sm:$0xff] }
 0x222   :  { %v2031_v56 = vld [vmem:[%s4511_s4 + $0xa0] sm:$0xff]  ;;  %v2034_v57 = vld [vmem:[%s4511_s4 + $0xb8] sm:$0xff]  ;;  %v2033_v58 = vld [vmem:[%s4511_s4 + $0xb0] sm:$0xff] }
 0x223   :  { %v2036_v59 = vld [vmem:[%s4511_s4 + $0xc8] sm:$0xff]  ;;  %v2035_v60 = vld [vmem:[%s4511_s4 + $0xc0] sm:$0xff]  ;;  %v2038_v61 = vld [vmem:[%s4511_s4 + $0xd8] sm:$0xff] }
 0x224   :  { %v2037_v62 = vld [vmem:[%s4511_s4 + $0xd0] sm:$0xff]  ;;  %v2040_v63 = vld [vmem:[%s4511_s4 + $0xe8] sm:$0xff]  ;;  %v2039_v0 = vld [vmem:[%s4511_s4 + $0xe0] sm:$0xff] }
 0x225   :  { %2102 = vperm.xlu1 %3699, %v2016_v39   ;;  %2097 = vperm.xlu0 %3698, %v2015_v40   ;;  %v2042_v1 = vld [vmem:[%s4511_s4 + $0xf8] sm:$0xff]  ;;  %v2041_v2 = vld [vmem:[%s4511_s4 + $0xf0] sm:$0xff]  ;;  %v2044_v3 = vld [vmem:[%s4511_s4 + $0x108] sm:$0xff] }
 0x226   :  { %v2043_v4 = vld [vmem:[%s4511_s4 + $0x100] sm:$0xff]  ;;  %v2046_v5 = vld [vmem:[%s4511_s4 + $0x118] sm:$0xff]  ;;  %v2045_v6 = vld [vmem:[%s4511_s4 + $0x110] sm:$0xff] }
 0x227   :  { %v2048_v7 = vld [vmem:[%s4511_s4 + $0x128] sm:$0xff]  ;;  %v2047_v8 = vld [vmem:[%s4511_s4 + $0x120] sm:$0xff]  ;;  %v2050_v9 = vld [vmem:[%s4511_s4 + $0x138] sm:$0xff] }
 0x228   :  { %v2049_v10 = vld [vmem:[%s4511_s4 + $0x130] sm:$0xff]  ;;  %v2052_v11 = vld [vmem:[%s4511_s4 + $0x148] sm:$0xff]  ;;  %v2051_v12 = vld [vmem:[%s4511_s4 + $0x140] sm:$0xff] }
 0x229   :  { %2112 = vperm.xlu1 %3699, %v2018_v41   ;;  %2107 = vperm.xlu0 %3698, %v2017_v42   ;;  %v2054_v13 = vld [vmem:[%s4511_s4 + $0x158] sm:$0xff]  ;;  %v2053_v14 = vld [vmem:[%s4511_s4 + $0x150] sm:$0xff]  ;;  %v2056_v15 = vld [vmem:[%s4511_s4 + $0x168] sm:$0xff] }
 0x22a   :  { %v2055_v16 = vld [vmem:[%s4511_s4 + $0x160] sm:$0xff]  ;;  %v2058_v17 = vld [vmem:[%s4511_s4 + $0x178] sm:$0xff]  ;;  %v2057_v18 = vld [vmem:[%s4511_s4 + $0x170] sm:$0xff] }
 0x22b   :  { %v2060_v19 = vld [vmem:[%s4511_s4 + $0x188] sm:$0xff]  ;;  %v2059_v20 = vld [vmem:[%s4511_s4 + $0x180] sm:$0xff]  ;;  %v2062_v21 = vld [vmem:[%s4511_s4 + $0x198] sm:$0xff] }
 0x22c   :  { %v2061_v22 = vld [vmem:[%s4511_s4 + $0x190] sm:$0xff]  ;;  %v2064_v23 = vld [vmem:[%s4511_s4 + $0x1a8] sm:$0xff]  ;;  %v2063_v24 = vld [vmem:[%s4511_s4 + $0x1a0] sm:$0xff] }
 0x22d   :  { %2122 = vperm.xlu1 %3699, %v2020_v43   ;;  %2117 = vperm.xlu0 %3698, %v2019_v44   ;;  %v2066_v25 = vld [vmem:[%s4511_s4 + $0x1b8] sm:$0xff]  ;;  %v2065_v26 = vld [vmem:[%s4511_s4 + $0x1b0] sm:$0xff]  ;;  %v2068_v27 = vld [vmem:[%s4511_s4 + $0x1c8] sm:$0xff] }
 0x22e   :  { %v2067_v28 = vld [vmem:[%s4511_s4 + $0x1c0] sm:$0xff]  ;;  %v2070_v29 = vld [vmem:[%s4511_s4 + $0x1d8] sm:$0xff]  ;;  %v2069_v30 = vld [vmem:[%s4511_s4 + $0x1d0] sm:$0xff] }
 0x22f   :  { %v2072_v31 = vld [vmem:[%s4511_s4 + $0x1e8] sm:$0xff]  ;;  %v2071_v32 = vld [vmem:[%s4511_s4 + $0x1e0] sm:$0xff]  ;;  %v2074_v33 = vld [vmem:[%s4511_s4 + $0x1f8] sm:$0xff] }
 0x230   :  { %v2073_v34 = vld [vmem:[%s4511_s4 + $0x1f0] sm:$0xff]  ;;  %v1947_v36 = vld [vmem:[#allocation2] sm:$0xff]  ;;  %v1950_v43 = vld [vmem:[#allocation2 + $0x18] sm:$0xff] }
 0x231   :  { %2132 = vperm.xlu1 %3699, %v2022_v45   ;;  %2127 = vperm.xlu0 %3698, %v2021_v46   ;;  %v1949_v35 = vld [vmem:[#allocation2 + $0x10] sm:$0xff]  ;;  %v2459_v41 = vld [vmem:[%s4512_s5] sm:$0xff]  ;;  %v1948_v44 = vld [vmem:[#allocation2 + $0x8] sm:$0xff] }
 0x232   :  { %v2461_v39 = vld [vmem:[%s4512_s5 + $0x10] sm:$0xff] }
 0x235   :  { %2142 = vperm.xlu1 %3699, %v2024_v47   ;;  %2137 = vperm.xlu0 %3698, %v2023_v48   ;;  %v2462_v47 = vld [vmem:[%s4512_s5 + $0x18] sm:$0xff] }
 0x239   :  { %2152 = vperm.xlu1 %3699, %v2026_v49   ;;  %2147 = vperm.xlu0 %3698, %v2025_v50   ;;  %v2460_v49 = vld [vmem:[%s4512_s5 + $0x8] sm:$0xff] }
 0x23d   :  { %2162 = vperm.xlu1 %3699, %v2028_v51   ;;  %2157 = vperm.xlu0 %3698, %v2027_v52  }
 0x241   :  { %2172 = vperm.xlu1 %3699, %v2030_v53   ;;  %2167 = vperm.xlu0 %3698, %v2029_v54   ;;  %v1952_v53 = vld [vmem:[#allocation2 + $0x28] sm:$0xff]  ;;  %v1951_v54 = vld [vmem:[#allocation2 + $0x20] sm:$0xff] }
 0x245   :  { %2182 = vperm.xlu1 %3699, %v2032_v55   ;;  %2177 = vperm.xlu0 %3698, %v2031_v56  }
 0x249   :  { %2192 = vperm.xlu1 %3699, %v2034_v57   ;;  %2187 = vperm.xlu0 %3698, %v2033_v58  }
 0x24d   :  { %2202 = vperm.xlu1 %3699, %v2036_v59   ;;  %2197 = vperm.xlu0 %3698, %v2035_v60   ;;  %v2464_v59 = vld [vmem:[%s4512_s5 + $0x28] sm:$0xff] }
 0x251   :  { %2212 = vperm.xlu1 %3699, %v2038_v61   ;;  %2207 = vperm.xlu0 %3698, %v2037_v62   ;;  %v2463_v61 = vld [vmem:[%s4512_s5 + $0x20] sm:$0xff] }
 0x255   :  { %2222 = vperm.xlu1 %3699, %v2040_v63   ;;  %2217 = vperm.xlu0 %3698, %v2039_v0  }
 0x259   :  { %2232 = vperm.xlu1 %3699, %v2042_v1   ;;  %2227 = vperm.xlu0 %3698, %v2041_v2  }
 0x25d   :  { %2242 = vperm.xlu1 %3699, %v2044_v3   ;;  %2237 = vperm.xlu0 %3698, %v2043_v4   ;;  %v1954_v3 = vld [vmem:[#allocation2 + $0x38] sm:$0xff]  ;;  %v1953_v4 = vld [vmem:[#allocation2 + $0x30] sm:$0xff] }
 0x261   :  { %2252 = vperm.xlu1 %3699, %v2046_v5   ;;  %2247 = vperm.xlu0 %3698, %v2045_v6  }
 0x265   :  { %2262 = vperm.xlu1 %3699, %v2048_v7   ;;  %2257 = vperm.xlu0 %3698, %v2047_v8  }
 0x269   :  { %2272 = vperm.xlu1 %3699, %v2050_v9   ;;  %2267 = vperm.xlu0 %3698, %v2049_v10   ;;  %v2466_v9 = vld [vmem:[%s4512_s5 + $0x38] sm:$0xff] }
 0x26d   :  { %2282 = vperm.xlu1 %3699, %v2052_v11   ;;  %2277 = vperm.xlu0 %3698, %v2051_v12   ;;  %v2465_v11 = vld [vmem:[%s4512_s5 + $0x30] sm:$0xff] }
 0x271   :  { %2292 = vperm.xlu1 %3699, %v2054_v13   ;;  %2287 = vperm.xlu0 %3698, %v2053_v14  }
 0x275   :  { %2302 = vperm.xlu1 %3699, %v2056_v15   ;;  %2297 = vperm.xlu0 %3698, %v2055_v16  }
 0x279   :  { %2312 = vperm.xlu1 %3699, %v2058_v17   ;;  %2307 = vperm.xlu0 %3698, %v2057_v18   ;;  %v1956_v17 = vld [vmem:[#allocation2 + $0x48] sm:$0xff]  ;;  %v1955_v18 = vld [vmem:[#allocation2 + $0x40] sm:$0xff] }
 0x27d   :  { %2322 = vperm.xlu1 %3699, %v2060_v19   ;;  %2317 = vperm.xlu0 %3698, %v2059_v20  }
 0x281   :  { %2332 = vperm.xlu1 %3699, %v2062_v21   ;;  %2327 = vperm.xlu0 %3698, %v2061_v22   ;;  %v2468_v22 = vld [vmem:[%s4512_s5 + $0x48] sm:$0xff] }
 0x285   :  { %2342 = vperm.xlu1 %3699, %v2064_v23   ;;  %2337 = vperm.xlu0 %3698, %v2063_v24   ;;  %v2467_v24 = vld [vmem:[%s4512_s5 + $0x40] sm:$0xff] }
 0x289   :  { %2352 = vperm.xlu1 %3699, %v2066_v25   ;;  %2347 = vperm.xlu0 %3698, %v2065_v26  }
 0x28d   :  { %2362 = vperm.xlu1 %3699, %v2068_v27   ;;  %2357 = vperm.xlu0 %3698, %v2067_v28  }
 0x291   :  { %2372 = vperm.xlu1 %3699, %v2070_v29   ;;  %2367 = vperm.xlu0 %3698, %v2069_v30   ;;  %v1958_v30 = vld [vmem:[#allocation2 + $0x58] sm:$0xff] }
 0x295   :  { %2382 = vperm.xlu1 %3699, %v2072_v31   ;;  %2377 = vperm.xlu0 %3698, %v2071_v32   ;;  %v1957_v31 = vld [vmem:[#allocation2 + $0x50] sm:$0xff] }
 0x299   :  { %2392 = vperm.xlu1 %3699, %v2074_v33   ;;  %2387 = vperm.xlu0 %3698, %v2073_v34  }
 0x29c   :  { %v2088_v37 = vpop.permute.xlu1 %2087  ;;  %v2078_v38 = vpop.permute.xlu0 %2077 }
 0x29d   :  { %v2397_v40 = vmul.f32 %v2088_v37, %v1949_v35  ;;  %v2395_v42 = vmul.f32 %v2078_v38, %v1947_v36  ;;  %v2470_v35 = vld [vmem:[%s4512_s5 + $0x58] sm:$0xff]  ;;  %v2469_v37 = vld [vmem:[%s4512_s5 + $0x50] sm:$0xff] }
 0x29f   :  { %v2525_v45 = vadd.f32 %v2461_v39, %v2397_v40  ;;  %v2523_v46 = vadd.f32 %v2459_v41, %v2395_v42 }
 0x2a0   :  { %v2093_v48 = vpop.permute.xlu1 %2092  ;;  %v2083_v50 = vpop.permute.xlu0 %2082 }
 0x2a1   :  { %v2398_v51 = vmul.f32 %v2093_v48, %v1950_v43  ;;  %v2396_v52 = vmul.f32 %v2083_v50, %v1948_v44  ;;  %v2589_v57 = vmax.f32 %v2525_v45, 0.0  ;;  %v2587_v58 = vmax.f32 %v2523_v46, 0.0  ;;  %v1960_v43 = vld [vmem:[#allocation2 + $0x68] sm:$0xff]  ;;  %v1959_v44 = vld [vmem:[#allocation2 + $0x60] sm:$0xff] }
 0x2a2   :  { %v2472_v48 = vld [vmem:[%s4512_s5 + $0x68] sm:$0xff]  ;;  %v2471_v50 = vld [vmem:[%s4512_s5 + $0x60] sm:$0xff] }
 0x2a3   :  { %v2526_v55 = vadd.f32 %v2462_v47, %v2398_v51  ;;  %v2524_v56 = vadd.f32 %v2460_v49, %v2396_v52 }
 0x2a4   :  { %v2103_v60 = vpop.permute.xlu1 %2102  ;;  %v2098_v62 = vpop.permute.xlu0 %2097 }
 0x2a5   :  { %v2590_v63 = vmax.f32 %v2526_v55, 0.0  ;;  %v2588_v0 = vmax.f32 %v2524_v56, 0.0  ;;  %v2400_v1 = vmul.f32 %v2103_v60, %v1952_v53  ;;  %v2399_v2 = vmul.f32 %v2098_v62, %v1951_v54  ;;  %v1962_v56 = vld [vmem:[#allocation2 + $0x78] sm:$0xff] }
 0x2a7   :  { %v3288_v5 = vpack.c.bf16 %v2590_v63, %v2589_v57  ;;  %v3283_v6 = vpack.c.bf16 %v2588_v0, %v2587_v58  ;;  %v2528_v7 = vadd.f32 %v2464_v59, %v2400_v1  ;;  %v2527_v8 = vadd.f32 %v2463_v61, %v2399_v2  ;;  %v1961_v57 = vld [vmem:[#allocation2 + $0x70] sm:$0xff]  ;;  %v2474_v61 = vld [vmem:[%s4512_s5 + $0x78] sm:$0xff] }
 0x2a8   :  { %v2113_v10 = vpop.permute.xlu1 %2112  ;;  %v2108_v12 = vpop.permute.xlu0 %2107  ;;  %v2473_v63 = vld [vmem:[%s4512_s5 + $0x70] sm:$0xff] }
 0x2a9   :  { %3440 = vst [vmem:[%s4513_s6 + $0x8] sm:$0xff] %v3288_v5   ;;  %3284 = vst [vmem:[%s4513_s6] sm:$0xff] %v3283_v6   ;;  %v2592_v13 = vmax.f32 %v2528_v7, 0.0  ;;  %v2591_v14 = vmax.f32 %v2527_v8, 0.0  ;;  %v2402_v15 = vmul.f32 %v2113_v10, %v1954_v3  ;;  %v2401_v16 = vmul.f32 %v2108_v12, %v1953_v4  ;;  %v1964_v5 = vld [vmem:[#allocation2 + $0x88] sm:$0xff]  ;;  %v1963_v6 = vld [vmem:[#allocation2 + $0x80] sm:$0xff] }
 0x2aa   :  { %v2476_v10 = vld [vmem:[%s4512_s5 + $0x88] sm:$0xff]  ;;  %v2475_v12 = vld [vmem:[%s4512_s5 + $0x80] sm:$0xff] }
 0x2ab   :  { %v3293_v19 = vpack.c.bf16 %v2592_v13, %v2591_v14  ;;  %v2530_v20 = vadd.f32 %v2466_v9, %v2402_v15  ;;  %v2529_v21 = vadd.f32 %v2465_v11, %v2401_v16 }
 0x2ac   :  { %v2123_v23 = vpop.permute.xlu1 %2122  ;;  %v2118_v25 = vpop.permute.xlu0 %2117 }
 0x2ad   :  { %3441 = vst [vmem:[%s4513_s6 + $0x10] sm:$0xff] %v3293_v19   ;;  %v2594_v26 = vmax.f32 %v2530_v20, 0.0  ;;  %v2593_v27 = vmax.f32 %v2529_v21, 0.0  ;;  %v2404_v28 = vmul.f32 %v2123_v23, %v1956_v17  ;;  %v2403_v29 = vmul.f32 %v2118_v25, %v1955_v18  ;;  %v1966_v18 = vld [vmem:[#allocation2 + $0x98] sm:$0xff]  ;;  %v1965_v19 = vld [vmem:[#allocation2 + $0x90] sm:$0xff] }
 0x2ae   :  { %v2478_v23 = vld [vmem:[%s4512_s5 + $0x98] sm:$0xff]  ;;  %v2477_v25 = vld [vmem:[%s4512_s5 + $0x90] sm:$0xff] }
 0x2af   :  { %v3298_v32 = vpack.c.bf16 %v2594_v26, %v2593_v27  ;;  %v2532_v33 = vadd.f32 %v2468_v22, %v2404_v28  ;;  %v2531_v34 = vadd.f32 %v2467_v24, %v2403_v29 }
 0x2b0   :  { %v2133_v36 = vpop.permute.xlu1 %2132  ;;  %v2128_v38 = vpop.permute.xlu0 %2127 }
 0x2b1   :  { %3442 = vst [vmem:[%s4513_s6 + $0x18] sm:$0xff] %v3298_v32   ;;  %v2596_v39 = vmax.f32 %v2532_v33, 0.0  ;;  %v2595_v40 = vmax.f32 %v2531_v34, 0.0  ;;  %v2406_v41 = vmul.f32 %v2133_v36, %v1958_v30  ;;  %v2405_v42 = vmul.f32 %v2128_v38, %v1957_v31  ;;  %v1968_v31 = vld [vmem:[#allocation2 + $0xa8] sm:$0xff]  ;;  %v1967_v32 = vld [vmem:[#allocation2 + $0xa0] sm:$0xff] }
 0x2b2   :  { %v2480_v36 = vld [vmem:[%s4512_s5 + $0xa8] sm:$0xff]  ;;  %v2479_v38 = vld [vmem:[%s4512_s5 + $0xa0] sm:$0xff] }
 0x2b3   :  { %v3303_v45 = vpack.c.bf16 %v2596_v39, %v2595_v40  ;;  %v2534_v46 = vadd.f32 %v2470_v35, %v2406_v41  ;;  %v2533_v47 = vadd.f32 %v2469_v37, %v2405_v42 }
 0x2b4   :  { %v2143_v49 = vpop.permute.xlu1 %2142  ;;  %v2138_v51 = vpop.permute.xlu0 %2137 }
 0x2b5   :  { %3443 = vst [vmem:[%s4513_s6 + $0x20] sm:$0xff] %v3303_v45   ;;  %v2598_v52 = vmax.f32 %v2534_v46, 0.0  ;;  %v2597_v53 = vmax.f32 %v2533_v47, 0.0  ;;  %v2408_v54 = vmul.f32 %v2143_v49, %v1960_v43  ;;  %v2407_v55 = vmul.f32 %v2138_v51, %v1959_v44  ;;  %v1970_v44 = vld [vmem:[#allocation2 + $0xb8] sm:$0xff]  ;;  %v1969_v45 = vld [vmem:[#allocation2 + $0xb0] sm:$0xff] }
 0x2b6   :  { %v2482_v49 = vld [vmem:[%s4512_s5 + $0xb8] sm:$0xff]  ;;  %v2481_v51 = vld [vmem:[%s4512_s5 + $0xb0] sm:$0xff] }
 0x2b7   :  { %v3308_v58 = vpack.c.bf16 %v2598_v52, %v2597_v53  ;;  %v2536_v59 = vadd.f32 %v2472_v48, %v2408_v54  ;;  %v2535_v60 = vadd.f32 %v2471_v50, %v2407_v55 }
 0x2b8   :  { %v2153_v62 = vpop.permute.xlu1 %2152  ;;  %v2148_v0 = vpop.permute.xlu0 %2147 }
 0x2b9   :  { %3444 = vst [vmem:[%s4513_s6 + $0x28] sm:$0xff] %v3308_v58   ;;  %v2600_v1 = vmax.f32 %v2536_v59, 0.0  ;;  %v2599_v2 = vmax.f32 %v2535_v60, 0.0  ;;  %v2410_v3 = vmul.f32 %v2153_v62, %v1962_v56  ;;  %v2409_v4 = vmul.f32 %v2148_v0, %v1961_v57  ;;  %v1972_v57 = vld [vmem:[#allocation2 + $0xc8] sm:$0xff]  ;;  %v1971_v58 = vld [vmem:[#allocation2 + $0xc0] sm:$0xff] }
 0x2ba   :  { %v2484_v62 = vld [vmem:[%s4512_s5 + $0xc8] sm:$0xff]  ;;  %v2483_v0 = vld [vmem:[%s4512_s5 + $0xc0] sm:$0xff] }
 0x2bb   :  { %v3313_v7 = vpack.c.bf16 %v2600_v1, %v2599_v2  ;;  %v2538_v8 = vadd.f32 %v2474_v61, %v2410_v3  ;;  %v2537_v9 = vadd.f32 %v2473_v63, %v2409_v4 }
 0x2bc   :  { %v2163_v11 = vpop.permute.xlu1 %2162  ;;  %v2158_v13 = vpop.permute.xlu0 %2157 }
 0x2bd   :  { %3445 = vst [vmem:[%s4513_s6 + $0x30] sm:$0xff] %v3313_v7   ;;  %v2602_v14 = vmax.f32 %v2538_v8, 0.0  ;;  %v2601_v15 = vmax.f32 %v2537_v9, 0.0  ;;  %v2412_v16 = vmul.f32 %v2163_v11, %v1964_v5  ;;  %v2411_v17 = vmul.f32 %v2158_v13, %v1963_v6  ;;  %v1974_v6 = vld [vmem:[#allocation2 + $0xd8] sm:$0xff]  ;;  %v1973_v7 = vld [vmem:[#allocation2 + $0xd0] sm:$0xff] }
 0x2be   :  { %v2486_v11 = vld [vmem:[%s4512_s5 + $0xd8] sm:$0xff]  ;;  %v2485_v13 = vld [vmem:[%s4512_s5 + $0xd0] sm:$0xff] }
 0x2bf   :  { %v3318_v20 = vpack.c.bf16 %v2602_v14, %v2601_v15  ;;  %v2540_v21 = vadd.f32 %v2476_v10, %v2412_v16  ;;  %v2539_v22 = vadd.f32 %v2475_v12, %v2411_v17 }
 0x2c0   :  { %v2173_v24 = vpop.permute.xlu1 %2172  ;;  %v2168_v26 = vpop.permute.xlu0 %2167 }
 0x2c1   :  { %3446 = vst [vmem:[%s4513_s6 + $0x38] sm:$0xff] %v3318_v20   ;;  %v2604_v27 = vmax.f32 %v2540_v21, 0.0  ;;  %v2603_v28 = vmax.f32 %v2539_v22, 0.0  ;;  %v2414_v29 = vmul.f32 %v2173_v24, %v1966_v18  ;;  %v2413_v30 = vmul.f32 %v2168_v26, %v1965_v19  ;;  %v1976_v19 = vld [vmem:[#allocation2 + $0xe8] sm:$0xff]  ;;  %v1975_v20 = vld [vmem:[#allocation2 + $0xe0] sm:$0xff] }
 0x2c2   :  { %v2488_v24 = vld [vmem:[%s4512_s5 + $0xe8] sm:$0xff]  ;;  %v2487_v26 = vld [vmem:[%s4512_s5 + $0xe0] sm:$0xff] }
 0x2c3   :  { %v3323_v33 = vpack.c.bf16 %v2604_v27, %v2603_v28  ;;  %v2542_v34 = vadd.f32 %v2478_v23, %v2414_v29  ;;  %v2541_v35 = vadd.f32 %v2477_v25, %v2413_v30 }
 0x2c4   :  { %v2183_v37 = vpop.permute.xlu1 %2182  ;;  %v2178_v39 = vpop.permute.xlu0 %2177 }
 0x2c5   :  { %3447 = vst [vmem:[%s4513_s6 + $0x40] sm:$0xff] %v3323_v33   ;;  %v2606_v40 = vmax.f32 %v2542_v34, 0.0  ;;  %v2605_v41 = vmax.f32 %v2541_v35, 0.0  ;;  %v2416_v42 = vmul.f32 %v2183_v37, %v1968_v31  ;;  %v2415_v43 = vmul.f32 %v2178_v39, %v1967_v32  ;;  %v1978_v32 = vld [vmem:[#allocation2 + $0xf8] sm:$0xff]  ;;  %v1977_v33 = vld [vmem:[#allocation2 + $0xf0] sm:$0xff] }
 0x2c6   :  { %v2490_v37 = vld [vmem:[%s4512_s5 + $0xf8] sm:$0xff]  ;;  %v2489_v39 = vld [vmem:[%s4512_s5 + $0xf0] sm:$0xff] }
 0x2c7   :  { %v3328_v46 = vpack.c.bf16 %v2606_v40, %v2605_v41  ;;  %v2544_v47 = vadd.f32 %v2480_v36, %v2416_v42  ;;  %v2543_v48 = vadd.f32 %v2479_v38, %v2415_v43 }
 0x2c8   :  { %v2193_v50 = vpop.permute.xlu1 %2192  ;;  %v2188_v52 = vpop.permute.xlu0 %2187 }
 0x2c9   :  { %3448 = vst [vmem:[%s4513_s6 + $0x48] sm:$0xff] %v3328_v46   ;;  %v2608_v53 = vmax.f32 %v2544_v47, 0.0  ;;  %v2607_v54 = vmax.f32 %v2543_v48, 0.0  ;;  %v2418_v55 = vmul.f32 %v2193_v50, %v1970_v44  ;;  %v2417_v56 = vmul.f32 %v2188_v52, %v1969_v45  ;;  %v1980_v45 = vld [vmem:[#allocation2 + $0x108] sm:$0xff]  ;;  %v1979_v46 = vld [vmem:[#allocation2 + $0x100] sm:$0xff] }
 0x2ca   :  { %v2492_v50 = vld [vmem:[%s4512_s5 + $0x108] sm:$0xff]  ;;  %v2491_v52 = vld [vmem:[%s4512_s5 + $0x100] sm:$0xff] }
 0x2cb   :  { %v3333_v59 = vpack.c.bf16 %v2608_v53, %v2607_v54  ;;  %v2546_v60 = vadd.f32 %v2482_v49, %v2418_v55  ;;  %v2545_v61 = vadd.f32 %v2481_v51, %v2417_v56 }
 0x2cc   :  { %v2203_v63 = vpop.permute.xlu1 %2202  ;;  %v2198_v1 = vpop.permute.xlu0 %2197 }
 0x2cd   :  { %3449 = vst [vmem:[%s4513_s6 + $0x50] sm:$0xff] %v3333_v59   ;;  %v2610_v2 = vmax.f32 %v2546_v60, 0.0  ;;  %v2609_v3 = vmax.f32 %v2545_v61, 0.0  ;;  %v2420_v4 = vmul.f32 %v2203_v63, %v1972_v57  ;;  %v2419_v5 = vmul.f32 %v2198_v1, %v1971_v58  ;;  %v1982_v58 = vld [vmem:[#allocation2 + $0x118] sm:$0xff]  ;;  %v1981_v59 = vld [vmem:[#allocation2 + $0x110] sm:$0xff] }
 0x2ce   :  { %v2494_v63 = vld [vmem:[%s4512_s5 + $0x118] sm:$0xff]  ;;  %v2493_v1 = vld [vmem:[%s4512_s5 + $0x110] sm:$0xff] }
 0x2cf   :  { %v3338_v8 = vpack.c.bf16 %v2610_v2, %v2609_v3  ;;  %v2548_v9 = vadd.f32 %v2484_v62, %v2420_v4  ;;  %v2547_v10 = vadd.f32 %v2483_v0, %v2419_v5 }
 0x2d0   :  { %v2213_v12 = vpop.permute.xlu1 %2212  ;;  %v2208_v14 = vpop.permute.xlu0 %2207 }
 0x2d1   :  { %3450 = vst [vmem:[%s4513_s6 + $0x58] sm:$0xff] %v3338_v8   ;;  %v2612_v15 = vmax.f32 %v2548_v9, 0.0  ;;  %v2611_v16 = vmax.f32 %v2547_v10, 0.0  ;;  %v2422_v17 = vmul.f32 %v2213_v12, %v1974_v6  ;;  %v2421_v18 = vmul.f32 %v2208_v14, %v1973_v7  ;;  %v1984_v7 = vld [vmem:[#allocation2 + $0x128] sm:$0xff]  ;;  %v1983_v8 = vld [vmem:[#allocation2 + $0x120] sm:$0xff] }
 0x2d2   :  { %v2496_v12 = vld [vmem:[%s4512_s5 + $0x128] sm:$0xff]  ;;  %v2495_v14 = vld [vmem:[%s4512_s5 + $0x120] sm:$0xff] }
 0x2d3   :  { %v3343_v21 = vpack.c.bf16 %v2612_v15, %v2611_v16  ;;  %v2550_v22 = vadd.f32 %v2486_v11, %v2422_v17  ;;  %v2549_v23 = vadd.f32 %v2485_v13, %v2421_v18 }
 0x2d4   :  { %v2223_v25 = vpop.permute.xlu1 %2222  ;;  %v2218_v27 = vpop.permute.xlu0 %2217 }
 0x2d5   :  { %3451 = vst [vmem:[%s4513_s6 + $0x60] sm:$0xff] %v3343_v21   ;;  %v2614_v28 = vmax.f32 %v2550_v22, 0.0  ;;  %v2613_v29 = vmax.f32 %v2549_v23, 0.0  ;;  %v2424_v30 = vmul.f32 %v2223_v25, %v1976_v19  ;;  %v2423_v31 = vmul.f32 %v2218_v27, %v1975_v20  ;;  %v1986_v20 = vld [vmem:[#allocation2 + $0x138] sm:$0xff]  ;;  %v1985_v21 = vld [vmem:[#allocation2 + $0x130] sm:$0xff] }
 0x2d6   :  { %v2498_v25 = vld [vmem:[%s4512_s5 + $0x138] sm:$0xff]  ;;  %v2497_v27 = vld [vmem:[%s4512_s5 + $0x130] sm:$0xff] }
 0x2d7   :  { %v3348_v34 = vpack.c.bf16 %v2614_v28, %v2613_v29  ;;  %v2552_v35 = vadd.f32 %v2488_v24, %v2424_v30  ;;  %v2551_v36 = vadd.f32 %v2487_v26, %v2423_v31 }
 0x2d8   :  { %v2233_v38 = vpop.permute.xlu1 %2232  ;;  %v2228_v40 = vpop.permute.xlu0 %2227 }
 0x2d9   :  { %3452 = vst [vmem:[%s4513_s6 + $0x68] sm:$0xff] %v3348_v34   ;;  %v2616_v41 = vmax.f32 %v2552_v35, 0.0  ;;  %v2615_v42 = vmax.f32 %v2551_v36, 0.0  ;;  %v2426_v43 = vmul.f32 %v2233_v38, %v1978_v32  ;;  %v2425_v44 = vmul.f32 %v2228_v40, %v1977_v33  ;;  %v1988_v33 = vld [vmem:[#allocation2 + $0x148] sm:$0xff]  ;;  %v1987_v34 = vld [vmem:[#allocation2 + $0x140] sm:$0xff] }
 0x2da   :  { %v2500_v38 = vld [vmem:[%s4512_s5 + $0x148] sm:$0xff]  ;;  %v2499_v40 = vld [vmem:[%s4512_s5 + $0x140] sm:$0xff] }
 0x2db   :  { %v3353_v47 = vpack.c.bf16 %v2616_v41, %v2615_v42  ;;  %v2554_v48 = vadd.f32 %v2490_v37, %v2426_v43  ;;  %v2553_v49 = vadd.f32 %v2489_v39, %v2425_v44 }
 0x2dc   :  { %v2243_v51 = vpop.permute.xlu1 %2242  ;;  %v2238_v53 = vpop.permute.xlu0 %2237 }
 0x2dd   :  { %3453 = vst [vmem:[%s4513_s6 + $0x70] sm:$0xff] %v3353_v47   ;;  %v2618_v54 = vmax.f32 %v2554_v48, 0.0  ;;  %v2617_v55 = vmax.f32 %v2553_v49, 0.0  ;;  %v2428_v56 = vmul.f32 %v2243_v51, %v1980_v45  ;;  %v2427_v57 = vmul.f32 %v2238_v53, %v1979_v46  ;;  %v1990_v46 = vld [vmem:[#allocation2 + $0x158] sm:$0xff]  ;;  %v1989_v47 = vld [vmem:[#allocation2 + $0x150] sm:$0xff] }
 0x2de   :  { %v2502_v51 = vld [vmem:[%s4512_s5 + $0x158] sm:$0xff]  ;;  %v2501_v53 = vld [vmem:[%s4512_s5 + $0x150] sm:$0xff] }
 0x2df   :  { %v3358_v60 = vpack.c.bf16 %v2618_v54, %v2617_v55  ;;  %v2556_v61 = vadd.f32 %v2492_v50, %v2428_v56  ;;  %v2555_v62 = vadd.f32 %v2491_v52, %v2427_v57 }
 0x2e0   :  { %v2253_v0 = vpop.permute.xlu1 %2252  ;;  %v2248_v2 = vpop.permute.xlu0 %2247 }
 0x2e1   :  { %3454 = vst [vmem:[%s4513_s6 + $0x78] sm:$0xff] %v3358_v60   ;;  %v2620_v3 = vmax.f32 %v2556_v61, 0.0  ;;  %v2619_v4 = vmax.f32 %v2555_v62, 0.0  ;;  %v2430_v5 = vmul.f32 %v2253_v0, %v1982_v58  ;;  %v2429_v6 = vmul.f32 %v2248_v2, %v1981_v59  ;;  %v1992_v59 = vld [vmem:[#allocation2 + $0x168] sm:$0xff]  ;;  %v1991_v60 = vld [vmem:[#allocation2 + $0x160] sm:$0xff] }
 0x2e2   :  { %v2504_v0 = vld [vmem:[%s4512_s5 + $0x168] sm:$0xff]  ;;  %v2503_v2 = vld [vmem:[%s4512_s5 + $0x160] sm:$0xff] }
 0x2e3   :  { %v3363_v9 = vpack.c.bf16 %v2620_v3, %v2619_v4  ;;  %v2558_v10 = vadd.f32 %v2494_v63, %v2430_v5  ;;  %v2557_v11 = vadd.f32 %v2493_v1, %v2429_v6 }
 0x2e4   :  { %v2263_v13 = vpop.permute.xlu1 %2262  ;;  %v2258_v15 = vpop.permute.xlu0 %2257 }
 0x2e5   :  { %3455 = vst [vmem:[%s4513_s6 + $0x80] sm:$0xff] %v3363_v9   ;;  %v2622_v16 = vmax.f32 %v2558_v10, 0.0  ;;  %v2621_v17 = vmax.f32 %v2557_v11, 0.0  ;;  %v2432_v18 = vmul.f32 %v2263_v13, %v1984_v7  ;;  %v2431_v19 = vmul.f32 %v2258_v15, %v1983_v8  ;;  %v1994_v8 = vld [vmem:[#allocation2 + $0x178] sm:$0xff]  ;;  %v1993_v9 = vld [vmem:[#allocation2 + $0x170] sm:$0xff] }
 0x2e6   :  { %v2506_v13 = vld [vmem:[%s4512_s5 + $0x178] sm:$0xff]  ;;  %v2505_v15 = vld [vmem:[%s4512_s5 + $0x170] sm:$0xff] }
 0x2e7   :  { %v3368_v22 = vpack.c.bf16 %v2622_v16, %v2621_v17  ;;  %v2560_v23 = vadd.f32 %v2496_v12, %v2432_v18  ;;  %v2559_v24 = vadd.f32 %v2495_v14, %v2431_v19 }
 0x2e8   :  { %v2273_v26 = vpop.permute.xlu1 %2272  ;;  %v2268_v28 = vpop.permute.xlu0 %2267 }
 0x2e9   :  { %3456 = vst [vmem:[%s4513_s6 + $0x88] sm:$0xff] %v3368_v22   ;;  %v2624_v29 = vmax.f32 %v2560_v23, 0.0  ;;  %v2623_v30 = vmax.f32 %v2559_v24, 0.0  ;;  %v2434_v31 = vmul.f32 %v2273_v26, %v1986_v20  ;;  %v2433_v32 = vmul.f32 %v2268_v28, %v1985_v21  ;;  %v1996_v21 = vld [vmem:[#allocation2 + $0x188] sm:$0xff]  ;;  %v1995_v22 = vld [vmem:[#allocation2 + $0x180] sm:$0xff] }
 0x2ea   :  { %v2508_v26 = vld [vmem:[%s4512_s5 + $0x188] sm:$0xff]  ;;  %v2507_v28 = vld [vmem:[%s4512_s5 + $0x180] sm:$0xff] }
 0x2eb   :  { %v3373_v35 = vpack.c.bf16 %v2624_v29, %v2623_v30  ;;  %v2562_v36 = vadd.f32 %v2498_v25, %v2434_v31  ;;  %v2561_v37 = vadd.f32 %v2497_v27, %v2433_v32 }
 0x2ec   :  { %v2283_v39 = vpop.permute.xlu1 %2282  ;;  %v2278_v41 = vpop.permute.xlu0 %2277 }
 0x2ed   :  { %3457 = vst [vmem:[%s4513_s6 + $0x90] sm:$0xff] %v3373_v35   ;;  %v2626_v42 = vmax.f32 %v2562_v36, 0.0  ;;  %v2625_v43 = vmax.f32 %v2561_v37, 0.0  ;;  %v2436_v44 = vmul.f32 %v2283_v39, %v1988_v33  ;;  %v2435_v45 = vmul.f32 %v2278_v41, %v1987_v34  ;;  %v1998_v34 = vld [vmem:[#allocation2 + $0x198] sm:$0xff]  ;;  %v1997_v35 = vld [vmem:[#allocation2 + $0x190] sm:$0xff] }
 0x2ee   :  { %v2510_v39 = vld [vmem:[%s4512_s5 + $0x198] sm:$0xff]  ;;  %v2509_v41 = vld [vmem:[%s4512_s5 + $0x190] sm:$0xff] }
 0x2ef   :  { %v3378_v48 = vpack.c.bf16 %v2626_v42, %v2625_v43  ;;  %v2564_v49 = vadd.f32 %v2500_v38, %v2436_v44  ;;  %v2563_v50 = vadd.f32 %v2499_v40, %v2435_v45 }
 0x2f0   :  { %v2293_v52 = vpop.permute.xlu1 %2292  ;;  %v2288_v54 = vpop.permute.xlu0 %2287 }
 0x2f1   :  { %3458 = vst [vmem:[%s4513_s6 + $0x98] sm:$0xff] %v3378_v48   ;;  %v2628_v55 = vmax.f32 %v2564_v49, 0.0  ;;  %v2627_v56 = vmax.f32 %v2563_v50, 0.0  ;;  %v2438_v57 = vmul.f32 %v2293_v52, %v1990_v46  ;;  %v2437_v58 = vmul.f32 %v2288_v54, %v1989_v47  ;;  %v2000_v47 = vld [vmem:[#allocation2 + $0x1a8] sm:$0xff]  ;;  %v1999_v48 = vld [vmem:[#allocation2 + $0x1a0] sm:$0xff] }
 0x2f2   :  { %v2512_v52 = vld [vmem:[%s4512_s5 + $0x1a8] sm:$0xff]  ;;  %v2511_v54 = vld [vmem:[%s4512_s5 + $0x1a0] sm:$0xff] }
 0x2f3   :  { %v3383_v61 = vpack.c.bf16 %v2628_v55, %v2627_v56  ;;  %v2566_v62 = vadd.f32 %v2502_v51, %v2438_v57  ;;  %v2565_v63 = vadd.f32 %v2501_v53, %v2437_v58 }
 0x2f4   :  { %v2303_v1 = vpop.permute.xlu1 %2302  ;;  %v2298_v3 = vpop.permute.xlu0 %2297 }
 0x2f5   :  { %3459 = vst [vmem:[%s4513_s6 + $0xa0] sm:$0xff] %v3383_v61   ;;  %v2630_v4 = vmax.f32 %v2566_v62, 0.0  ;;  %v2629_v5 = vmax.f32 %v2565_v63, 0.0  ;;  %v2440_v6 = vmul.f32 %v2303_v1, %v1992_v59  ;;  %v2439_v7 = vmul.f32 %v2298_v3, %v1991_v60  ;;  %v2002_v60 = vld [vmem:[#allocation2 + $0x1b8] sm:$0xff]  ;;  %v2001_v61 = vld [vmem:[#allocation2 + $0x1b0] sm:$0xff] }
 0x2f6   :  { %v2514_v1 = vld [vmem:[%s4512_s5 + $0x1b8] sm:$0xff]  ;;  %v2513_v3 = vld [vmem:[%s4512_s5 + $0x1b0] sm:$0xff] }
 0x2f7   :  { %v3388_v10 = vpack.c.bf16 %v2630_v4, %v2629_v5  ;;  %v2568_v11 = vadd.f32 %v2504_v0, %v2440_v6  ;;  %v2567_v12 = vadd.f32 %v2503_v2, %v2439_v7 }
 0x2f8   :  { %v2313_v14 = vpop.permute.xlu1 %2312  ;;  %v2308_v16 = vpop.permute.xlu0 %2307 }
 0x2f9   :  { %3460 = vst [vmem:[%s4513_s6 + $0xa8] sm:$0xff] %v3388_v10   ;;  %v2632_v17 = vmax.f32 %v2568_v11, 0.0  ;;  %v2631_v18 = vmax.f32 %v2567_v12, 0.0  ;;  %v2442_v19 = vmul.f32 %v2313_v14, %v1994_v8  ;;  %v2441_v20 = vmul.f32 %v2308_v16, %v1993_v9  ;;  %v2004_v9 = vld [vmem:[#allocation2 + $0x1c8] sm:$0xff]  ;;  %v2003_v10 = vld [vmem:[#allocation2 + $0x1c0] sm:$0xff] }
 0x2fa   :  { %v2516_v14 = vld [vmem:[%s4512_s5 + $0x1c8] sm:$0xff]  ;;  %v2515_v16 = vld [vmem:[%s4512_s5 + $0x1c0] sm:$0xff] }
 0x2fb   :  { %v3393_v23 = vpack.c.bf16 %v2632_v17, %v2631_v18  ;;  %v2570_v24 = vadd.f32 %v2506_v13, %v2442_v19  ;;  %v2569_v25 = vadd.f32 %v2505_v15, %v2441_v20 }
 0x2fc   :  { %v2323_v27 = vpop.permute.xlu1 %2322  ;;  %v2318_v29 = vpop.permute.xlu0 %2317 }
 0x2fd   :  { %3461 = vst [vmem:[%s4513_s6 + $0xb0] sm:$0xff] %v3393_v23   ;;  %v2634_v30 = vmax.f32 %v2570_v24, 0.0  ;;  %v2633_v31 = vmax.f32 %v2569_v25, 0.0  ;;  %v2444_v32 = vmul.f32 %v2323_v27, %v1996_v21  ;;  %v2443_v33 = vmul.f32 %v2318_v29, %v1995_v22  ;;  %v2006_v22 = vld [vmem:[#allocation2 + $0x1d8] sm:$0xff]  ;;  %v2005_v23 = vld [vmem:[#allocation2 + $0x1d0] sm:$0xff] }
 0x2fe   :  { %v2518_v27 = vld [vmem:[%s4512_s5 + $0x1d8] sm:$0xff]  ;;  %v2517_v29 = vld [vmem:[%s4512_s5 + $0x1d0] sm:$0xff] }
 0x2ff   :  { %v3398_v36 = vpack.c.bf16 %v2634_v30, %v2633_v31  ;;  %v2572_v37 = vadd.f32 %v2508_v26, %v2444_v32  ;;  %v2571_v38 = vadd.f32 %v2507_v28, %v2443_v33 }
 0x300   :  { %v2333_v40 = vpop.permute.xlu1 %2332  ;;  %v2328_v42 = vpop.permute.xlu0 %2327 }
 0x301   :  { %3462 = vst [vmem:[%s4513_s6 + $0xb8] sm:$0xff] %v3398_v36   ;;  %v2636_v43 = vmax.f32 %v2572_v37, 0.0  ;;  %v2635_v44 = vmax.f32 %v2571_v38, 0.0  ;;  %v2446_v45 = vmul.f32 %v2333_v40, %v1998_v34  ;;  %v2445_v46 = vmul.f32 %v2328_v42, %v1997_v35  ;;  %v2008_v35 = vld [vmem:[#allocation2 + $0x1e8] sm:$0xff]  ;;  %v2007_v36 = vld [vmem:[#allocation2 + $0x1e0] sm:$0xff] }
 0x302   :  { %v2520_v40 = vld [vmem:[%s4512_s5 + $0x1e8] sm:$0xff]  ;;  %v2519_v42 = vld [vmem:[%s4512_s5 + $0x1e0] sm:$0xff] }
 0x303   :  { %v3403_v49 = vpack.c.bf16 %v2636_v43, %v2635_v44  ;;  %v2574_v50 = vadd.f32 %v2510_v39, %v2446_v45  ;;  %v2573_v51 = vadd.f32 %v2509_v41, %v2445_v46 }
 0x304   :  { %v2343_v53 = vpop.permute.xlu1 %2342  ;;  %v2338_v55 = vpop.permute.xlu0 %2337 }
 0x305   :  { %3463 = vst [vmem:[%s4513_s6 + $0xc0] sm:$0xff] %v3403_v49   ;;  %v2638_v56 = vmax.f32 %v2574_v50, 0.0  ;;  %v2637_v57 = vmax.f32 %v2573_v51, 0.0  ;;  %v2448_v58 = vmul.f32 %v2343_v53, %v2000_v47  ;;  %v2447_v59 = vmul.f32 %v2338_v55, %v1999_v48  ;;  %v2010_v48 = vld [vmem:[#allocation2 + $0x1f8] sm:$0xff]  ;;  %v2009_v49 = vld [vmem:[#allocation2 + $0x1f0] sm:$0xff] }
 0x306   :  { %v2522_v53 = vld [vmem:[%s4512_s5 + $0x1f8] sm:$0xff]  ;;  %v2521_v55 = vld [vmem:[%s4512_s5 + $0x1f0] sm:$0xff] }
 0x307   :  { %v3408_v62 = vpack.c.bf16 %v2638_v56, %v2637_v57  ;;  %v2576_v63 = vadd.f32 %v2512_v52, %v2448_v58  ;;  %v2575_v0 = vadd.f32 %v2511_v54, %v2447_v59 }
 0x308   :  { %v2353_v2 = vpop.permute.xlu1 %2352  ;;  %v2348_v4 = vpop.permute.xlu0 %2347 }
 0x309   :  { %3464 = vst [vmem:[%s4513_s6 + $0xc8] sm:$0xff] %v3408_v62   ;;  %v2640_v5 = vmax.f32 %v2576_v63, 0.0  ;;  %v2639_v6 = vmax.f32 %v2575_v0, 0.0  ;;  %v2450_v7 = vmul.f32 %v2353_v2, %v2002_v60  ;;  %v2449_v8 = vmul.f32 %v2348_v4, %v2001_v61 }
 0x30b   :  { %v3413_v11 = vpack.c.bf16 %v2640_v5, %v2639_v6  ;;  %v2578_v12 = vadd.f32 %v2514_v1, %v2450_v7  ;;  %v2577_v13 = vadd.f32 %v2513_v3, %v2449_v8 }
 0x30c   :  { %v2363_v15 = vpop.permute.xlu1 %2362  ;;  %v2358_v17 = vpop.permute.xlu0 %2357 }
 0x30d   :  { %3465 = vst [vmem:[%s4513_s6 + $0xd0] sm:$0xff] %v3413_v11   ;;  %v2642_v18 = vmax.f32 %v2578_v12, 0.0  ;;  %v2641_v19 = vmax.f32 %v2577_v13, 0.0  ;;  %v2452_v20 = vmul.f32 %v2363_v15, %v2004_v9  ;;  %v2451_v21 = vmul.f32 %v2358_v17, %v2003_v10 }
 0x30f   :  { %v3418_v24 = vpack.c.bf16 %v2642_v18, %v2641_v19  ;;  %v2580_v25 = vadd.f32 %v2516_v14, %v2452_v20  ;;  %v2579_v26 = vadd.f32 %v2515_v16, %v2451_v21 }
 0x310   :  { %v2373_v28 = vpop.permute.xlu1 %2372  ;;  %v2368_v30 = vpop.permute.xlu0 %2367 }
 0x311   :  { %3466 = vst [vmem:[%s4513_s6 + $0xd8] sm:$0xff] %v3418_v24   ;;  %v2644_v31 = vmax.f32 %v2580_v25, 0.0  ;;  %v2643_v32 = vmax.f32 %v2579_v26, 0.0  ;;  %v2454_v33 = vmul.f32 %v2373_v28, %v2006_v22  ;;  %v2453_v34 = vmul.f32 %v2368_v30, %v2005_v23 }
 0x313   :  { %v3423_v37 = vpack.c.bf16 %v2644_v31, %v2643_v32  ;;  %v2582_v38 = vadd.f32 %v2518_v27, %v2454_v33  ;;  %v2581_v39 = vadd.f32 %v2517_v29, %v2453_v34 }
 0x314   :  { %v2383_v41 = vpop.permute.xlu1 %2382  ;;  %v2378_v43 = vpop.permute.xlu0 %2377 }
 0x315   :  { %3467 = vst [vmem:[%s4513_s6 + $0xe0] sm:$0xff] %v3423_v37   ;;  %v2646_v44 = vmax.f32 %v2582_v38, 0.0  ;;  %v2645_v45 = vmax.f32 %v2581_v39, 0.0  ;;  %v2456_v46 = vmul.f32 %v2383_v41, %v2008_v35  ;;  %v2455_v47 = vmul.f32 %v2378_v43, %v2007_v36 }
 0x317   :  { %v3428_v50 = vpack.c.bf16 %v2646_v44, %v2645_v45  ;;  %v2584_v51 = vadd.f32 %v2520_v40, %v2456_v46  ;;  %v2583_v52 = vadd.f32 %v2519_v42, %v2455_v47 }
 0x318   :  { %v2393_v54 = vpop.permute.xlu1 %2392  ;;  %v2388_v56 = vpop.permute.xlu0 %2387 }
 0x319   :  { %3468 = vst [vmem:[%s4513_s6 + $0xe8] sm:$0xff] %v3428_v50   ;;  %v2648_v57 = vmax.f32 %v2584_v51, 0.0  ;;  %v2647_v58 = vmax.f32 %v2583_v52, 0.0  ;;  %v2458_v59 = vmul.f32 %v2393_v54, %v2010_v48  ;;  %v2457_v60 = vmul.f32 %v2388_v56, %v2009_v49 }
 0x31b   :  { %v3433_v61 = vpack.c.bf16 %v2648_v57, %v2647_v58  ;;  %v2586_v62 = vadd.f32 %v2522_v53, %v2458_v59  ;;  %v2585_v63 = vadd.f32 %v2521_v55, %v2457_v60 }
 0x31d   :  { %3469 = vst [vmem:[%s4513_s6 + $0xf0] sm:$0xff] %v3433_v61   ;;  %v2650_v0 = vmax.f32 %v2586_v62, 0.0  ;;  %v2649_v1 = vmax.f32 %v2585_v63, 0.0 }
 0x31f   :  { %v3438_v2 = vpack.c.bf16 %v2650_v0, %v2649_v1 }
 0x321   :  { %3470 = vst [vmem:[%s4513_s6 + $0xf8] sm:$0xff] %v3438_v2  }

</bundles_post_ra>
